<compile_context>
chip_gen: v6e
topology: v6e:2x2x1
jax: 0.10.0
libtpu: 0.0.40
codegen_flags: <defaults>
</compile_context>

<pallas_src>
import functools

import jax
import jax.numpy as jnp
from jax import lax
from jax.experimental import pallas as pl
from jax.experimental.pallas import tpu as pltpu

EPS_LN = 1e-5  # PyTorch LayerNorm default

# contract last dims of both operands: A @ B^T without an explicit transpose
_NT_DIMS = (((1,), (1,)), ((), ()))


def _softmax_last(x):
    """Softmax over the last (lane) axis; divide goes to the EUP."""
    m = jnp.max(x, axis=-1, keepdims=True)
    e = jnp.exp(x - m)
    return e * pl.reciprocal(jnp.sum(e, axis=-1, keepdims=True), approx=True)


def _softmax_rows(x):
    """Softmax over axis 0 (rows) of a 2-D array."""
    m = jnp.max(x, axis=0, keepdims=True)
    e = jnp.exp(x - m)
    return e * pl.reciprocal(jnp.sum(e, axis=0, keepdims=True), approx=True)


def latentgnn_kernel(
    n_nodes,           # static: N (visible nodes per batch element)
    v2l_ref,           # (BB*N, C)
    l2v_ref,           # (BB*N, C)
    adj_ref,           # (BB, N, N)
    w_psi_v2l_ref,     # (C, D)  pre-transposed
    w_psi_l2v_ref,     # (C, D)  pre-transposed
    w_lat_ref,         # (C, C)  pre-transposed
    gamma_ref,         # (1, C)
    beta_ref,          # (1, C)
    w_vis_ref,         # (K, C, C)  each slice pre-transposed
    w_gc_ref,          # (C, C)  pre-transposed
    out_ref,           # (BB*N, C)
):
    f32 = jnp.float32
    N = n_nodes
    BB = adj_ref.shape[0]
    K = w_vis_ref.shape[0]

    v2l_f = v2l_ref[...].astype(f32)         # (BB*N, C)
    l2v_f = l2v_ref[...].astype(f32)         # (BB*N, C)
    gamma = gamma_ref[...].astype(f32)
    beta = beta_ref[...].astype(f32)

    # ---- shared-weight psi projections on the fused batch (big-M matmuls) ----
    pv = jnp.maximum(
        jnp.dot(v2l_f, w_psi_v2l_ref[...], preferred_element_type=f32), 0.0)   # (BB*N, D)
    pl_feat = jnp.maximum(
        jnp.dot(l2v_f, w_psi_l2v_ref[...], preferred_element_type=f32), 0.0)   # (BB*N, D)

    adj_n = []        # per-batch softmax-normalized adjacency, (N, N)
    vis_pieces = []   # per-batch visible features, (N, C)
    for b in range(BB):
        lo = b * N

        # Adj = softmax(Adj, dim=-1)
        adj_b = _softmax_last(adj_ref[b].astype(f32))                  # (N, N)
        adj_n.append(adj_b)

        # psi outputs kept in (N, D) layout; normalization is over visible nodes
        av = _softmax_rows(pv[lo:lo + N, :])                           # (N, D)
        al = _softmax_rows(pl_feat[lo:lo + N, :])                      # (N, D)
        v2l_b = v2l_f[lo:lo + N, :]                                    # (N, C)

        # latent = v2l_graph_adj @ v2l_node_feature                    -> (D, C)
        latent = jnp.dot(av.T, v2l_b, preferred_element_type=f32)

        # affinity = softmax(latent @ latent^T)  (NT contraction)      -> (D, D)
        aff = _softmax_last(
            lax.dot_general(latent, latent, _NT_DIMS, preferred_element_type=f32))

        # latent_lin: Linear -> LayerNorm -> ReLU
        lat = jnp.dot(latent, w_lat_ref[...], preferred_element_type=f32)
        mean = jnp.mean(lat, axis=-1, keepdims=True)
        var = jnp.mean((lat - mean) ** 2, axis=-1, keepdims=True)
        lat = (lat - mean) * lax.rsqrt(var + EPS_LN)
        lat = jnp.maximum(lat * gamma + beta, 0.0)

        # latent = tanh(affinity @ latent)                              -> (D, C)
        lat = jnp.tanh(jnp.dot(aff, lat, preferred_element_type=f32))

        # visible = l2v_graph_adj^T @ latent  ((N, D) @ (D, C))         -> (N, C)
        vis_pieces.append(jnp.dot(al, lat, preferred_element_type=f32))

    visible = jnp.concatenate(vis_pieces, axis=0)                      # (BB*N, C)

    # ---- kernel_index GCN iterations: shared linear (big-M) + per-batch bmm ----
    for i in range(K):
        lin = jnp.dot(visible, w_vis_ref[i], preferred_element_type=f32)  # (BB*N, C)
        pieces = []
        for b in range(BB):
            lo = b * N
            pieces.append(jnp.tanh(
                jnp.dot(adj_n[b], lin[lo:lo + N, :], preferred_element_type=f32)))
        visible = jnp.concatenate(pieces, axis=0)

    # GraphConvWeight: Linear + ReLU (big-M)
    visible = jnp.maximum(
        jnp.dot(visible, w_gc_ref[...], preferred_element_type=f32), 0.0)

    out_ref[...] = visible.astype(out_ref.dtype)


@jax.jit
def latentgnn_forward(v2l, l2v, adj, w_psi_v2l, w_psi_l2v, w_lat, gamma, beta,
                      w_vis, w_gc):
    B, N, C = v2l.shape
    D = w_psi_v2l.shape[0]
    K = w_vis.shape[0]

    # Keep a 2-wide "parallel" grid when possible so v7x uses both TensorCores;
    # each grid step fuses BB batch elements (big-M shared-weight matmuls).
    G = 2 if (B % 2 == 0 and B >= 2) else 1
    BB = B // G
    BBN = BB * N

    # One-time layout work in XLA (never re-executed inside the grid loop):
    # flatten activations to lane-friendly 2-D slabs and pre-transpose weights.
    v2l2 = v2l.reshape(B * N, C)
    l2v2 = l2v.reshape(B * N, C)
    w_psi_v2l_t = w_psi_v2l.T                      # (C, D)
    w_psi_l2v_t = w_psi_l2v.T                      # (C, D)
    w_lat_t = w_lat.T                              # (C, C)
    w_vis_t = jnp.transpose(w_vis, (0, 2, 1))      # (K, C, C)
    w_gc_t = w_gc.T                                # (C, C)

    full = lambda shape: pl.BlockSpec(shape, lambda g: (0,) * len(shape))

    grid_spec = pltpu.PrefetchScalarGridSpec(
        num_scalar_prefetch=0,
        grid=(G,),
        in_specs=[
            pl.BlockSpec((BBN, C), lambda g: (g, 0)),        # v2l (flattened)
            pl.BlockSpec((BBN, C), lambda g: (g, 0)),        # l2v (flattened)
            pl.BlockSpec((BB, N, N), lambda g: (g, 0, 0)),   # Adj
            full((C, D)),      # w_psi_v2l^T
            full((C, D)),      # w_psi_l2v^T
            full((C, C)),      # w_lat^T
            full((1, C)),      # gamma
            full((1, C)),      # beta
            full((K, C, C)),   # stacked visible_lin_i^T
            full((C, C)),      # w_gc^T
        ],
        out_specs=pl.BlockSpec((BBN, C), lambda g: (g, 0)),
    )

    out2 = pl.pallas_call(
        functools.partial(latentgnn_kernel, N),
        out_shape=jax.ShapeDtypeStruct((B * N, C), jnp.float32),
        grid_spec=grid_spec,
        compiler_params=pltpu.CompilerParams(
            dimension_semantics=("parallel",)),
    )(v2l2, l2v2, adj, w_psi_v2l_t, w_psi_l2v_t, w_lat_t, gamma, beta,
      w_vis_t, w_gc_t)

    return out2.reshape(B, N, C)


def reference_forward(v2l, l2v, adj, w_psi_v2l, w_psi_l2v, w_lat, gamma, beta,
                      w_vis, w_gc):
    sm = lambda x: jax.nn.softmax(x, axis=-1)
    adj_n = sm(adj)
    v2l_adj = sm(jnp.transpose(jax.nn.relu(v2l @ w_psi_v2l.T), (0, 2, 1)))
    l2v_adj = sm(jnp.transpose(jax.nn.relu(l2v @ w_psi_l2v.T), (0, 2, 1)))
    latent = v2l_adj @ v2l
    aff = sm(latent @ jnp.transpose(latent, (0, 2, 1)))
    lat = latent @ w_lat.T
    mean = lat.mean(-1, keepdims=True)
    var = ((lat - mean) ** 2).mean(-1, keepdims=True)
    lat = (lat - mean) / jnp.sqrt(var + EPS_LN) * gamma + beta
    lat = jax.nn.relu(lat)
    lat = jnp.tanh(aff @ lat)
    vis = jnp.transpose(l2v_adj, (0, 2, 1)) @ lat
    for i in range(w_vis.shape[0]):
        vis = vis @ w_vis[i].T
        vis = adj_n @ vis
        vis = jnp.tanh(vis)
    return jax.nn.relu(vis @ w_gc.T)


if __name__ == "__main__":
    # Small deterministic config
    B, N, C, D, K = 8, 64, 32, 8, 2   # batch, visible nodes, features, latent dim, kernel_index
    key = jax.random.PRNGKey(0)
    keys = jax.random.split(key, 8)

    v2l = jax.random.normal(keys[0], (B, N, C), dtype=jnp.float32)
    l2v = jax.random.normal(keys[1], (B, N, C), dtype=jnp.float32)
    adj = jax.random.normal(keys[2], (B, N, N), dtype=jnp.float32)

    # Parameters (all Linear layers are bias-free, as in the module)
    w_psi_v2l = jax.random.normal(keys[3], (D, C), dtype=jnp.float32) * 0.1
    w_psi_l2v = jax.random.normal(keys[4], (D, C), dtype=jnp.float32) * 0.1
    w_lat = jax.random.normal(keys[5], (C, C), dtype=jnp.float32) * 0.1
    gamma = jnp.ones((1, C), dtype=jnp.float32)     # LayerNorm default weight
    beta = jnp.zeros((1, C), dtype=jnp.float32)     # LayerNorm default bias
    w_vis = jax.random.normal(keys[6], (K, C, C), dtype=jnp.float32) * 0.1
    w_gc = jax.random.normal(keys[7], (C, C), dtype=jnp.float32) * 0.01  # std=0.01 init

    out = latentgnn_forward(v2l, l2v, adj, w_psi_v2l, w_psi_l2v, w_lat, gamma,
                            beta, w_vis, w_gc)
    out = jax.block_until_ready(out)

    ref = reference_forward(v2l, l2v, adj, w_psi_v2l, w_psi_l2v, w_lat, gamma,
                            beta, w_vis, w_gc)
    ref = jax.block_until_ready(ref)

    assert out.shape == (B, N, C)
    assert jnp.allclose(out, ref, rtol=2e-3, atol=2e-3), (
        f"max abs err = {jnp.max(jnp.abs(out - ref))}"
    )
    print("KERNEL_OK")
</pallas_src>

<mosaic_0001>
module attributes {stable_mosaic.version = 11 : i64} {
  func.func @latentgnn_kernel(%arg0: i32, %arg1: memref<256x32xf32, #tpu.memory_space<vmem>>, %arg2: memref<256x32xf32, #tpu.memory_space<vmem>>, %arg3: memref<4x64x64xf32, #tpu.memory_space<vmem>>, %arg4: memref<32x8xf32, #tpu.memory_space<vmem>>, %arg5: memref<32x8xf32, #tpu.memory_space<vmem>>, %arg6: memref<32x32xf32, #tpu.memory_space<vmem>>, %arg7: memref<1x32xf32, #tpu.memory_space<vmem>>, %arg8: memref<1x32xf32, #tpu.memory_space<vmem>>, %arg9: memref<2x32x32xf32, #tpu.memory_space<vmem>>, %arg10: memref<32x32xf32, #tpu.memory_space<vmem>>, %arg11: memref<256x32xf32, #tpu.memory_space<vmem>>) attributes {dimension_semantics = [#tpu.dimension_semantics<parallel>], iteration_bounds = array<i64: 2>, scalar_prefetch = 0 : i64, scratch_operands = 0 : i64, tpu.core_type = #tpu.core_type<tc>, window_params = [{transform_indices = @transform_0, window_bounds = array<i64: 256, 32>}, {transform_indices = @transform_1, window_bounds = array<i64: 256, 32>}, {transform_indices = @transform_2, window_bounds = array<i64: 4, 64, 64>}, {pipeline_mode = #tpu.pipeline_mode<synchronous>, transform_indices = @transform_3, window_bounds = array<i64: 32, 8>}, {pipeline_mode = #tpu.pipeline_mode<synchronous>, transform_indices = @transform_4, window_bounds = array<i64: 32, 8>}, {pipeline_mode = #tpu.pipeline_mode<synchronous>, transform_indices = @transform_5, window_bounds = array<i64: 32, 32>}, {pipeline_mode = #tpu.pipeline_mode<synchronous>, transform_indices = @transform_6, window_bounds = array<i64: 1, 32>}, {pipeline_mode = #tpu.pipeline_mode<synchronous>, transform_indices = @transform_7, window_bounds = array<i64: 1, 32>}, {pipeline_mode = #tpu.pipeline_mode<synchronous>, transform_indices = @transform_8, window_bounds = array<i64: 2, 32, 32>}, {pipeline_mode = #tpu.pipeline_mode<synchronous>, transform_indices = @transform_9, window_bounds = array<i64: 32, 32>}, {transform_indices = @transform_10, window_bounds = array<i64: 256, 32>}]} {
    %c0 = arith.constant 0 : index
    %c0_0 = arith.constant 0 : index
    %0 = vector.load %arg1[%c0, %c0_0] : memref<256x32xf32, #tpu.memory_space<vmem>>, vector<256x32xf32>
    %c0_1 = arith.constant 0 : index
    %c0_2 = arith.constant 0 : index
    %1 = vector.load %arg2[%c0_1, %c0_2] : memref<256x32xf32, #tpu.memory_space<vmem>>, vector<256x32xf32>
    %c0_3 = arith.constant 0 : index
    %c0_4 = arith.constant 0 : index
    %2 = vector.load %arg7[%c0_3, %c0_4] : memref<1x32xf32, #tpu.memory_space<vmem>>, vector<1x32xf32>
    %c0_5 = arith.constant 0 : index
    %c0_6 = arith.constant 0 : index
    %3 = vector.load %arg8[%c0_5, %c0_6] : memref<1x32xf32, #tpu.memory_space<vmem>>, vector<1x32xf32>
    %c0_7 = arith.constant 0 : index
    %c0_8 = arith.constant 0 : index
    %4 = vector.load %arg4[%c0_7, %c0_8] : memref<32x8xf32, #tpu.memory_space<vmem>>, vector<32x8xf32>
    %cst = arith.constant dense<0.000000e+00> : vector<256x8xf32>
    %5 = tpu.matmul %0, %4, %cst {dimension_numbers = #tpu.dot_dimension_numbers<[1], [0], [0], [1], [0, 0, 1, 1], [], []>} : vector<256x32xf32>, vector<32x8xf32>, vector<256x8xf32> -> vector<256x8xf32>
    %cst_9 = arith.constant 0.000000e+00 : f32
    %6 = vector.broadcast %cst_9 : f32 to vector<256x8xf32>
    %7 = arith.maximumf %5, %6 : vector<256x8xf32>
    %c0_10 = arith.constant 0 : index
    %c0_11 = arith.constant 0 : index
    %8 = vector.load %arg5[%c0_10, %c0_11] : memref<32x8xf32, #tpu.memory_space<vmem>>, vector<32x8xf32>
    %cst_12 = arith.constant dense<0.000000e+00> : vector<256x8xf32>
    %9 = tpu.matmul %1, %8, %cst_12 {dimension_numbers = #tpu.dot_dimension_numbers<[1], [0], [0], [1], [0, 0, 1, 1], [], []>} : vector<256x32xf32>, vector<32x8xf32>, vector<256x8xf32> -> vector<256x8xf32>
    %cst_13 = arith.constant 0.000000e+00 : f32
    %10 = vector.broadcast %cst_13 : f32 to vector<256x8xf32>
    %11 = arith.maximumf %9, %10 : vector<256x8xf32>
    %c0_14 = arith.constant 0 : index
    %c0_15 = arith.constant 0 : index
    %c0_16 = arith.constant 0 : index
    %12 = vector.load %arg3[%c0_14, %c0_15, %c0_16] : memref<4x64x64xf32, #tpu.memory_space<vmem>>, vector<1x64x64xf32>
    %13 = vector.shape_cast %12 : vector<1x64x64xf32> to vector<64x64xf32>
    %cst_17 = arith.constant dense<0xFF800000> : vector<64xf32>
    %14 = vector.multi_reduction <maximumf>, %13, %cst_17 [1] : vector<64x64xf32> to vector<64xf32>
    %15 = vector.shape_cast %14 : vector<64xf32> to vector<64x1xf32>
    %16 = vector.broadcast %15 : vector<64x1xf32> to vector<64x64xf32>
    %17 = arith.subf %13, %16 : vector<64x64xf32>
    %18 = math.exp %17 : vector<64x64xf32>
    %cst_18 = arith.constant dense<0.000000e+00> : vector<64xf32>
    %19 = vector.multi_reduction <add>, %18, %cst_18 [1] : vector<64x64xf32> to vector<64xf32>
    %20 = vector.shape_cast %19 : vector<64xf32> to vector<64x1xf32>
    %21 = tpu.reciprocal %20 {approx = true} : vector<64x1xf32> -> vector<64x1xf32>
    %22 = vector.broadcast %21 : vector<64x1xf32> to vector<64x64xf32>
    %23 = arith.mulf %18, %22 : vector<64x64xf32>
    %24 = vector.extract_strided_slice %7 {offsets = [0, 0], sizes = [64, 8], strides = [1, 1]} : vector<256x8xf32> to vector<64x8xf32>
    %cst_19 = arith.constant dense<0xFF800000> : vector<8xf32>
    %25 = vector.multi_reduction <maximumf>, %24, %cst_19 [0] : vector<64x8xf32> to vector<8xf32>
    %26 = vector.shape_cast %25 : vector<8xf32> to vector<1x8xf32>
    %27 = vector.broadcast %26 : vector<1x8xf32> to vector<64x8xf32>
    %28 = arith.subf %24, %27 : vector<64x8xf32>
    %29 = math.exp %28 : vector<64x8xf32>
    %cst_20 = arith.constant dense<0.000000e+00> : vector<8xf32>
    %30 = vector.multi_reduction <add>, %29, %cst_20 [0] : vector<64x8xf32> to vector<8xf32>
    %31 = vector.shape_cast %30 : vector<8xf32> to vector<1x8xf32>
    %32 = tpu.reciprocal %31 {approx = true} : vector<1x8xf32> -> vector<1x8xf32>
    %33 = vector.broadcast %32 : vector<1x8xf32> to vector<64x8xf32>
    %34 = arith.mulf %29, %33 : vector<64x8xf32>
    %35 = vector.extract_strided_slice %11 {offsets = [0, 0], sizes = [64, 8], strides = [1, 1]} : vector<256x8xf32> to vector<64x8xf32>
    %cst_21 = arith.constant dense<0xFF800000> : vector<8xf32>
    %36 = vector.multi_reduction <maximumf>, %35, %cst_21 [0] : vector<64x8xf32> to vector<8xf32>
    %37 = vector.shape_cast %36 : vector<8xf32> to vector<1x8xf32>
    %38 = vector.broadcast %37 : vector<1x8xf32> to vector<64x8xf32>
    %39 = arith.subf %35, %38 : vector<64x8xf32>
    %40 = math.exp %39 : vector<64x8xf32>
    %cst_22 = arith.constant dense<0.000000e+00> : vector<8xf32>
    %41 = vector.multi_reduction <add>, %40, %cst_22 [0] : vector<64x8xf32> to vector<8xf32>
    %42 = vector.shape_cast %41 : vector<8xf32> to vector<1x8xf32>
    %43 = tpu.reciprocal %42 {approx = true} : vector<1x8xf32> -> vector<1x8xf32>
    %44 = vector.broadcast %43 : vector<1x8xf32> to vector<64x8xf32>
    %45 = arith.mulf %40, %44 : vector<64x8xf32>
    %46 = vector.extract_strided_slice %0 {offsets = [0, 0], sizes = [64, 32], strides = [1, 1]} : vector<256x32xf32> to vector<64x32xf32>
    %47 = tpu.transpose %34, [1, 0] : vector<64x8xf32> -> vector<8x64xf32>
    %cst_23 = arith.constant dense<0.000000e+00> : vector<8x32xf32>
    %48 = tpu.matmul %47, %46, %cst_23 {dimension_numbers = #tpu.dot_dimension_numbers<[1], [0], [0], [1], [0, 0, 1, 1], [], []>} : vector<8x64xf32>, vector<64x32xf32>, vector<8x32xf32> -> vector<8x32xf32>
    %cst_24 = arith.constant dense<0.000000e+00> : vector<8x8xf32>
    %49 = tpu.matmul %48, %48, %cst_24 {dimension_numbers = #tpu.dot_dimension_numbers<[1], [1], [0], [0], [0, 0, 1, 0], [], []>} : vector<8x32xf32>, vector<8x32xf32>, vector<8x8xf32> -> vector<8x8xf32>
    %cst_25 = arith.constant dense<0xFF800000> : vector<8xf32>
    %50 = vector.multi_reduction <maximumf>, %49, %cst_25 [1] : vector<8x8xf32> to vector<8xf32>
    %51 = vector.shape_cast %50 : vector<8xf32> to vector<8x1xf32>
    %52 = vector.broadcast %51 : vector<8x1xf32> to vector<8x8xf32>
    %53 = arith.subf %49, %52 : vector<8x8xf32>
    %54 = math.exp %53 : vector<8x8xf32>
    %cst_26 = arith.constant dense<0.000000e+00> : vector<8xf32>
    %55 = vector.multi_reduction <add>, %54, %cst_26 [1] : vector<8x8xf32> to vector<8xf32>
    %56 = vector.shape_cast %55 : vector<8xf32> to vector<8x1xf32>
    %57 = tpu.reciprocal %56 {approx = true} : vector<8x1xf32> -> vector<8x1xf32>
    %58 = vector.broadcast %57 : vector<8x1xf32> to vector<8x8xf32>
    %59 = arith.mulf %54, %58 : vector<8x8xf32>
    %c0_27 = arith.constant 0 : index
    %c0_28 = arith.constant 0 : index
    %60 = vector.load %arg6[%c0_27, %c0_28] : memref<32x32xf32, #tpu.memory_space<vmem>>, vector<32x32xf32>
    %cst_29 = arith.constant dense<0.000000e+00> : vector<8x32xf32>
    %61 = tpu.matmul %48, %60, %cst_29 {dimension_numbers = #tpu.dot_dimension_numbers<[1], [0], [0], [1], [0, 0, 1, 1], [], []>} : vector<8x32xf32>, vector<32x32xf32>, vector<8x32xf32> -> vector<8x32xf32>
    %cst_30 = arith.constant dense<0.000000e+00> : vector<8xf32>
    %62 = vector.multi_reduction <add>, %61, %cst_30 [1] : vector<8x32xf32> to vector<8xf32>
    %63 = vector.shape_cast %62 : vector<8xf32> to vector<8x1xf32>
    %cst_31 = arith.constant 3.200000e+01 : f32
    %64 = vector.broadcast %cst_31 : f32 to vector<8x1xf32>
    %65 = arith.divf %63, %64 : vector<8x1xf32>
    %66 = vector.broadcast %65 : vector<8x1xf32> to vector<8x32xf32>
    %67 = arith.subf %61, %66 : vector<8x32xf32>
    %68 = arith.mulf %67, %67 : vector<8x32xf32>
    %cst_32 = arith.constant dense<0.000000e+00> : vector<8xf32>
    %69 = vector.multi_reduction <add>, %68, %cst_32 [1] : vector<8x32xf32> to vector<8xf32>
    %70 = vector.shape_cast %69 : vector<8xf32> to vector<8x1xf32>
    %cst_33 = arith.constant 3.200000e+01 : f32
    %71 = vector.broadcast %cst_33 : f32 to vector<8x1xf32>
    %72 = arith.divf %70, %71 : vector<8x1xf32>
    %73 = vector.broadcast %65 : vector<8x1xf32> to vector<8x32xf32>
    %74 = arith.subf %61, %73 : vector<8x32xf32>
    %cst_34 = arith.constant 9.99999974E-6 : f32
    %75 = vector.broadcast %cst_34 : f32 to vector<8x1xf32>
    %76 = arith.addf %72, %75 : vector<8x1xf32>
    %77 = math.rsqrt %76 : vector<8x1xf32>
    %78 = vector.broadcast %77 : vector<8x1xf32> to vector<8x32xf32>
    %79 = arith.mulf %74, %78 : vector<8x32xf32>
    %80 = vector.broadcast %2 : vector<1x32xf32> to vector<8x32xf32>
    %81 = arith.mulf %79, %80 : vector<8x32xf32>
    %82 = vector.broadcast %3 : vector<1x32xf32> to vector<8x32xf32>
    %83 = arith.addf %81, %82 : vector<8x32xf32>
    %cst_35 = arith.constant 0.000000e+00 : f32
    %84 = vector.broadcast %cst_35 : f32 to vector<8x32xf32>
    %85 = arith.maximumf %83, %84 : vector<8x32xf32>
    %cst_36 = arith.constant dense<0.000000e+00> : vector<8x32xf32>
    %86 = tpu.matmul %59, %85, %cst_36 {dimension_numbers = #tpu.dot_dimension_numbers<[1], [0], [0], [1], [0, 0, 1, 1], [], []>} : vector<8x8xf32>, vector<8x32xf32>, vector<8x32xf32> -> vector<8x32xf32>
    %87 = math.tanh %86 : vector<8x32xf32>
    %cst_37 = arith.constant dense<0.000000e+00> : vector<64x32xf32>
    %88 = tpu.matmul %45, %87, %cst_37 {dimension_numbers = #tpu.dot_dimension_numbers<[1], [0], [0], [1], [0, 0, 1, 1], [], []>} : vector<64x8xf32>, vector<8x32xf32>, vector<64x32xf32> -> vector<64x32xf32>
    %c1 = arith.constant 1 : index
    %c0_38 = arith.constant 0 : index
    %c0_39 = arith.constant 0 : index
    %89 = vector.load %arg3[%c1, %c0_38, %c0_39] : memref<4x64x64xf32, #tpu.memory_space<vmem>>, vector<1x64x64xf32>
    %90 = vector.shape_cast %89 : vector<1x64x64xf32> to vector<64x64xf32>
    %cst_40 = arith.constant dense<0xFF800000> : vector<64xf32>
    %91 = vector.multi_reduction <maximumf>, %90, %cst_40 [1] : vector<64x64xf32> to vector<64xf32>
    %92 = vector.shape_cast %91 : vector<64xf32> to vector<64x1xf32>
    %93 = vector.broadcast %92 : vector<64x1xf32> to vector<64x64xf32>
    %94 = arith.subf %90, %93 : vector<64x64xf32>
    %95 = math.exp %94 : vector<64x64xf32>
    %cst_41 = arith.constant dense<0.000000e+00> : vector<64xf32>
    %96 = vector.multi_reduction <add>, %95, %cst_41 [1] : vector<64x64xf32> to vector<64xf32>
    %97 = vector.shape_cast %96 : vector<64xf32> to vector<64x1xf32>
    %98 = tpu.reciprocal %97 {approx = true} : vector<64x1xf32> -> vector<64x1xf32>
    %99 = vector.broadcast %98 : vector<64x1xf32> to vector<64x64xf32>
    %100 = arith.mulf %95, %99 : vector<64x64xf32>
    %101 = vector.extract_strided_slice %7 {offsets = [64, 0], sizes = [64, 8], strides = [1, 1]} : vector<256x8xf32> to vector<64x8xf32>
    %cst_42 = arith.constant dense<0xFF800000> : vector<8xf32>
    %102 = vector.multi_reduction <maximumf>, %101, %cst_42 [0] : vector<64x8xf32> to vector<8xf32>
    %103 = vector.shape_cast %102 : vector<8xf32> to vector<1x8xf32>
    %104 = vector.broadcast %103 : vector<1x8xf32> to vector<64x8xf32>
    %105 = arith.subf %101, %104 : vector<64x8xf32>
    %106 = math.exp %105 : vector<64x8xf32>
    %cst_43 = arith.constant dense<0.000000e+00> : vector<8xf32>
    %107 = vector.multi_reduction <add>, %106, %cst_43 [0] : vector<64x8xf32> to vector<8xf32>
    %108 = vector.shape_cast %107 : vector<8xf32> to vector<1x8xf32>
    %109 = tpu.reciprocal %108 {approx = true} : vector<1x8xf32> -> vector<1x8xf32>
    %110 = vector.broadcast %109 : vector<1x8xf32> to vector<64x8xf32>
    %111 = arith.mulf %106, %110 : vector<64x8xf32>
    %112 = vector.extract_strided_slice %11 {offsets = [64, 0], sizes = [64, 8], strides = [1, 1]} : vector<256x8xf32> to vector<64x8xf32>
    %cst_44 = arith.constant dense<0xFF800000> : vector<8xf32>
    %113 = vector.multi_reduction <maximumf>, %112, %cst_44 [0] : vector<64x8xf32> to vector<8xf32>
    %114 = vector.shape_cast %113 : vector<8xf32> to vector<1x8xf32>
    %115 = vector.broadcast %114 : vector<1x8xf32> to vector<64x8xf32>
    %116 = arith.subf %112, %115 : vector<64x8xf32>
    %117 = math.exp %116 : vector<64x8xf32>
    %cst_45 = arith.constant dense<0.000000e+00> : vector<8xf32>
    %118 = vector.multi_reduction <add>, %117, %cst_45 [0] : vector<64x8xf32> to vector<8xf32>
    %119 = vector.shape_cast %118 : vector<8xf32> to vector<1x8xf32>
    %120 = tpu.reciprocal %119 {approx = true} : vector<1x8xf32> -> vector<1x8xf32>
    %121 = vector.broadcast %120 : vector<1x8xf32> to vector<64x8xf32>
    %122 = arith.mulf %117, %121 : vector<64x8xf32>
    %123 = vector.extract_strided_slice %0 {offsets = [64, 0], sizes = [64, 32], strides = [1, 1]} : vector<256x32xf32> to vector<64x32xf32>
    %124 = tpu.transpose %111, [1, 0] : vector<64x8xf32> -> vector<8x64xf32>
    %cst_46 = arith.constant dense<0.000000e+00> : vector<8x32xf32>
    %125 = tpu.matmul %124, %123, %cst_46 {dimension_numbers = #tpu.dot_dimension_numbers<[1], [0], [0], [1], [0, 0, 1, 1], [], []>} : vector<8x64xf32>, vector<64x32xf32>, vector<8x32xf32> -> vector<8x32xf32>
    %cst_47 = arith.constant dense<0.000000e+00> : vector<8x8xf32>
    %126 = tpu.matmul %125, %125, %cst_47 {dimension_numbers = #tpu.dot_dimension_numbers<[1], [1], [0], [0], [0, 0, 1, 0], [], []>} : vector<8x32xf32>, vector<8x32xf32>, vector<8x8xf32> -> vector<8x8xf32>
    %cst_48 = arith.constant dense<0xFF800000> : vector<8xf32>
    %127 = vector.multi_reduction <maximumf>, %126, %cst_48 [1] : vector<8x8xf32> to vector<8xf32>
    %128 = vector.shape_cast %127 : vector<8xf32> to vector<8x1xf32>
    %129 = vector.broadcast %128 : vector<8x1xf32> to vector<8x8xf32>
    %130 = arith.subf %126, %129 : vector<8x8xf32>
    %131 = math.exp %130 : vector<8x8xf32>
    %cst_49 = arith.constant dense<0.000000e+00> : vector<8xf32>
    %132 = vector.multi_reduction <add>, %131, %cst_49 [1] : vector<8x8xf32> to vector<8xf32>
    %133 = vector.shape_cast %132 : vector<8xf32> to vector<8x1xf32>
    %134 = tpu.reciprocal %133 {approx = true} : vector<8x1xf32> -> vector<8x1xf32>
    %135 = vector.broadcast %134 : vector<8x1xf32> to vector<8x8xf32>
    %136 = arith.mulf %131, %135 : vector<8x8xf32>
    %c0_50 = arith.constant 0 : index
    %c0_51 = arith.constant 0 : index
    %137 = vector.load %arg6[%c0_50, %c0_51] : memref<32x32xf32, #tpu.memory_space<vmem>>, vector<32x32xf32>
    %cst_52 = arith.constant dense<0.000000e+00> : vector<8x32xf32>
    %138 = tpu.matmul %125, %137, %cst_52 {dimension_numbers = #tpu.dot_dimension_numbers<[1], [0], [0], [1], [0, 0, 1, 1], [], []>} : vector<8x32xf32>, vector<32x32xf32>, vector<8x32xf32> -> vector<8x32xf32>
    %cst_53 = arith.constant dense<0.000000e+00> : vector<8xf32>
    %139 = vector.multi_reduction <add>, %138, %cst_53 [1] : vector<8x32xf32> to vector<8xf32>
    %140 = vector.shape_cast %139 : vector<8xf32> to vector<8x1xf32>
    %cst_54 = arith.constant 3.200000e+01 : f32
    %141 = vector.broadcast %cst_54 : f32 to vector<8x1xf32>
    %142 = arith.divf %140, %141 : vector<8x1xf32>
    %143 = vector.broadcast %142 : vector<8x1xf32> to vector<8x32xf32>
    %144 = arith.subf %138, %143 : vector<8x32xf32>
    %145 = arith.mulf %144, %144 : vector<8x32xf32>
    %cst_55 = arith.constant dense<0.000000e+00> : vector<8xf32>
    %146 = vector.multi_reduction <add>, %145, %cst_55 [1] : vector<8x32xf32> to vector<8xf32>
    %147 = vector.shape_cast %146 : vector<8xf32> to vector<8x1xf32>
    %cst_56 = arith.constant 3.200000e+01 : f32
    %148 = vector.broadcast %cst_56 : f32 to vector<8x1xf32>
    %149 = arith.divf %147, %148 : vector<8x1xf32>
    %150 = vector.broadcast %142 : vector<8x1xf32> to vector<8x32xf32>
    %151 = arith.subf %138, %150 : vector<8x32xf32>
    %cst_57 = arith.constant 9.99999974E-6 : f32
    %152 = vector.broadcast %cst_57 : f32 to vector<8x1xf32>
    %153 = arith.addf %149, %152 : vector<8x1xf32>
    %154 = math.rsqrt %153 : vector<8x1xf32>
    %155 = vector.broadcast %154 : vector<8x1xf32> to vector<8x32xf32>
    %156 = arith.mulf %151, %155 : vector<8x32xf32>
    %157 = vector.broadcast %2 : vector<1x32xf32> to vector<8x32xf32>
    %158 = arith.mulf %156, %157 : vector<8x32xf32>
    %159 = vector.broadcast %3 : vector<1x32xf32> to vector<8x32xf32>
    %160 = arith.addf %158, %159 : vector<8x32xf32>
    %cst_58 = arith.constant 0.000000e+00 : f32
    %161 = vector.broadcast %cst_58 : f32 to vector<8x32xf32>
    %162 = arith.maximumf %160, %161 : vector<8x32xf32>
    %cst_59 = arith.constant dense<0.000000e+00> : vector<8x32xf32>
    %163 = tpu.matmul %136, %162, %cst_59 {dimension_numbers = #tpu.dot_dimension_numbers<[1], [0], [0], [1], [0, 0, 1, 1], [], []>} : vector<8x8xf32>, vector<8x32xf32>, vector<8x32xf32> -> vector<8x32xf32>
    %164 = math.tanh %163 : vector<8x32xf32>
    %cst_60 = arith.constant dense<0.000000e+00> : vector<64x32xf32>
    %165 = tpu.matmul %122, %164, %cst_60 {dimension_numbers = #tpu.dot_dimension_numbers<[1], [0], [0], [1], [0, 0, 1, 1], [], []>} : vector<64x8xf32>, vector<8x32xf32>, vector<64x32xf32> -> vector<64x32xf32>
    %c2 = arith.constant 2 : index
    %c0_61 = arith.constant 0 : index
    %c0_62 = arith.constant 0 : index
    %166 = vector.load %arg3[%c2, %c0_61, %c0_62] : memref<4x64x64xf32, #tpu.memory_space<vmem>>, vector<1x64x64xf32>
    %167 = vector.shape_cast %166 : vector<1x64x64xf32> to vector<64x64xf32>
    %cst_63 = arith.constant dense<0xFF800000> : vector<64xf32>
    %168 = vector.multi_reduction <maximumf>, %167, %cst_63 [1] : vector<64x64xf32> to vector<64xf32>
    %169 = vector.shape_cast %168 : vector<64xf32> to vector<64x1xf32>
    %170 = vector.broadcast %169 : vector<64x1xf32> to vector<64x64xf32>
    %171 = arith.subf %167, %170 : vector<64x64xf32>
    %172 = math.exp %171 : vector<64x64xf32>
    %cst_64 = arith.constant dense<0.000000e+00> : vector<64xf32>
    %173 = vector.multi_reduction <add>, %172, %cst_64 [1] : vector<64x64xf32> to vector<64xf32>
    %174 = vector.shape_cast %173 : vector<64xf32> to vector<64x1xf32>
    %175 = tpu.reciprocal %174 {approx = true} : vector<64x1xf32> -> vector<64x1xf32>
    %176 = vector.broadcast %175 : vector<64x1xf32> to vector<64x64xf32>
    %177 = arith.mulf %172, %176 : vector<64x64xf32>
    %178 = vector.extract_strided_slice %7 {offsets = [128, 0], sizes = [64, 8], strides = [1, 1]} : vector<256x8xf32> to vector<64x8xf32>
    %cst_65 = arith.constant dense<0xFF800000> : vector<8xf32>
    %179 = vector.multi_reduction <maximumf>, %178, %cst_65 [0] : vector<64x8xf32> to vector<8xf32>
    %180 = vector.shape_cast %179 : vector<8xf32> to vector<1x8xf32>
    %181 = vector.broadcast %180 : vector<1x8xf32> to vector<64x8xf32>
    %182 = arith.subf %178, %181 : vector<64x8xf32>
    %183 = math.exp %182 : vector<64x8xf32>
    %cst_66 = arith.constant dense<0.000000e+00> : vector<8xf32>
    %184 = vector.multi_reduction <add>, %183, %cst_66 [0] : vector<64x8xf32> to vector<8xf32>
    %185 = vector.shape_cast %184 : vector<8xf32> to vector<1x8xf32>
    %186 = tpu.reciprocal %185 {approx = true} : vector<1x8xf32> -> vector<1x8xf32>
    %187 = vector.broadcast %186 : vector<1x8xf32> to vector<64x8xf32>
    %188 = arith.mulf %183, %187 : vector<64x8xf32>
    %189 = vector.extract_strided_slice %11 {offsets = [128, 0], sizes = [64, 8], strides = [1, 1]} : vector<256x8xf32> to vector<64x8xf32>
    %cst_67 = arith.constant dense<0xFF800000> : vector<8xf32>
    %190 = vector.multi_reduction <maximumf>, %189, %cst_67 [0] : vector<64x8xf32> to vector<8xf32>
    %191 = vector.shape_cast %190 : vector<8xf32> to vector<1x8xf32>
    %192 = vector.broadcast %191 : vector<1x8xf32> to vector<64x8xf32>
    %193 = arith.subf %189, %192 : vector<64x8xf32>
    %194 = math.exp %193 : vector<64x8xf32>
    %cst_68 = arith.constant dense<0.000000e+00> : vector<8xf32>
    %195 = vector.multi_reduction <add>, %194, %cst_68 [0] : vector<64x8xf32> to vector<8xf32>
    %196 = vector.shape_cast %195 : vector<8xf32> to vector<1x8xf32>
    %197 = tpu.reciprocal %196 {approx = true} : vector<1x8xf32> -> vector<1x8xf32>
    %198 = vector.broadcast %197 : vector<1x8xf32> to vector<64x8xf32>
    %199 = arith.mulf %194, %198 : vector<64x8xf32>
    %200 = vector.extract_strided_slice %0 {offsets = [128, 0], sizes = [64, 32], strides = [1, 1]} : vector<256x32xf32> to vector<64x32xf32>
    %201 = tpu.transpose %188, [1, 0] : vector<64x8xf32> -> vector<8x64xf32>
    %cst_69 = arith.constant dense<0.000000e+00> : vector<8x32xf32>
    %202 = tpu.matmul %201, %200, %cst_69 {dimension_numbers = #tpu.dot_dimension_numbers<[1], [0], [0], [1], [0, 0, 1, 1], [], []>} : vector<8x64xf32>, vector<64x32xf32>, vector<8x32xf32> -> vector<8x32xf32>
    %cst_70 = arith.constant dense<0.000000e+00> : vector<8x8xf32>
    %203 = tpu.matmul %202, %202, %cst_70 {dimension_numbers = #tpu.dot_dimension_numbers<[1], [1], [0], [0], [0, 0, 1, 0], [], []>} : vector<8x32xf32>, vector<8x32xf32>, vector<8x8xf32> -> vector<8x8xf32>
    %cst_71 = arith.constant dense<0xFF800000> : vector<8xf32>
    %204 = vector.multi_reduction <maximumf>, %203, %cst_71 [1] : vector<8x8xf32> to vector<8xf32>
    %205 = vector.shape_cast %204 : vector<8xf32> to vector<8x1xf32>
    %206 = vector.broadcast %205 : vector<8x1xf32> to vector<8x8xf32>
    %207 = arith.subf %203, %206 : vector<8x8xf32>
    %208 = math.exp %207 : vector<8x8xf32>
    %cst_72 = arith.constant dense<0.000000e+00> : vector<8xf32>
    %209 = vector.multi_reduction <add>, %208, %cst_72 [1] : vector<8x8xf32> to vector<8xf32>
    %210 = vector.shape_cast %209 : vector<8xf32> to vector<8x1xf32>
    %211 = tpu.reciprocal %210 {approx = true} : vector<8x1xf32> -> vector<8x1xf32>
    %212 = vector.broadcast %211 : vector<8x1xf32> to vector<8x8xf32>
    %213 = arith.mulf %208, %212 : vector<8x8xf32>
    %c0_73 = arith.constant 0 : index
    %c0_74 = arith.constant 0 : index
    %214 = vector.load %arg6[%c0_73, %c0_74] : memref<32x32xf32, #tpu.memory_space<vmem>>, vector<32x32xf32>
    %cst_75 = arith.constant dense<0.000000e+00> : vector<8x32xf32>
    %215 = tpu.matmul %202, %214, %cst_75 {dimension_numbers = #tpu.dot_dimension_numbers<[1], [0], [0], [1], [0, 0, 1, 1], [], []>} : vector<8x32xf32>, vector<32x32xf32>, vector<8x32xf32> -> vector<8x32xf32>
    %cst_76 = arith.constant dense<0.000000e+00> : vector<8xf32>
    %216 = vector.multi_reduction <add>, %215, %cst_76 [1] : vector<8x32xf32> to vector<8xf32>
    %217 = vector.shape_cast %216 : vector<8xf32> to vector<8x1xf32>
    %cst_77 = arith.constant 3.200000e+01 : f32
    %218 = vector.broadcast %cst_77 : f32 to vector<8x1xf32>
    %219 = arith.divf %217, %218 : vector<8x1xf32>
    %220 = vector.broadcast %219 : vector<8x1xf32> to vector<8x32xf32>
    %221 = arith.subf %215, %220 : vector<8x32xf32>
    %222 = arith.mulf %221, %221 : vector<8x32xf32>
    %cst_78 = arith.constant dense<0.000000e+00> : vector<8xf32>
    %223 = vector.multi_reduction <add>, %222, %cst_78 [1] : vector<8x32xf32> to vector<8xf32>
    %224 = vector.shape_cast %223 : vector<8xf32> to vector<8x1xf32>
    %cst_79 = arith.constant 3.200000e+01 : f32
    %225 = vector.broadcast %cst_79 : f32 to vector<8x1xf32>
    %226 = arith.divf %224, %225 : vector<8x1xf32>
    %227 = vector.broadcast %219 : vector<8x1xf32> to vector<8x32xf32>
    %228 = arith.subf %215, %227 : vector<8x32xf32>
    %cst_80 = arith.constant 9.99999974E-6 : f32
    %229 = vector.broadcast %cst_80 : f32 to vector<8x1xf32>
    %230 = arith.addf %226, %229 : vector<8x1xf32>
    %231 = math.rsqrt %230 : vector<8x1xf32>
    %232 = vector.broadcast %231 : vector<8x1xf32> to vector<8x32xf32>
    %233 = arith.mulf %228, %232 : vector<8x32xf32>
    %234 = vector.broadcast %2 : vector<1x32xf32> to vector<8x32xf32>
    %235 = arith.mulf %233, %234 : vector<8x32xf32>
    %236 = vector.broadcast %3 : vector<1x32xf32> to vector<8x32xf32>
    %237 = arith.addf %235, %236 : vector<8x32xf32>
    %cst_81 = arith.constant 0.000000e+00 : f32
    %238 = vector.broadcast %cst_81 : f32 to vector<8x32xf32>
    %239 = arith.maximumf %237, %238 : vector<8x32xf32>
    %cst_82 = arith.constant dense<0.000000e+00> : vector<8x32xf32>
    %240 = tpu.matmul %213, %239, %cst_82 {dimension_numbers = #tpu.dot_dimension_numbers<[1], [0], [0], [1], [0, 0, 1, 1], [], []>} : vector<8x8xf32>, vector<8x32xf32>, vector<8x32xf32> -> vector<8x32xf32>
    %241 = math.tanh %240 : vector<8x32xf32>
    %cst_83 = arith.constant dense<0.000000e+00> : vector<64x32xf32>
    %242 = tpu.matmul %199, %241, %cst_83 {dimension_numbers = #tpu.dot_dimension_numbers<[1], [0], [0], [1], [0, 0, 1, 1], [], []>} : vector<64x8xf32>, vector<8x32xf32>, vector<64x32xf32> -> vector<64x32xf32>
    %c3 = arith.constant 3 : index
    %c0_84 = arith.constant 0 : index
    %c0_85 = arith.constant 0 : index
    %243 = vector.load %arg3[%c3, %c0_84, %c0_85] : memref<4x64x64xf32, #tpu.memory_space<vmem>>, vector<1x64x64xf32>
    %244 = vector.shape_cast %243 : vector<1x64x64xf32> to vector<64x64xf32>
    %cst_86 = arith.constant dense<0xFF800000> : vector<64xf32>
    %245 = vector.multi_reduction <maximumf>, %244, %cst_86 [1] : vector<64x64xf32> to vector<64xf32>
    %246 = vector.shape_cast %245 : vector<64xf32> to vector<64x1xf32>
    %247 = vector.broadcast %246 : vector<64x1xf32> to vector<64x64xf32>
    %248 = arith.subf %244, %247 : vector<64x64xf32>
    %249 = math.exp %248 : vector<64x64xf32>
    %cst_87 = arith.constant dense<0.000000e+00> : vector<64xf32>
    %250 = vector.multi_reduction <add>, %249, %cst_87 [1] : vector<64x64xf32> to vector<64xf32>
    %251 = vector.shape_cast %250 : vector<64xf32> to vector<64x1xf32>
    %252 = tpu.reciprocal %251 {approx = true} : vector<64x1xf32> -> vector<64x1xf32>
    %253 = vector.broadcast %252 : vector<64x1xf32> to vector<64x64xf32>
    %254 = arith.mulf %249, %253 : vector<64x64xf32>
    %255 = vector.extract_strided_slice %7 {offsets = [192, 0], sizes = [64, 8], strides = [1, 1]} : vector<256x8xf32> to vector<64x8xf32>
    %cst_88 = arith.constant dense<0xFF800000> : vector<8xf32>
    %256 = vector.multi_reduction <maximumf>, %255, %cst_88 [0] : vector<64x8xf32> to vector<8xf32>
    %257 = vector.shape_cast %256 : vector<8xf32> to vector<1x8xf32>
    %258 = vector.broadcast %257 : vector<1x8xf32> to vector<64x8xf32>
    %259 = arith.subf %255, %258 : vector<64x8xf32>
    %260 = math.exp %259 : vector<64x8xf32>
    %cst_89 = arith.constant dense<0.000000e+00> : vector<8xf32>
    %261 = vector.multi_reduction <add>, %260, %cst_89 [0] : vector<64x8xf32> to vector<8xf32>
    %262 = vector.shape_cast %261 : vector<8xf32> to vector<1x8xf32>
    %263 = tpu.reciprocal %262 {approx = true} : vector<1x8xf32> -> vector<1x8xf32>
    %264 = vector.broadcast %263 : vector<1x8xf32> to vector<64x8xf32>
    %265 = arith.mulf %260, %264 : vector<64x8xf32>
    %266 = vector.extract_strided_slice %11 {offsets = [192, 0], sizes = [64, 8], strides = [1, 1]} : vector<256x8xf32> to vector<64x8xf32>
    %cst_90 = arith.constant dense<0xFF800000> : vector<8xf32>
    %267 = vector.multi_reduction <maximumf>, %266, %cst_90 [0] : vector<64x8xf32> to vector<8xf32>
    %268 = vector.shape_cast %267 : vector<8xf32> to vector<1x8xf32>
    %269 = vector.broadcast %268 : vector<1x8xf32> to vector<64x8xf32>
    %270 = arith.subf %266, %269 : vector<64x8xf32>
    %271 = math.exp %270 : vector<64x8xf32>
    %cst_91 = arith.constant dense<0.000000e+00> : vector<8xf32>
    %272 = vector.multi_reduction <add>, %271, %cst_91 [0] : vector<64x8xf32> to vector<8xf32>
    %273 = vector.shape_cast %272 : vector<8xf32> to vector<1x8xf32>
    %274 = tpu.reciprocal %273 {approx = true} : vector<1x8xf32> -> vector<1x8xf32>
    %275 = vector.broadcast %274 : vector<1x8xf32> to vector<64x8xf32>
    %276 = arith.mulf %271, %275 : vector<64x8xf32>
    %277 = vector.extract_strided_slice %0 {offsets = [192, 0], sizes = [64, 32], strides = [1, 1]} : vector<256x32xf32> to vector<64x32xf32>
    %278 = tpu.transpose %265, [1, 0] : vector<64x8xf32> -> vector<8x64xf32>
    %cst_92 = arith.constant dense<0.000000e+00> : vector<8x32xf32>
    %279 = tpu.matmul %278, %277, %cst_92 {dimension_numbers = #tpu.dot_dimension_numbers<[1], [0], [0], [1], [0, 0, 1, 1], [], []>} : vector<8x64xf32>, vector<64x32xf32>, vector<8x32xf32> -> vector<8x32xf32>
    %cst_93 = arith.constant dense<0.000000e+00> : vector<8x8xf32>
    %280 = tpu.matmul %279, %279, %cst_93 {dimension_numbers = #tpu.dot_dimension_numbers<[1], [1], [0], [0], [0, 0, 1, 0], [], []>} : vector<8x32xf32>, vector<8x32xf32>, vector<8x8xf32> -> vector<8x8xf32>
    %cst_94 = arith.constant dense<0xFF800000> : vector<8xf32>
    %281 = vector.multi_reduction <maximumf>, %280, %cst_94 [1] : vector<8x8xf32> to vector<8xf32>
    %282 = vector.shape_cast %281 : vector<8xf32> to vector<8x1xf32>
    %283 = vector.broadcast %282 : vector<8x1xf32> to vector<8x8xf32>
    %284 = arith.subf %280, %283 : vector<8x8xf32>
    %285 = math.exp %284 : vector<8x8xf32>
    %cst_95 = arith.constant dense<0.000000e+00> : vector<8xf32>
    %286 = vector.multi_reduction <add>, %285, %cst_95 [1] : vector<8x8xf32> to vector<8xf32>
    %287 = vector.shape_cast %286 : vector<8xf32> to vector<8x1xf32>
    %288 = tpu.reciprocal %287 {approx = true} : vector<8x1xf32> -> vector<8x1xf32>
    %289 = vector.broadcast %288 : vector<8x1xf32> to vector<8x8xf32>
    %290 = arith.mulf %285, %289 : vector<8x8xf32>
    %c0_96 = arith.constant 0 : index
    %c0_97 = arith.constant 0 : index
    %291 = vector.load %arg6[%c0_96, %c0_97] : memref<32x32xf32, #tpu.memory_space<vmem>>, vector<32x32xf32>
    %cst_98 = arith.constant dense<0.000000e+00> : vector<8x32xf32>
    %292 = tpu.matmul %279, %291, %cst_98 {dimension_numbers = #tpu.dot_dimension_numbers<[1], [0], [0], [1], [0, 0, 1, 1], [], []>} : vector<8x32xf32>, vector<32x32xf32>, vector<8x32xf32> -> vector<8x32xf32>
    %cst_99 = arith.constant dense<0.000000e+00> : vector<8xf32>
    %293 = vector.multi_reduction <add>, %292, %cst_99 [1] : vector<8x32xf32> to vector<8xf32>
    %294 = vector.shape_cast %293 : vector<8xf32> to vector<8x1xf32>
    %cst_100 = arith.constant 3.200000e+01 : f32
    %295 = vector.broadcast %cst_100 : f32 to vector<8x1xf32>
    %296 = arith.divf %294, %295 : vector<8x1xf32>
    %297 = vector.broadcast %296 : vector<8x1xf32> to vector<8x32xf32>
    %298 = arith.subf %292, %297 : vector<8x32xf32>
    %299 = arith.mulf %298, %298 : vector<8x32xf32>
    %cst_101 = arith.constant dense<0.000000e+00> : vector<8xf32>
    %300 = vector.multi_reduction <add>, %299, %cst_101 [1] : vector<8x32xf32> to vector<8xf32>
    %301 = vector.shape_cast %300 : vector<8xf32> to vector<8x1xf32>
    %cst_102 = arith.constant 3.200000e+01 : f32
    %302 = vector.broadcast %cst_102 : f32 to vector<8x1xf32>
    %303 = arith.divf %301, %302 : vector<8x1xf32>
    %304 = vector.broadcast %296 : vector<8x1xf32> to vector<8x32xf32>
    %305 = arith.subf %292, %304 : vector<8x32xf32>
    %cst_103 = arith.constant 9.99999974E-6 : f32
    %306 = vector.broadcast %cst_103 : f32 to vector<8x1xf32>
    %307 = arith.addf %303, %306 : vector<8x1xf32>
    %308 = math.rsqrt %307 : vector<8x1xf32>
    %309 = vector.broadcast %308 : vector<8x1xf32> to vector<8x32xf32>
    %310 = arith.mulf %305, %309 : vector<8x32xf32>
    %311 = vector.broadcast %2 : vector<1x32xf32> to vector<8x32xf32>
    %312 = arith.mulf %310, %311 : vector<8x32xf32>
    %313 = vector.broadcast %3 : vector<1x32xf32> to vector<8x32xf32>
    %314 = arith.addf %312, %313 : vector<8x32xf32>
    %cst_104 = arith.constant 0.000000e+00 : f32
    %315 = vector.broadcast %cst_104 : f32 to vector<8x32xf32>
    %316 = arith.maximumf %314, %315 : vector<8x32xf32>
    %cst_105 = arith.constant dense<0.000000e+00> : vector<8x32xf32>
    %317 = tpu.matmul %290, %316, %cst_105 {dimension_numbers = #tpu.dot_dimension_numbers<[1], [0], [0], [1], [0, 0, 1, 1], [], []>} : vector<8x8xf32>, vector<8x32xf32>, vector<8x32xf32> -> vector<8x32xf32>
    %318 = math.tanh %317 : vector<8x32xf32>
    %cst_106 = arith.constant dense<0.000000e+00> : vector<64x32xf32>
    %319 = tpu.matmul %276, %318, %cst_106 {dimension_numbers = #tpu.dot_dimension_numbers<[1], [0], [0], [1], [0, 0, 1, 1], [], []>} : vector<64x8xf32>, vector<8x32xf32>, vector<64x32xf32> -> vector<64x32xf32>
    %320 = tpu.concatenate %88, %165, %242, %319 in 0 : vector<64x32xf32>, vector<64x32xf32>, vector<64x32xf32>, vector<64x32xf32> -> vector<256x32xf32>
    %c0_107 = arith.constant 0 : index
    %c0_108 = arith.constant 0 : index
    %c0_109 = arith.constant 0 : index
    %321 = vector.load %arg9[%c0_107, %c0_108, %c0_109] : memref<2x32x32xf32, #tpu.memory_space<vmem>>, vector<1x32x32xf32>
    %322 = vector.shape_cast %321 : vector<1x32x32xf32> to vector<32x32xf32>
    %cst_110 = arith.constant dense<0.000000e+00> : vector<256x32xf32>
    %323 = tpu.matmul %320, %322, %cst_110 {dimension_numbers = #tpu.dot_dimension_numbers<[1], [0], [0], [1], [0, 0, 1, 1], [], []>} : vector<256x32xf32>, vector<32x32xf32>, vector<256x32xf32> -> vector<256x32xf32>
    %324 = vector.extract_strided_slice %323 {offsets = [0, 0], sizes = [64, 32], strides = [1, 1]} : vector<256x32xf32> to vector<64x32xf32>
    %cst_111 = arith.constant dense<0.000000e+00> : vector<64x32xf32>
    %325 = tpu.matmul %23, %324, %cst_111 {dimension_numbers = #tpu.dot_dimension_numbers<[1], [0], [0], [1], [0, 0, 1, 1], [], []>} : vector<64x64xf32>, vector<64x32xf32>, vector<64x32xf32> -> vector<64x32xf32>
    %326 = math.tanh %325 : vector<64x32xf32>
    %327 = vector.extract_strided_slice %323 {offsets = [64, 0], sizes = [64, 32], strides = [1, 1]} : vector<256x32xf32> to vector<64x32xf32>
    %cst_112 = arith.constant dense<0.000000e+00> : vector<64x32xf32>
    %328 = tpu.matmul %100, %327, %cst_112 {dimension_numbers = #tpu.dot_dimension_numbers<[1], [0], [0], [1], [0, 0, 1, 1], [], []>} : vector<64x64xf32>, vector<64x32xf32>, vector<64x32xf32> -> vector<64x32xf32>
    %329 = math.tanh %328 : vector<64x32xf32>
    %330 = vector.extract_strided_slice %323 {offsets = [128, 0], sizes = [64, 32], strides = [1, 1]} : vector<256x32xf32> to vector<64x32xf32>
    %cst_113 = arith.constant dense<0.000000e+00> : vector<64x32xf32>
    %331 = tpu.matmul %177, %330, %cst_113 {dimension_numbers = #tpu.dot_dimension_numbers<[1], [0], [0], [1], [0, 0, 1, 1], [], []>} : vector<64x64xf32>, vector<64x32xf32>, vector<64x32xf32> -> vector<64x32xf32>
    %332 = math.tanh %331 : vector<64x32xf32>
    %333 = vector.extract_strided_slice %323 {offsets = [192, 0], sizes = [64, 32], strides = [1, 1]} : vector<256x32xf32> to vector<64x32xf32>
    %cst_114 = arith.constant dense<0.000000e+00> : vector<64x32xf32>
    %334 = tpu.matmul %254, %333, %cst_114 {dimension_numbers = #tpu.dot_dimension_numbers<[1], [0], [0], [1], [0, 0, 1, 1], [], []>} : vector<64x64xf32>, vector<64x32xf32>, vector<64x32xf32> -> vector<64x32xf32>
    %335 = math.tanh %334 : vector<64x32xf32>
    %336 = tpu.concatenate %326, %329, %332, %335 in 0 : vector<64x32xf32>, vector<64x32xf32>, vector<64x32xf32>, vector<64x32xf32> -> vector<256x32xf32>
    %c1_115 = arith.constant 1 : index
    %c0_116 = arith.constant 0 : index
    %c0_117 = arith.constant 0 : index
    %337 = vector.load %arg9[%c1_115, %c0_116, %c0_117] : memref<2x32x32xf32, #tpu.memory_space<vmem>>, vector<1x32x32xf32>
    %338 = vector.shape_cast %337 : vector<1x32x32xf32> to vector<32x32xf32>
    %cst_118 = arith.constant dense<0.000000e+00> : vector<256x32xf32>
    %339 = tpu.matmul %336, %338, %cst_118 {dimension_numbers = #tpu.dot_dimension_numbers<[1], [0], [0], [1], [0, 0, 1, 1], [], []>} : vector<256x32xf32>, vector<32x32xf32>, vector<256x32xf32> -> vector<256x32xf32>
    %340 = vector.extract_strided_slice %339 {offsets = [0, 0], sizes = [64, 32], strides = [1, 1]} : vector<256x32xf32> to vector<64x32xf32>
    %cst_119 = arith.constant dense<0.000000e+00> : vector<64x32xf32>
    %341 = tpu.matmul %23, %340, %cst_119 {dimension_numbers = #tpu.dot_dimension_numbers<[1], [0], [0], [1], [0, 0, 1, 1], [], []>} : vector<64x64xf32>, vector<64x32xf32>, vector<64x32xf32> -> vector<64x32xf32>
    %342 = math.tanh %341 : vector<64x32xf32>
    %343 = vector.extract_strided_slice %339 {offsets = [64, 0], sizes = [64, 32], strides = [1, 1]} : vector<256x32xf32> to vector<64x32xf32>
    %cst_120 = arith.constant dense<0.000000e+00> : vector<64x32xf32>
    %344 = tpu.matmul %100, %343, %cst_120 {dimension_numbers = #tpu.dot_dimension_numbers<[1], [0], [0], [1], [0, 0, 1, 1], [], []>} : vector<64x64xf32>, vector<64x32xf32>, vector<64x32xf32> -> vector<64x32xf32>
    %345 = math.tanh %344 : vector<64x32xf32>
    %346 = vector.extract_strided_slice %339 {offsets = [128, 0], sizes = [64, 32], strides = [1, 1]} : vector<256x32xf32> to vector<64x32xf32>
    %cst_121 = arith.constant dense<0.000000e+00> : vector<64x32xf32>
    %347 = tpu.matmul %177, %346, %cst_121 {dimension_numbers = #tpu.dot_dimension_numbers<[1], [0], [0], [1], [0, 0, 1, 1], [], []>} : vector<64x64xf32>, vector<64x32xf32>, vector<64x32xf32> -> vector<64x32xf32>
    %348 = math.tanh %347 : vector<64x32xf32>
    %349 = vector.extract_strided_slice %339 {offsets = [192, 0], sizes = [64, 32], strides = [1, 1]} : vector<256x32xf32> to vector<64x32xf32>
    %cst_122 = arith.constant dense<0.000000e+00> : vector<64x32xf32>
    %350 = tpu.matmul %254, %349, %cst_122 {dimension_numbers = #tpu.dot_dimension_numbers<[1], [0], [0], [1], [0, 0, 1, 1], [], []>} : vector<64x64xf32>, vector<64x32xf32>, vector<64x32xf32> -> vector<64x32xf32>
    %351 = math.tanh %350 : vector<64x32xf32>
    %352 = tpu.concatenate %342, %345, %348, %351 in 0 : vector<64x32xf32>, vector<64x32xf32>, vector<64x32xf32>, vector<64x32xf32> -> vector<256x32xf32>
    %c0_123 = arith.constant 0 : index
    %c0_124 = arith.constant 0 : index
    %353 = vector.load %arg10[%c0_123, %c0_124] : memref<32x32xf32, #tpu.memory_space<vmem>>, vector<32x32xf32>
    %cst_125 = arith.constant dense<0.000000e+00> : vector<256x32xf32>
    %354 = tpu.matmul %352, %353, %cst_125 {dimension_numbers = #tpu.dot_dimension_numbers<[1], [0], [0], [1], [0, 0, 1, 1], [], []>} : vector<256x32xf32>, vector<32x32xf32>, vector<256x32xf32> -> vector<256x32xf32>
    %cst_126 = arith.constant 0.000000e+00 : f32
    %355 = vector.broadcast %cst_126 : f32 to vector<256x32xf32>
    %356 = arith.maximumf %354, %355 : vector<256x32xf32>
    %c0_127 = arith.constant 0 : index
    %c0_128 = arith.constant 0 : index
    %357 = vector.load %arg11[%c0_127, %c0_128] : memref<256x32xf32, #tpu.memory_space<vmem>>, vector<256x32xf32>
    tpu.vector_store %arg11[%c0_127, %c0_128], %356 {strides = array<i32>} : memref<256x32xf32, #tpu.memory_space<vmem>>, vector<256x32xf32>,
    return
  }
  func.func @transform_0(%arg0: i32) -> (i32, i32) {
    %c0_i32 = arith.constant 0 : i32
    %c0_i32_0 = arith.constant 0 : i32
    return %arg0, %c0_i32 : i32, i32
  }
  func.func @transform_1(%arg0: i32) -> (i32, i32) {
    %c0_i32 = arith.constant 0 : i32
    %c0_i32_0 = arith.constant 0 : i32
    return %arg0, %c0_i32 : i32, i32
  }
  func.func @transform_2(%arg0: i32) -> (i32, i32, i32) {
    %c0_i32 = arith.constant 0 : i32
    %c0_i32_0 = arith.constant 0 : i32
    %c0_i32_1 = arith.constant 0 : i32
    return %arg0, %c0_i32, %c0_i32_0 : i32, i32, i32
  }
  func.func @transform_3(%arg0: i32) -> (i32, i32) {
    %c0_i32 = arith.constant 0 : i32
    %c0_i32_0 = arith.constant 0 : i32
    %c0_i32_1 = arith.constant 0 : i32
    return %c0_i32, %c0_i32_0 : i32, i32
  }
  func.func @transform_4(%arg0: i32) -> (i32, i32) {
    %c0_i32 = arith.constant 0 : i32
    %c0_i32_0 = arith.constant 0 : i32
    %c0_i32_1 = arith.constant 0 : i32
    return %c0_i32, %c0_i32_0 : i32, i32
  }
  func.func @transform_5(%arg0: i32) -> (i32, i32) {
    %c0_i32 = arith.constant 0 : i32
    %c0_i32_0 = arith.constant 0 : i32
    %c0_i32_1 = arith.constant 0 : i32
    return %c0_i32, %c0_i32_0 : i32, i32
  }
  func.func @transform_6(%arg0: i32) -> (i32, i32) {
    %c0_i32 = arith.constant 0 : i32
    %c0_i32_0 = arith.constant 0 : i32
    %c0_i32_1 = arith.constant 0 : i32
    return %c0_i32, %c0_i32_0 : i32, i32
  }
  func.func @transform_7(%arg0: i32) -> (i32, i32) {
    %c0_i32 = arith.constant 0 : i32
    %c0_i32_0 = arith.constant 0 : i32
    %c0_i32_1 = arith.constant 0 : i32
    return %c0_i32, %c0_i32_0 : i32, i32
  }
  func.func @transform_8(%arg0: i32) -> (i32, i32, i32) {
    %c0_i32 = arith.constant 0 : i32
    %c0_i32_0 = arith.constant 0 : i32
    %c0_i32_1 = arith.constant 0 : i32
    %c0_i32_2 = arith.constant 0 : i32
    return %c0_i32, %c0_i32_0, %c0_i32_1 : i32, i32, i32
  }
  func.func @transform_9(%arg0: i32) -> (i32, i32) {
    %c0_i32 = arith.constant 0 : i32
    %c0_i32_0 = arith.constant 0 : i32
    %c0_i32_1 = arith.constant 0 : i32
    return %c0_i32, %c0_i32_0 : i32, i32
  }
  func.func @transform_10(%arg0: i32) -> (i32, i32) {
    %c0_i32 = arith.constant 0 : i32
    %c0_i32_0 = arith.constant 0 : i32
    return %arg0, %c0_i32 : i32, i32
  }
}

</mosaic_0001>

<bundles_post_ra>
// kernel: latentgnn_forward.1
= control target key start
LH: loop header
LB: loop body
LE: loop exit
PB: predicated region body
PF: predicated region fallthrough
CT: control target
= control target key end

     0   :  { %s8231_s13 = smov 0   ;;  %s10420_s0 = inlined_call_operand.vmem [shape: f32[512,32], index: 0, kind: input, shape index: {}]   ;;  %s10421_s1 = inlined_call_operand.vmem [shape: f32[512,32], index: 1, kind: input, shape index: {}]   ;;  %s10422_s2 = inlined_call_operand.vmem [shape: f32[8,64,64], index: 2, kind: input, shape index: {}]   ;;  %s10423_s3 = inlined_call_operand.vmem [shape: f32[32,8], index: 3, kind: input, shape index: {}]   ;;  %s10424_s4 = inlined_call_operand.vmem [shape: f32[32,8], index: 4, kind: input, shape index: {}]   ;;  %s10425_s5 = inlined_call_operand.vmem [shape: f32[32,32], index: 5, kind: input, shape index: {}]   ;;  %s10426_s6 = inlined_call_operand.vmem [shape: f32[1,32], index: 6, kind: input, shape index: {}]   ;;  %s10427_s7 = inlined_call_operand.vmem [shape: f32[1,32], index: 7, kind: input, shape index: {}]   ;;  %s10428_s8 = inlined_call_operand.vmem [shape: f32[2,32,32], index: 8, kind: input, shape index: {}]   ;;  %s10429_s9 = inlined_call_operand.vmem [shape: f32[32,32], index: 9, kind: input, shape index: {}]   ;;  %s10430_s10 = inlined_call_operand.vmem [shape: f32[512,32], index: 10, kind: output, shape index: {}]  }
   0x1 LB: > { %s6229_s14 = sadd.s32 4294967295, %s8172_s13   ;;  %p6233_p0 = scmp.ge.s32.totalorder %s8172_s13, 1  ;;  %s8172_s13 = sphi %s8231_s13, %s20_s13  }
   0x2   : > { %p336_p1 = scmp.lt.s32.totalorder %s8172_s13, 3 }
   0x4   : > { %p337_p2 = pnand %p6233_p0, %p336_p1 }
   0x6   : > { %340 = sbr.rel (%p337_p2) target bundleno = 4815 (0x12cf), region = 60 }
   0xb   : > { %v479_v0 = vld [vmem:[%s10423_s3 + $0x18] sm:$0xff]  ;;  %v478_v1 = vld [vmem:[%s10423_s3 + $0x10] sm:$0xff]  ;;  %s6234_s19 = sshll.u32 %s6229_s14, 5  ;;  %v477_v2 = vld [vmem:[%s10423_s3 + $0x8] sm:$0xff]  ;;  %vm480_vm0 = vcmask 261120   ;;  %v10435_v18 = vmov 0.0  }
   0xc   : > { %6968 = vmatprep.subr.mxu0 %v479_v0  ;;  %p386_p3 = scmp.lt.s32.totalorder %s6234_s19, 63  ;;  %7688 = vmatprep.subr.mxu1 %v479_v0  ;;  %v476_v3 = vld [vmem:[%s10423_s3] sm:$0xff]  ;;  %vm1288_vm1 = vcmask 64512   ;;  %vm8175_vm2 = vmmov 0   ;;  %vm1199_vm3 = vcmask 523264   ;;  %s6238_s16 = sshll.u32 %s6229_s14, 2 }
   0xd   : > { %6969 = vmatpush3.msra.mxu0 %v479_v0  ;;  %7692 = vmatpush3.msra.mxu1 %v479_v0  ;;  %p398_p4 = scmp.lt.s32.totalorder %s6238_s16, 7 }
   0xe   : > { %6970 = vmatprep.subr.mxu0 %v478_v1  ;;  %s10534_s19 = smov (!%p386_p3, %s6234_s19), 63  ;;  %7689 = vmatprep.subr.mxu1 %v478_v1 }
   0xf   : > { %6971 = vmatpush3.msra.mxu0 %v478_v1  ;;  %7693 = vmatpush3.msra.mxu1 %v478_v1  ;;  %s8253_s24 = sshll.u32 %s10534_s19, 3  ;;  %s10536_s16 = smov (!%p398_p4, %s6238_s16), 7 }
  0x10   : > { %6972 = vmatprep.subr.mxu0 %v477_v2  ;;  %7690 = vmatprep.subr.mxu1 %v477_v2  ;;  %s8259_s27 = scalar_lea.vmem %s10420_s0, %s8253_s24  ;;  %s8409_s18 = scalar_lea.vmem %s10421_s1, %s8253_s24 }
  0x11   : > { %6973 = vmatpush3.msra.mxu0 %v477_v2  ;;  %7694 = vmatpush3.msra.mxu1 %v477_v2  ;;  %v8262_v4 = vld [vmem:[%s8259_s27] sm:$0xff]  ;;  %v8265_v5 = vld [vmem:[%s8259_s27 + $0x8] sm:$0xff]  ;;  %v8268_v6 = vld [vmem:[%s8259_s27 + $0x10] sm:$0xff]  ;;  %s6551_s17 = sshll.u32 %s10536_s16, 6  ;;  %s10333_s14 = scalar_lea.vmem %s10430_s10, %s8253_s24 }
  0x12   : > { %6974 = vmatprep.subr.mxu0 %v476_v3  ;;  %7691 = vmatprep.subr.mxu1 %v476_v3  ;;  %v8277_v7 = vld [vmem:[%s8259_s27 + $0x18] sm:$0xff]  ;;  %v414_v8 = vld [vmem:[%s8259_s27 + $0x20] sm:$0xff]  ;;  %v415_v9 = vld [vmem:[%s8259_s27 + $0x28] sm:$0xff]  ;;  %s9623_s20 = scalar_lea.vmem %s10422_s2, %s6551_s17 }
  0x13   : > { %6975 = vmatpush3.msra.mxu0 %v476_v3  ;;  %6976 = vmatprep.mubr.msk.f32.mxu0 %vm480_vm0, %v8262_v4  ;;  %v416_v10 = vld [vmem:[%s8259_s27 + $0x30] sm:$0xff]  ;;  %v417_v11 = vld [vmem:[%s8259_s27 + $0x38] sm:$0xff]  ;;  %v418_v14 = vld [vmem:[%s8259_s27 + $0x40] sm:$0xff] }
  0x14   : > { %6977 = vmatmul.mubr.msk.f32.vlgmr.msra.gmra.mxu0 %vm480_vm0, %v8265_v5  ;;  %7695 = vmatpush3.msra.mxu1 %v476_v3  ;;  %v419_v15 = vld [vmem:[%s8259_s27 + $0x48] sm:$0xff]  ;;  %v420_v16 = vld [vmem:[%s8259_s27 + $0x50] sm:$0xff]  ;;  %v421_v21 = vld [vmem:[%s8259_s27 + $0x58] sm:$0xff] }
  0x15   : > { %6979 = vmatprep.mubr.msk.f32.mxu0 %vm480_vm0, %v8268_v6  ;;  %7080 = vmatprep.subr.mxu0 %v10435_v18  ;;  %v428_v19 = vld [vmem:[%s8259_s27 + $0x90] sm:$0xff]  ;;  %v429_v22 = vld [vmem:[%s8259_s27 + $0x98] sm:$0xff]  ;;  %v430_v23 = vld [vmem:[%s8259_s27 + $0xa0] sm:$0xff] }
  0x16   : > { %7003 = vmatprep.mubr.msk.f32.mxu1 %vm480_vm0, %v428_v19  ;;  %v422_v24 = vld [vmem:[%s8259_s27 + $0x60] sm:$0xff]  ;;  %7081 = vmatpush3.msra.mxu0 %v417_v11  ;;  %v431_v26 = vld [vmem:[%s8259_s27 + $0xa8] sm:$0xff]  ;;  %v432_v27 = vld [vmem:[%s8259_s27 + $0xb0] sm:$0xff] }
  0x17   : > { %7004 = vmatmul.mubr.msk.f32.vlgmr.msra.gmra.mxu1 %vm480_vm0, %v429_v22  ;;  %7082 = vmatprep.subr.mxu0 %v10435_v18  ;;  %v423_v29 = vld [vmem:[%s8259_s27 + $0x68] sm:$0xff]  ;;  %v424_v33 = vld [vmem:[%s8259_s27 + $0x70] sm:$0xff]  ;;  %v433_v36 = vld [vmem:[%s8259_s27 + $0xb8] sm:$0xff] }
  0x18   : > { %6980 = vmatmul.mubr.msk.f32.gmra.mxu0 %vm480_vm0, %v8277_v7  ;;  %7006 = vmatprep.mubr.msk.f32.mxu1 %vm480_vm0, %v430_v23  ;;  %v425_v42 = vld [vmem:[%s8259_s27 + $0x78] sm:$0xff]  ;;  %v426_v47 = vld [vmem:[%s8259_s27 + $0x80] sm:$0xff]  ;;  %v427_v56 = vld [vmem:[%s8259_s27 + $0x88] sm:$0xff] }
  0x19   : > { %6982 = vmatprep.mubr.msk.f32.mxu0 %vm480_vm0, %v414_v8  ;;  %7083 = vmatpush3.msra.mxu0 %v416_v10 }
  0x1a   : > { %7084 = vmatprep.subr.mxu0 %v10435_v18 }
  0x1b   : > { %7007 = vmatmul.mubr.msk.f32.gmra.mxu1 %vm480_vm0, %v431_v26  ;;  %7085 = vmatpush3.msra.mxu0 %v415_v9 }
  0x1c   : > { %6983 = vmatmul.mubr.msk.f32.gmra.mxu0 %vm480_vm0, %v415_v9  ;;  %7009 = vmatprep.mubr.msk.f32.mxu1 %vm480_vm0, %v432_v27 }
  0x1d   : > { %6985 = vmatprep.mubr.msk.f32.mxu0 %vm480_vm0, %v416_v10  ;;  %7086 = vmatprep.subr.mxu0 %v10435_v18 }
  0x1e   : > { %7087 = vmatpush3.msra.mxu0 %v414_v8 }
  0x1f   : > { %7010 = vmatmul.mubr.msk.f32.gmra.mxu1 %vm480_vm0, %v433_v36  ;;  %7088 = vmatprep.subr.mxu0 %v10435_v18 }
  0x20   : > { %6986 = vmatmul.mubr.msk.f32.gmra.mxu0 %vm480_vm0, %v417_v11 }
  0x21   : > { %6988 = vmatprep.mubr.msk.f32.mxu0 %vm480_vm0, %v418_v14  ;;  %7089 = vmatpush3.msra.mxu0 %v8277_v7 }
  0x22   : > { %7090 = vmatprep.subr.mxu0 %v10435_v18 }
  0x23   : > { %7091 = vmatpush3.msra.mxu0 %v8268_v6 }
  0x24   : > { %6989 = vmatmul.mubr.msk.f32.gmra.mxu0 %vm480_vm0, %v419_v15  ;;  %7092 = vmatprep.subr.mxu0 %v10435_v18 }
  0x25   : > { %6991 = vmatprep.mubr.msk.f32.mxu0 %vm480_vm0, %v420_v16  ;;  %7093 = vmatpush3.msra.mxu0 %v8265_v5 }
  0x26   : > { %7094 = vmatprep.subr.mxu0 %v10435_v18 }
  0x27   : > { %7095 = vmatpush3.msra.mxu0 %v8262_v4 }
  0x28   : > { %6992 = vmatmul.mubr.msk.f32.gmra.mxu0 %vm480_vm0, %v421_v21  ;;  %7104 = vmatprep.subr.mxu0 %v10435_v18 }
  0x29   : > { %6994 = vmatprep.mubr.msk.f32.mxu0 %vm480_vm0, %v422_v24 }
  0x2c   : > { %6995 = vmatmul.mubr.msk.f32.gmra.mxu0 %vm480_vm0, %v423_v29 }
  0x2d   : > { %6997 = vmatprep.mubr.msk.f32.mxu0 %vm480_vm0, %v424_v33 }
  0x30   : > { %6998 = vmatmul.mubr.msk.f32.gmra.mxu0 %vm480_vm0, %v425_v42 }
  0x31   : > { %7000 = vmatprep.mubr.msk.f32.mxu0 %vm480_vm0, %v426_v47 }
  0x34   : > { %7001 = vmatmul.mubr.msk.f32.gmra.mxu0 %vm480_vm0, %v427_v56  ;;  %v438_v56 = vld [vmem:[%s8259_s27 + $0xe0] sm:$0xff] }
  0x35   : > { %7096 = vmatprep.mubr.msk.f32.mxu0 %vm8175_vm2, %v10435_v18 }
  0xd4   : > { %v8289_v12 = vpop.f32.mrf.mxu0 }
  0xd5   : > { %v803_v34 = vmax.f32 %v8289_v12, 0.0 }
  0xd6   : > { %v8291_v13 = vpop.f32.mrf.mxu0 }
  0xd7   : > { %v802_v30 = vmax.f32 %v8291_v13, 0.0  ;;  %v1290_v49 = vsel %vm1288_vm1, %v803_v34, -inf }
  0xd8   : > { %v8296_v17 = vpop.f32.mrf.mxu0 }
  0xd9   : > { %v805_v37 = vmax.f32 %v8296_v17, 0.0  ;;  %v1289_v43 = vsel %vm1288_vm1, %v802_v30, -inf }
  0xda   : > { %v8302_v20 = vpop.f32.mrf.mxu0 }
  0xdb   : > { %v804_v38 = vmax.f32 %v8302_v20, 0.0  ;;  %v1292_v50 = vsel %vm1288_vm1, %v805_v37, -inf }
  0xdc   : > { %v8311_v25 = vpop.f32.mrf.mxu0 }
  0xdd   : > { %v807_v31 = vmax.f32 %v8311_v25, 0.0  ;;  %v1291_v51 = vsel %vm1288_vm1, %v804_v38, -inf }
  0xde   : > { %v8318_v28 = vpop.f32.mrf.mxu0 }
  0xdf   : > { %v806_v32 = vmax.f32 %v8318_v28, 0.0  ;;  %v1295_v44 = vsel %vm1288_vm1, %v807_v31, -inf }
  0xe0   : > { %v8329_v35 = vpop.f32.mrf.mxu0  ;;  %v1296_v53 = vmax.f32 %v1290_v49, %v1295_v44  ;;  %v434_v49 = vld [vmem:[%s8259_s27 + $0xc0] sm:$0xff] }
  0xe1   : > { %v1293_v39 = vsel %vm1288_vm1, %v806_v32, -inf  ;;  %v809_v40 = vmax.f32 %v8329_v35, 0.0  ;;  %7012 = vmatprep.mubr.msk.f32.mxu1 %vm480_vm0, %v434_v49 }
  0xe2   : > { %v673_v41 = vpop.f32.mrf.mxu0  ;;  %v1294_v48 = vmax.f32 %v1289_v43, %v1293_v39 }
  0xe3   : > { %v1299_v45 = vsel %vm1288_vm1, %v809_v40, -inf  ;;  %v808_v46 = vmax.f32 %v673_v41, 0.0 }
  0xe4   : > { %v1300_v54 = vmax.f32 %v1292_v50, %v1299_v45  ;;  %v1301_v57 = vmax.f32 %v1294_v48, %v1296_v53  ;;  %v435_v50 = vld [vmem:[%s8259_s27 + $0xc8] sm:$0xff]  ;;  %v837_v53 = vld [vmem:[%s10424_s4 + $0x18] sm:$0xff] }
  0xe5   : > { %v1297_v52 = vsel %vm1288_vm1, %v808_v46, -inf  ;;  %7013 = vmatmul.mubr.msk.f32.gmra.mxu1 %vm480_vm0, %v435_v50  ;;  %7024 = vmatprep.subr.mxu1 %v837_v53 }
  0xe6   : > { %v1298_v55 = vmax.f32 %v1291_v51, %v1297_v52  ;;  %v436_v51 = vld [vmem:[%s8259_s27 + $0xd0] sm:$0xff]  ;;  %7025 = vmatpush3.msra.mxu1 %v837_v53 }
  0xe7   : > { %7015 = vmatprep.mubr.msk.f32.mxu1 %vm480_vm0, %v436_v51 }
  0xe8   : > { %v1302_v58 = vmax.f32 %v1298_v55, %v1300_v54  ;;  %v437_v54 = vld [vmem:[%s8259_s27 + $0xd8] sm:$0xff]  ;;  %v836_v55 = vld [vmem:[%s10424_s4 + $0x10] sm:$0xff] }
  0xe9   : > { %7016 = vmatmul.mubr.msk.f32.gmra.mxu1 %vm480_vm0, %v437_v54  ;;  %7026 = vmatprep.subr.mxu1 %v836_v55 }
  0xea   : > { %v1303_v59 = vmax.f32 %v1301_v57, %v1302_v58  ;;  %7018 = vmatprep.mubr.msk.f32.mxu1 %vm480_vm0, %v438_v56  ;;  %v439_v58 = vld [vmem:[%s8259_s27 + $0xe8] sm:$0xff]  ;;  %7027 = vmatpush3.msra.mxu1 %v836_v55 }
  0xec   : > { %v1304_v60 = vrot.slane %v1303_v59, 4 }
  0xed   : > { %7019 = vmatmul.mubr.msk.f32.gmra.mxu1 %vm480_vm0, %v439_v58 }
  0xee   : > { %v1305_v61 = vmax.f32 %v1303_v59, %v1304_v60  ;;  %v440_v59 = vld [vmem:[%s8259_s27 + $0xf0] sm:$0xff] }
  0xef   : > { %7021 = vmatprep.mubr.msk.f32.mxu1 %vm480_vm0, %v440_v59 }
  0xf0   : > { %v1306_v62 = vrot.slane %v1305_v61, 2 }
  0xf2   : > { %v1307_v63 = vmax.f32 %v1305_v61, %v1306_v62 }
  0xf4   : > { %v1308_v0 = vrot.slane %v1307_v63, 1 }
  0xf6   : > { %v1309_v1 = vmax.f32 %v1307_v63, %v1308_v0 }
  0xf8   : > { %v1310_v2 = vsub.f32 %v802_v30, %v1309_v1  ;;  %v1311_v3 = vsub.f32 %v803_v34, %v1309_v1  ;;  %v1312_v5 = vsub.f32 %v804_v38, %v1309_v1  ;;  %v1313_v6 = vsub.f32 %v805_v37, %v1309_v1 }
  0xf9   : > { %v1314_v4 = vsub.f32 %v806_v32, %v1309_v1  ;;  %v1315_v10 = vsub.f32 %v807_v31, %v1309_v1  ;;  %v1316_v12 = vsub.f32 %v808_v46, %v1309_v1  ;;  %v1317_v14 = vsub.f32 %v809_v40, %v1309_v1  ;;  %v441_v1 = vld [vmem:[%s8259_s27 + $0xf8] sm:$0xff] }
  0xfa   : > { %v1318_v7 = vmul.f32 1.442695, %v1310_v2  ;;  %v1320_v8 = vmul.f32 1.442695, %v1311_v3  ;;  %v1322_v9 = vmul.f32 1.442695, %v1312_v5  ;;  %7022 = vmatmul.mubr.msk.f32.gmra.mxu1 %vm480_vm0, %v441_v1 }
  0xfb   : > { %v1324_v11 = vmul.f32 1.442695, %v1313_v6  ;;  %v1326_v13 = vmul.f32 1.442695, %v1314_v4  ;;  %v1328_v15 = vmul.f32 1.442695, %v1315_v10 }
  0xfc   : > { %7706 = vpow2.f32 %v1318_v7  ;;  %v1330_v16 = vmul.f32 1.442695, %v1316_v12  ;;  %v1332_v17 = vmul.f32 1.442695, %v1317_v14  ;;  %v835_v2 = vld [vmem:[%s10424_s4 + $0x8] sm:$0xff]  ;;  %v834_v3 = vld [vmem:[%s10424_s4] sm:$0xff] }
  0xfd   : > { %7708 = vpow2.f32 %v1320_v8  ;;  %v442_v5 = vld [vmem:[%s8409_s18] sm:$0xff]  ;;  %7028 = vmatprep.subr.mxu1 %v835_v2  ;;  %v443_v7 = vld [vmem:[%s8409_s18 + $0x8] sm:$0xff]  ;;  %v444_v4 = vld [vmem:[%s8409_s18 + $0x10] sm:$0xff] }
  0xfe   : > { %7710 = vpow2.f32 %v1322_v9  ;;  %7032 = vmatprep.mubr.msk.f32.mxu1 %vm480_vm0, %v442_v5  ;;  %7029 = vmatpush3.msra.mxu1 %v835_v2  ;;  %v445_v8 = vld [vmem:[%s8409_s18 + $0x18] sm:$0xff]  ;;  %v446_v9 = vld [vmem:[%s8409_s18 + $0x20] sm:$0xff]  ;;  %v447_v10 = vld [vmem:[%s8409_s18 + $0x28] sm:$0xff] }
  0xff   : > { %7712 = vpow2.f32 %v1324_v11  ;;  %7030 = vmatprep.subr.mxu1 %v834_v3  ;;  %v448_v11 = vld [vmem:[%s8409_s18 + $0x30] sm:$0xff]  ;;  %v449_v12 = vld [vmem:[%s8409_s18 + $0x38] sm:$0xff]  ;;  %v451_v14 = vld [vmem:[%s8409_s18 + $0x48] sm:$0xff] }
 0x100   : > { %7714 = vpow2.f32 %v1326_v13  ;;  %7031 = vmatpush3.msra.mxu1 %v834_v3  ;;  %v450_v13 = vld [vmem:[%s8409_s18 + $0x40] sm:$0xff] }
 0x101   : > { %7716 = vpow2.f32 %v1328_v15  ;;  %7033 = vmatmul.mubr.msk.f32.vlgmr.msra.gmra.mxu1 %vm480_vm0, %v443_v7  ;;  %7099 = vmatprep.subr.mxu1 %v10435_v18  ;;  %v452_v15 = vld [vmem:[%s8409_s18 + $0x50] sm:$0xff] }
 0x102   : > { %7718 = vpow2.f32 %v1330_v16  ;;  %7035 = vmatprep.mubr.msk.f32.mxu1 %vm480_vm0, %v444_v4  ;;  %v453_v16 = vld [vmem:[%s8409_s18 + $0x58] sm:$0xff] }
 0x103   : > { %7720 = vpow2.f32 %v1332_v17  ;;  %v454_v17 = vld [vmem:[%s8409_s18 + $0x60] sm:$0xff] }
 0x105   : > { %7036 = vmatmul.mubr.msk.f32.gmra.mxu1 %vm480_vm0, %v445_v8 }
 0x106   : > { %7038 = vmatprep.mubr.msk.f32.mxu1 %vm480_vm0, %v446_v9 }
 0x109   : > { %v7707_v19 = vpop.eup %7706  ;;  %7039 = vmatmul.mubr.msk.f32.gmra.mxu1 %vm480_vm0, %v447_v10 }
 0x10a   : > { %v7709_v20 = vpop.eup %7708  ;;  %v1334_v21 = vsel %vm1288_vm1, %v7707_v19, 0.0  ;;  %7041 = vmatprep.mubr.msk.f32.mxu1 %vm480_vm0, %v448_v11 }
 0x10b   : > { %v7711_v22 = vpop.eup %7710  ;;  %v1335_v23 = vsel %vm1288_vm1, %v7709_v20, 0.0 }
 0x10c   : > { %v7713_v24 = vpop.eup %7712  ;;  %v1336_v25 = vadd.f32 %v1335_v23, %v1334_v21  ;;  %v1337_v26 = vsel %vm1288_vm1, %v7711_v22, 0.0  ;;  %v457_v21 = vld [vmem:[%s8409_s18 + $0x78] sm:$0xff]  ;;  %v459_v23 = vld [vmem:[%s8409_s18 + $0x88] sm:$0xff] }
 0x10d   : > { %v7715_v27 = vpop.eup %7714  ;;  %v1339_v29 = vsel %vm1288_vm1, %v7713_v24, 0.0  ;;  %7042 = vmatmul.mubr.msk.f32.gmra.mxu1 %vm480_vm0, %v449_v12 }
 0x10e   : > { %v1338_v28 = vadd.f32 %v1337_v26, %v1336_v25  ;;  %v7717_v30 = vpop.eup %7716  ;;  %v1341_v32 = vsel %vm1288_vm1, %v7715_v27, 0.0  ;;  %7044 = vmatprep.mubr.msk.f32.mxu1 %vm480_vm0, %v450_v13  ;;  %v461_v25 = vld [vmem:[%s8409_s18 + $0x98] sm:$0xff]  ;;  %v462_v26 = vld [vmem:[%s8409_s18 + $0xa0] sm:$0xff] }
 0x10f   : > { %v7719_v33 = vpop.eup %7718  ;;  %v1343_v35 = vsel %vm1288_vm1, %v7717_v30, 0.0 }
 0x110   : > { %v1340_v31 = vadd.f32 %v1339_v29, %v1338_v28  ;;  %v7721_v36 = vpop.eup %7720  ;;  %v1345_v38 = vsel %vm1288_vm1, %v7719_v33, 0.0  ;;  %v464_v28 = vld [vmem:[%s8409_s18 + $0xb0] sm:$0xff]  ;;  %v465_v29 = vld [vmem:[%s8409_s18 + $0xb8] sm:$0xff] }
 0x111   : > { %v1347_v40 = vsel %vm1288_vm1, %v7721_v36, 0.0  ;;  %7045 = vmatmul.mubr.msk.f32.gmra.mxu1 %vm480_vm0, %v451_v14 }
 0x112   : > { %v1342_v34 = vadd.f32 %v1341_v32, %v1340_v31  ;;  %7047 = vmatprep.mubr.msk.f32.mxu1 %vm480_vm0, %v452_v15  ;;  %v467_v31 = vld [vmem:[%s8409_s18 + $0xc8] sm:$0xff]  ;;  %v468_v32 = vld [vmem:[%s8409_s18 + $0xd0] sm:$0xff] }
 0x114   : > { %v1344_v37 = vadd.f32 %v1343_v35, %v1342_v34  ;;  %v470_v34 = vld [vmem:[%s8409_s18 + $0xe0] sm:$0xff]  ;;  %v471_v35 = vld [vmem:[%s8409_s18 + $0xe8] sm:$0xff] }
 0x115   : > { %7048 = vmatmul.mubr.msk.f32.gmra.mxu1 %vm480_vm0, %v453_v16 }
 0x116   : > { %v1346_v39 = vadd.f32 %v1345_v38, %v1344_v37  ;;  %7050 = vmatprep.mubr.msk.f32.mxu1 %vm480_vm0, %v454_v17  ;;  %v473_v37 = vld [vmem:[%s8409_s18 + $0xf8] sm:$0xff]  ;;  %v8482_v38 = vpop.f32.mrf.mxu0 }
 0x118   : > { %v1348_v41 = vadd.f32 %v1347_v40, %v1346_v39  ;;  %v8484_v39 = vpop.f32.mrf.mxu0  ;;  %v8486_v40 = vpop.f32.mrf.mxu1 }
 0x11a   : > { %v1349_v42 = vrot.slane %v1348_v41, 4 }
 0x11c   : > { %v1350_v43 = vadd.f32 %v1349_v42, %v1348_v41  ;;  %v8488_v41 = vpop.f32.mrf.mxu0  ;;  %v8490_v42 = vpop.f32.mrf.mxu1 }
 0x11d   : > { %v820_v56 = vmax.f32 %v8490_v42, 0.0 }
 0x11e   : > { %v1351_v44 = vrot.slane %v1350_v43, 2 }
 0x11f   : > { %v2758_v10 = vsel %vm1288_vm1, %v820_v56, -inf }
 0x120   : > { %v1352_v45 = vadd.f32 %v1351_v44, %v1350_v43  ;;  %v811_v43 = vmax.f32 %v8482_v38, 0.0  ;;  %v810_v44 = vmax.f32 %v8484_v39, 0.0 }
 0x122   : > { %v1353_v46 = vrot.slane %v1352_v45, 1  ;;  %v2032_v51 = vsel %vm1288_vm1, %v811_v43, -inf  ;;  %v2031_v53 = vsel %vm1288_vm1, %v810_v44, -inf }
 0x124   : > { %v1354_v47 = vadd.f32 %v1353_v46, %v1352_v45  ;;  %v8494_v45 = vpop.f32.mrf.mxu0  ;;  %v8496_v46 = vpop.f32.mrf.mxu1 }
 0x125   : > { %v812_v54 = vmax.f32 %v8494_v45, 0.0  ;;  %v823_v1 = vmax.f32 %v8496_v46, 0.0 }
 0x126   : > { %7722 = vrcp.f32 %v1354_v47  ;;  %v821_v47 = vmax.f32 %v8486_v40, 0.0  ;;  %v8500_v49 = vpop.f32.mrf.mxu0  ;;  %v8502_v50 = vpop.f32.mrf.mxu1 }
 0x127   : > { %v2033_v4 = vsel %vm1288_vm1, %v812_v54, -inf  ;;  %v822_v14 = vmax.f32 %v8502_v50, 0.0 }
 0x128   : > { %v8512_v55 = vpop.f32.mrf.mxu0 }
 0x129   : > { %v814_v59 = vmax.f32 %v8512_v55, 0.0 }
 0x12b   : > { %v2035_v3 = vsel %vm1288_vm1, %v814_v59, -inf }
 0x12c   : > { %v2036_v8 = vmax.f32 %v2031_v53, %v2035_v3  ;;  %v1630_v3 = vld [vmem:[%s10425_s5 + $0x10] sm:$0xff] }
 0x133   : > { %v7723_v48 = vpop.eup %7722 }
 0x134   : > { %v1356_v52 = vmul.f32 %v7723_v48, %v7707_v19  ;;  %v1357_v57 = vmul.f32 %v7723_v48, %v7709_v20  ;;  %v1358_v60 = vmul.f32 %v7723_v48, %v7711_v22  ;;  %v1359_v61 = vmul.f32 %v7723_v48, %v7713_v24  ;;  %v455_v19 = vld [vmem:[%s8409_s18 + $0x68] sm:$0xff]  ;;  %v456_v20 = vld [vmem:[%s8409_s18 + $0x70] sm:$0xff]  ;;  %v458_v22 = vld [vmem:[%s8409_s18 + $0x80] sm:$0xff] }
 0x135   : > { %v1360_v62 = vmul.f32 %v7723_v48, %v7715_v27  ;;  %v1361_v63 = vmul.f32 %v7723_v48, %v7717_v30  ;;  %v1362_v0 = vmul.f32 %v7723_v48, %v7719_v33  ;;  %v1363_v6 = vmul.f32 %v7723_v48, %v7721_v36  ;;  %7051 = vmatmul.mubr.msk.f32.gmra.mxu1 %vm480_vm0, %v455_v19  ;;  %v460_v24 = vld [vmem:[%s8409_s18 + $0x90] sm:$0xff]  ;;  %v463_v27 = vld [vmem:[%s8409_s18 + $0xa8] sm:$0xff]  ;;  %v466_v30 = vld [vmem:[%s8409_s18 + $0xc0] sm:$0xff] }
 0x136   : > { %1439 = vxpose.xlu0.b32.start [1/8] (short) (narrow) %v1356_v52, 8  ;;  %7053 = vmatprep.mubr.msk.f32.mxu1 %vm480_vm0, %v456_v20  ;;  %v469_v33 = vld [vmem:[%s8409_s18 + $0xd8] sm:$0xff]  ;;  %v472_v36 = vld [vmem:[%s8409_s18 + $0xf0] sm:$0xff]  ;;  %v813_v48 = vmax.f32 %v8488_v41, 0.0  ;;  %v815_v52 = vmax.f32 %v8500_v49, 0.0  ;;  %v2762_v20 = vsel %vm1288_vm1, %v823_v1, -inf }
 0x138   : > { %v2037_v58 = vsel %vm1288_vm1, %v815_v52, -inf }
 0x139   : > { %7054 = vmatmul.mubr.msk.f32.gmra.mxu1 %vm480_vm0, %v457_v21 }
 0x13a   : > { %1440 = vxpose.xlu0.b32.cont [2/8] (short) (narrow) %v1357_v57, 8  ;;  %7056 = vmatprep.mubr.msk.f32.mxu1 %vm480_vm0, %v458_v22  ;;  %v8515_v57 = vpop.f32.mrf.mxu1 }
 0x13c   : > { %v8529_v2 = vpop.f32.mrf.mxu1 }
 0x13d   : > { %7057 = vmatmul.mubr.msk.f32.gmra.mxu1 %vm480_vm0, %v459_v23  ;;  %v824_v7 = vmax.f32 %v8529_v2, 0.0 }
 0x13e   : > { %1441 = vxpose.xlu0.b32.cont [3/8] (short) (narrow) %v1358_v60, 8  ;;  %7059 = vmatprep.mubr.msk.f32.mxu1 %vm480_vm0, %v460_v24  ;;  %v2759_v60 = vsel %vm1288_vm1, %v821_v47, -inf }
 0x13f   : > { %v2764_v15 = vsel %vm1288_vm1, %v824_v7, -inf }
 0x141   : > { %7060 = vmatmul.mubr.msk.f32.gmra.mxu1 %vm480_vm0, %v461_v25  ;;  %v2765_v25 = vmax.f32 %v2758_v10, %v2764_v15 }
 0x142   : > { %1442 = vxpose.xlu0.b32.cont [4/8] (short) (narrow) %v1359_v61, 8  ;;  %7062 = vmatprep.mubr.msk.f32.mxu1 %vm480_vm0, %v462_v26  ;;  %v825_v61 = vmax.f32 %v8515_v57, 0.0  ;;  %v2760_v26 = vsel %vm1288_vm1, %v822_v14, -inf }
 0x145   : > { %7063 = vmatmul.mubr.msk.f32.gmra.mxu1 %vm480_vm0, %v463_v27 }
 0x146   : > { %1443 = vxpose.xlu0.b32.cont [5/8] (short) (narrow) %v1360_v62, 8  ;;  %7065 = vmatprep.mubr.msk.f32.mxu1 %vm480_vm0, %v464_v28  ;;  %v2034_v62 = vsel %vm1288_vm1, %v813_v48, -inf }
 0x149   : > { %7066 = vmatmul.mubr.msk.f32.gmra.mxu1 %vm480_vm0, %v465_v29 }
 0x14a   : > { %1444 = vxpose.xlu0.b32.cont [6/8] (short) (narrow) %v1361_v63, 8  ;;  %7068 = vmatprep.mubr.msk.f32.mxu1 %vm480_vm0, %v466_v30  ;;  %v2038_v63 = vmax.f32 %v2032_v51, %v2037_v58 }
 0x14c   : > { %v2043_v22 = vmax.f32 %v2036_v8, %v2038_v63  ;;  %v1629_v8 = vld [vmem:[%s10425_s5 + $0x8] sm:$0xff] }
 0x14d   : > { %7069 = vmatmul.mubr.msk.f32.gmra.mxu1 %vm480_vm0, %v467_v31 }
 0x14e   : > { %1445 = vxpose.xlu0.b32.cont [7/8] (short) (narrow) %v1362_v0, 8  ;;  %7071 = vmatprep.mubr.msk.f32.mxu1 %vm480_vm0, %v468_v32  ;;  %v6999_v0 = vpop.f32.mrf.mxu0 }
 0x14f   : > { %v817_v5 = vmax.f32 %v6999_v0, 0.0 }
 0x150   : > { %v8541_v9 = vpop.f32.mrf.mxu0 }
 0x151   : > { %7072 = vmatmul.mubr.msk.f32.gmra.mxu1 %vm480_vm0, %v469_v33  ;;  %v2041_v12 = vsel %vm1288_vm1, %v817_v5, -inf  ;;  %v816_v13 = vmax.f32 %v8541_v9, 0.0 }
 0x152   : > { %1446 = vxpose.xlu0.b32.end [8/8] (short) (narrow) %v1363_v6, 8  ;;  %7074 = vmatprep.mubr.msk.f32.mxu1 %vm480_vm0, %v470_v34  ;;  %v2766_v6 = vsel %vm1288_vm1, %v825_v61, -inf  ;;  %v2042_v16 = vmax.f32 %v2034_v62, %v2041_v12  ;;  %v7002_v17 = vpop.f32.mrf.mxu0 }
 0x153   : > { %v2767_v11 = vmax.f32 %v2759_v60, %v2766_v6  ;;  %v2039_v19 = vsel %vm1288_vm1, %v816_v13, -inf  ;;  %v819_v21 = vmax.f32 %v7002_v17, 0.0  ;;  %v1631_v60 = vld [vmem:[%s10425_s5 + $0x18] sm:$0xff] }
 0x154   : > { %v2040_v23 = vmax.f32 %v2033_v4, %v2039_v19  ;;  %v8558_v24 = vpop.f32.mrf.mxu0 }
 0x155   : > { %7075 = vmatmul.mubr.msk.f32.gmra.mxu1 %vm480_vm0, %v471_v35  ;;  %v2757_v27 = vsel %vm1288_vm1, %v819_v21, -inf  ;;  %v818_v28 = vmax.f32 %v8558_v24, 0.0  ;;  %v2769_v34 = vmax.f32 %v2765_v25, %v2767_v11 }
 0x156   : > { %7077 = vmatprep.mubr.msk.f32.mxu1 %vm480_vm0, %v472_v36  ;;  %v2044_v29 = vmax.f32 %v2040_v23, %v2042_v16  ;;  %v2763_v30 = vmax.f32 %v2757_v27, %v2762_v20 }
 0x157   : > { %v2756_v31 = vsel %vm1288_vm1, %v818_v28, -inf }
 0x158   : > { %v2045_v32 = vmax.f32 %v2043_v22, %v2044_v29  ;;  %v2761_v33 = vmax.f32 %v2756_v31, %v2760_v26 }
 0x159   : > { %7078 = vmatmul.mubr.msk.f32.gmra.mxu1 %vm480_vm0, %v473_v37 }
 0x15a   : > { %7101 = vmatprep.mubr.msk.f32.mxu1 %vm8175_vm2, %v10435_v18  ;;  %v2046_v35 = vrot.slane %v2045_v32, 4  ;;  %v2768_v36 = vmax.f32 %v2761_v33, %v2763_v30 }
 0x15c   : > { %v2047_v37 = vmax.f32 %v2045_v32, %v2046_v35  ;;  %v2770_v51 = vmax.f32 %v2768_v36, %v2769_v34 }
 0x15e   : > { %v2048_v53 = vrot.slane %v2047_v37, 2  ;;  %v2771_v58 = vrot.slane %v2770_v51, 4 }
 0x160   : > { %v2049_v63 = vmax.f32 %v2047_v37, %v2048_v53  ;;  %v2772_v0 = vmax.f32 %v2770_v51, %v2771_v58 }
 0x162   : > { %v2050_v6 = vrot.slane %v2049_v63, 1  ;;  %v2773_v4 = vrot.slane %v2772_v0, 2 }
 0x164   : > { %v2051_v10 = vmax.f32 %v2049_v63, %v2050_v6  ;;  %v2774_v11 = vmax.f32 %v2772_v0, %v2773_v4 }
 0x166   : > { %v2055_v12 = vsub.f32 %v813_v48, %v2051_v10  ;;  %v2057_v15 = vsub.f32 %v815_v52, %v2051_v10  ;;  %v2059_v16 = vsub.f32 %v817_v5, %v2051_v10  ;;  %v2775_v17 = vrot.slane %v2774_v11, 1 }
 0x167   : > { %v2053_v20 = vsub.f32 %v811_v43, %v2051_v10  ;;  %v2056_v48 = vsub.f32 %v814_v59, %v2051_v10  ;;  %v2052_v52 = vsub.f32 %v810_v44, %v2051_v10  ;;  %v2054_v38 = vsub.f32 %v812_v54, %v2051_v10 }
 0x168   : > { %v2776_v19 = vmax.f32 %v2774_v11, %v2775_v17  ;;  %v2066_v43 = vmul.f32 1.442695, %v2055_v12  ;;  %v2058_v55 = vsub.f32 %v816_v13, %v2051_v10  ;;  %v2070_v57 = vmul.f32 1.442695, %v2057_v15 }
 0x169   : > { %v2068_v5 = vmul.f32 1.442695, %v2056_v48  ;;  %v2062_v46 = vmul.f32 1.442695, %v2053_v20 }
 0x16a   : > { %v2778_v22 = vsub.f32 %v819_v21, %v2776_v19  ;;  %v2780_v23 = vsub.f32 %v821_v47, %v2776_v19  ;;  %v2782_v41 = vsub.f32 %v823_v1, %v2776_v19  ;;  %v2784_v49 = vsub.f32 %v825_v61, %v2776_v19 }
 0x16b   : > { %v2060_v21 = vmul.f32 1.442695, %v2052_v52  ;;  %v2779_v40 = vsub.f32 %v820_v56, %v2776_v19  ;;  %v2064_v47 = vmul.f32 1.442695, %v2054_v38  ;;  %7724 = vpow2.f32 %v2066_v43 }
 0x16c   : > { %7726 = vpow2.f32 %v2068_v5  ;;  %v2787_v59 = vmul.f32 1.442695, %v2778_v22  ;;  %v2781_v44 = vsub.f32 %v822_v14, %v2776_v19  ;;  %v2777_v45 = vsub.f32 %v818_v28, %v2776_v19 }
 0x16d   : > { %7728 = vpow2.f32 %v2060_v21  ;;  %v2789_v39 = vmul.f32 1.442695, %v2779_v40  ;;  %v2072_v42 = vmul.f32 1.442695, %v2058_v55  ;;  %v2783_v54 = vsub.f32 %v824_v7, %v2776_v19 }
 0x16e   : > { %7730 = vpow2.f32 %v2062_v46  ;;  %v2791_v56 = vmul.f32 1.442695, %v2780_v23  ;;  %v2785_v61 = vmul.f32 1.442695, %v2777_v45  ;;  %v2074_v1 = vmul.f32 1.442695, %v2059_v16 }
 0x16f   : > { %7732 = vpow2.f32 %v2064_v47  ;;  %v2793_v9 = vmul.f32 1.442695, %v2781_v44  ;;  %v2795_v13 = vmul.f32 1.442695, %v2782_v41  ;;  %v2797_v24 = vmul.f32 1.442695, %v2783_v54 }
 0x170   : > { %7734 = vpow2.f32 %v2070_v57  ;;  %v2799_v2 = vmul.f32 1.442695, %v2784_v49 }
 0x171   : > { %7736 = vpow2.f32 %v2787_v59 }
 0x172   : > { %7738 = vpow2.f32 %v2789_v39 }
 0x173   : > { %7740 = vpow2.f32 %v2785_v61 }
 0x174   : > { %7742 = vpow2.f32 %v2072_v42 }
 0x175   : > { %7744 = vpow2.f32 %v2791_v56  ;;  %v1628_v56 = vld [vmem:[%s10425_s5] sm:$0xff] }
 0x176   : > { %7746 = vpow2.f32 %v2074_v1 }
 0x177   : > { %7748 = vpow2.f32 %v2793_v9 }
 0x178   : > { %v8607_v50 = vpop.eup %7724  ;;  %7750 = vpow2.f32 %v2795_v13 }
 0x179   : > { %v8609_v14 = vpop.eup %7726  ;;  %7752 = vpow2.f32 %v2797_v24  ;;  %v2081_v33 = vsel %vm1288_vm1, %v8607_v50, 0.0 }
 0x17a   : > { %v8611_v7 = vpop.eup %7728  ;;  %7754 = vpow2.f32 %v2799_v2  ;;  %v2083_v37 = vsel %vm1288_vm1, %v8609_v14, 0.0 }
 0x17b   : > { %v8613_v25 = vpop.eup %7730  ;;  %v2076_v26 = vsel %vm1288_vm1, %v8611_v7, 0.0 }
 0x17c   : > { %v8617_v27 = vpop.eup %7732  ;;  %v2077_v28 = vsel %vm1288_vm1, %v8613_v25, 0.0 }
 0x17d   : > { %v8621_v29 = vpop.eup %7734  ;;  %v2078_v30 = vadd.f32 %v2077_v28, %v2076_v26  ;;  %v2079_v31 = vsel %vm1288_vm1, %v8617_v27, 0.0 }
 0x17e   : > { %v8625_v32 = vpop.eup %7736  ;;  %v2085_v63 = vsel %vm1288_vm1, %v8621_v29, 0.0 }
 0x17f   : > { %v8629_v34 = vpop.eup %7738  ;;  %v2080_v35 = vadd.f32 %v2079_v31, %v2078_v30 }
 0x180   : > { %v8631_v36 = vpop.eup %7740  ;;  %v2804_v4 = vsel %vm1288_vm1, %v8629_v34, 0.0 }
 0x181   : > { %v8635_v51 = vpop.eup %7742  ;;  %v2082_v53 = vadd.f32 %v2081_v33, %v2080_v35  ;;  %v2801_v58 = vsel %vm1288_vm1, %v8631_v36, 0.0 }
 0x182   : > { %v2087_v10 = vsel %vm1288_vm1, %v8635_v51, 0.0 }
 0x183   : > { %v2084_v6 = vadd.f32 %v2083_v37, %v2082_v53 }
 0x185   : > { %v2086_v15 = vadd.f32 %v2085_v63, %v2084_v6 }
 0x187   : > { %v2088_v22 = vadd.f32 %v2087_v10, %v2086_v15 }
 0x1a5   : > { %v8672_v9 = vpop.f32.mrf.mxu1 }
 0x1a6   : > { %v827_v2 = vmax.f32 %v8672_v9, 0.0 }
 0x1a7   : > { %v8674_v13 = vpop.f32.mrf.mxu1 }
 0x1a8   : > { %v3482_v31 = vsel %vm1288_vm1, %v827_v2, -inf }
 0x1a9   : > { %v8676_v24 = vpop.f32.mrf.mxu1 }
 0x1ab   : > { %v8679_v26 = vpop.f32.mrf.mxu1 }
 0x1ad   : > { %v8681_v30 = vpop.f32.mrf.mxu1 }
 0x1ae   : > { %v831_v33 = vmax.f32 %v8681_v30, 0.0 }
 0x1b2   : > { %v1455_v62 = vpop.trf.xlu0 }
 0x1b3   : > { %7097 = vmatmul.mubr.msk.f32.vlgmr.msra.gmra.mxu0 %vm1199_vm3, %v1455_v62  ;;  %v8641_v62 = vpop.eup %7744 }
 0x1b4   : > { %7105 = vmatpush3.msra.mxu0 %v1631_v60  ;;  %7112 = vmatprep.mubr.msk.f32.mxu0 %vm8175_vm2, %v10435_v18  ;;  %v2802_v60 = vsel %vm1288_vm1, %v8625_v32, 0.0  ;;  %v2806_v16 = vsel %vm1288_vm1, %v8641_v62, 0.0 }
 0x1b5   : > { %7106 = vmatprep.subr.mxu0 %v10435_v18  ;;  %v2803_v0 = vadd.f32 %v2802_v60, %v2801_v58 }
 0x1b6   : > { %7107 = vmatpush3.msra.mxu0 %v1630_v3  ;;  %v7747_v3 = vpop.eup %7746 }
 0x1b7   : > { %7108 = vmatprep.subr.mxu0 %v10435_v18  ;;  %v2805_v11 = vadd.f32 %v2804_v4, %v2803_v0  ;;  %v2089_v19 = vsel %vm1288_vm1, %v7747_v3, 0.0  ;;  %v8719_v4 = vpop.f32.mrf.mxu1 }
 0x1b8   : > { %7109 = vmatpush3.msra.mxu0 %v1629_v8  ;;  %v8647_v8 = vpop.eup %7748  ;;  %v2090_v49 = vadd.f32 %v2089_v19, %v2088_v22  ;;  %v10443_v10 = vmax.f32 %v8719_v4, 0.0 }
 0x1b9   : > { %7110 = vmatprep.subr.mxu0 %v10435_v18  ;;  %v8651_v12 = vpop.eup %7750  ;;  %v2807_v20 = vadd.f32 %v2806_v16, %v2805_v11  ;;  %v2808_v23 = vsel %vm1288_vm1, %v8647_v8, 0.0  ;;  %v829_v11 = vmax.f32 %v8676_v24, 0.0 }
 0x1ba   : > { %v8655_v17 = vpop.eup %7752  ;;  %v2810_v52 = vsel %vm1288_vm1, %v8651_v12, 0.0  ;;  %v2091_v5 = vrot.slane %v2090_v49, 4  ;;  %7111 = vmatpush3.msra.mxu0 %v1628_v56 }
 0x1bb   : > { %v2809_v41 = vadd.f32 %v2808_v23, %v2807_v20  ;;  %v2812_v48 = vsel %vm1288_vm1, %v8655_v17, 0.0  ;;  %v8664_v38 = vpop.eup %7754  ;;  %7134 = vmatprep.subr.mxu0 %v10435_v18  ;;  %v3484_v15 = vsel %vm1288_vm1, %v829_v11, -inf }
 0x1bc   : > { %v2092_v40 = vadd.f32 %v2091_v5, %v2090_v49  ;;  %v2814_v46 = vsel %vm1288_vm1, %v8664_v38, 0.0 }
 0x1bd   : > { %v2811_v43 = vadd.f32 %v2810_v52, %v2809_v41 }
 0x1be   : > { %v2093_v55 = vrot.slane %v2092_v40, 2 }
 0x1bf   : > { %v2813_v21 = vadd.f32 %v2812_v48, %v2811_v43 }
 0x1c0   : > { %v2094_v59 = vadd.f32 %v2093_v55, %v2092_v40 }
 0x1c1   : > { %v2815_v47 = vadd.f32 %v2814_v46, %v2813_v21 }
 0x1c2   : > { %v2095_v44 = vrot.slane %v2094_v59, 1 }
 0x1c3   : > { %v2816_v57 = vrot.slane %v2815_v47, 4 }
 0x1c4   : > { %v2096_v42 = vadd.f32 %v2095_v44, %v2094_v59 }
 0x1c5   : > { %v2817_v39 = vadd.f32 %v2816_v57, %v2815_v47 }
 0x1c6   : > { %7756 = vrcp.f32 %v2096_v42 }
 0x1c7   : > { %v2818_v45 = vrot.slane %v2817_v39, 2 }
 0x1c9   : > { %v2819_v54 = vadd.f32 %v2818_v45, %v2817_v39 }
 0x1cb   : > { %v2820_v61 = vrot.slane %v2819_v54, 1 }
 0x1cd   : > { %v2821_v1 = vadd.f32 %v2820_v61, %v2819_v54 }
 0x1cf   : > { %7758 = vrcp.f32 %v2821_v1 }
 0x1d3   : > { %v7757_v28 = vpop.eup %7756 }
 0x1d4   : > { %v8688_v35 = vmul.f32 %v7757_v28, %v8611_v7  ;;  %v8691_v37 = vmul.f32 %v7757_v28, %v8613_v25  ;;  %v8694_v53 = vmul.f32 %v7757_v28, %v8617_v27  ;;  %v8697_v58 = vmul.f32 %v7757_v28, %v8607_v50 }
 0x1d5   : > { %v8700_v60 = vmul.f32 %v7757_v28, %v8609_v14  ;;  %v8703_v63 = vmul.f32 %v7757_v28, %v8621_v29  ;;  %v3487_v7 = vsel %vm1288_vm1, %v831_v33, -inf  ;;  %v8709_v0 = vmul.f32 %v7757_v28, %v8635_v51 }
 0x1d6   : > { %v8711_v25 = vmul.f32 %v7757_v28, %v7747_v3  ;;  %v3488_v27 = vmax.f32 %v3482_v31, %v3487_v7  ;;  %v10448_v29 = vmax.f32 %v8674_v13, 0.0  ;;  %v828_v3 = vmax.f32 %v8679_v26, 0.0 }
 0x1d8   : > { %v3481_v51 = vsel %vm1288_vm1, %v10448_v29, -inf  ;;  %v3483_v22 = vsel %vm1288_vm1, %v828_v3, -inf }
 0x1dc   : > { %v7759_v6 = vpop.eup %7758 }
 0x1dd   : > { %v8714_v50 = vmul.f32 %v7759_v6, %v8631_v36  ;;  %v8717_v14 = vmul.f32 %v7759_v6, %v8625_v32  ;;  %v3485_v36 = vsel %vm1288_vm1, %v10443_v10, -inf  ;;  %v7023_v32 = vpop.f32.mrf.mxu1  ;;  %v8740_v49 = vmul.f32 %v7759_v6, %v8629_v34 }
 0x1de   : > { %v833_v16 = vmax.f32 %v7023_v32, 0.0  ;;  %v3486_v19 = vmax.f32 %v3481_v51, %v3485_v36  ;;  %v8743_v52 = vmul.f32 %v7759_v6, %v8641_v62  ;;  %v8746_v43 = vmul.f32 %v7759_v6, %v8647_v8 }
 0x1df   : > { %10470 = vst [vmem:[#allocation2_spill] sm:$0xff] %v8714_v50  ;;  %10471 = vst [vmem:[#allocation3_spill] sm:$0xff] %v8717_v14  ;;  %v8732_v20 = vpop.f32.mrf.mxu1  ;;  %v8754_v40 = vmul.f32 %v7759_v6, %v8651_v12  ;;  %v8757_v46 = vmul.f32 %v7759_v6, %v8655_v17  ;;  %v8760_v34 = vmul.f32 %v7759_v6, %v8664_v38 }
 0x1e0   : > { %v3491_v23 = vsel %vm1288_vm1, %v833_v16, -inf  ;;  %v10437_v41 = vmax.f32 %v8732_v20, 0.0  ;;  %10472 = vst [vmem:[#allocation4_spill] sm:$0xff] %v8740_v49  ;;  %10473 = vst [vmem:[#allocation5_spill] sm:$0xff] %v8743_v52  ;;  %v3493_v62 = vmax.f32 %v3486_v19, %v3488_v27 }
 0x1e1   : > { %v3492_v48 = vmax.f32 %v3484_v15, %v3491_v23  ;;  %10474 = vst [vmem:[#allocation6_spill] sm:$0xff] %v8746_v43  ;;  %v8751_v21 = vpop.f32.mrf.mxu1  ;;  %10475 = vst [vmem:[#allocation7_spill] sm:$0xff] %v8754_v40 }
 0x1e2   : > { %v3489_v5 = vsel %vm1288_vm1, %v10437_v41, -inf  ;;  %10476 = vst [vmem:[#allocation8_spill] sm:$0xff] %v8757_v46  ;;  %10477 = vst [vmem:[#allocation9_spill] sm:$0xff] %v8760_v34  ;;  %v1160_v39 = vmax.f32 %v8751_v21, 0.0 }
 0x1e3   : > { %v3490_v47 = vmax.f32 %v3483_v22, %v3489_v5  ;;  %v8762_v55 = vpop.f32.mrf.mxu1 }
 0x1e4   : > { %v10434_v44 = vmax.f32 %v8762_v55, 0.0  ;;  %v1365_v38 = vsel %vm1288_vm1, %v1160_v39, -inf }
 0x1e5   : > { %v3494_v8 = vmax.f32 %v3490_v47, %v3492_v48  ;;  %v8764_v57 = vpop.f32.mrf.mxu1 }
 0x1e6   : > { %v1162_v54 = vmax.f32 %v8764_v57, 0.0  ;;  %v1364_v61 = vsel %vm1288_vm1, %v10434_v44, -inf }
 0x1e7   : > { %v3495_v59 = vmax.f32 %v3493_v62, %v3494_v8  ;;  %v8768_v12 = vpop.f32.mrf.mxu1 }
 0x1e8   : > { %v10433_v28 = vmax.f32 %v8768_v12, 0.0  ;;  %v1367_v36 = vsel %vm1288_vm1, %v1162_v54, -inf }
 0x1e9   : > { %v3496_v45 = vrot.slane %v3495_v59, 4  ;;  %v8770_v17 = vpop.f32.mrf.mxu1 }
 0x1ea   : > { %v1164_v56 = vmax.f32 %v8770_v17, 0.0  ;;  %v1366_v48 = vsel %vm1288_vm1, %v10433_v28, -inf }
 0x1eb   : > { %v3497_v42 = vmax.f32 %v3495_v59, %v3496_v45  ;;  %v8780_v1 = vpop.f32.mrf.mxu1 }
 0x1ec   : > { %v1370_v31 = vsel %vm1288_vm1, %v1164_v56, -inf  ;;  %v10432_v7 = vmax.f32 %v8780_v1, 0.0 }
 0x1ed   : > { %v3498_v24 = vrot.slane %v3497_v42, 2  ;;  %v1371_v27 = vmax.f32 %v1365_v38, %v1370_v31  ;;  %v8787_v6 = vpop.f32.mrf.mxu1 }
 0x1ee   : > { %v1368_v32 = vsel %vm1288_vm1, %v10432_v7, -inf  ;;  %v1166_v15 = vmax.f32 %v8787_v6, 0.0 }
 0x1ef   : > { %v3499_v51 = vmax.f32 %v3497_v42, %v3498_v24  ;;  %v1369_v19 = vmax.f32 %v1364_v61, %v1368_v32  ;;  %v8796_v22 = vpop.f32.mrf.mxu1 }
 0x1f0   : > { %v1374_v5 = vsel %vm1288_vm1, %v1166_v15, -inf  ;;  %v10431_v62 = vmax.f32 %v8796_v22, 0.0 }
 0x1f1   : > { %v3500_v23 = vrot.slane %v3499_v51, 1  ;;  %v1375_v47 = vmax.f32 %v1367_v36, %v1374_v5  ;;  %v8803_v8 = vpop.f32.mrf.mxu1  ;;  %v1376_v42 = vmax.f32 %v1369_v19, %v1371_v27 }
 0x1f2   : > { %v1372_v45 = vsel %vm1288_vm1, %v10431_v62, -inf  ;;  %v10440_v32 = vmax.f32 %v8803_v8, 0.0 }
 0x1f3   : > { %v8805_v59 = vmax.f32 %v3499_v51, %v3500_v23  ;;  %v1373_v38 = vmax.f32 %v1366_v48, %v1372_v45  ;;  %v8810_v61 = vpop.f32.mrf.mxu1 }
 0x1f4   : > { %v2107_v30 = vsel %vm1288_vm1, %v10440_v32, -inf }
 0x1f5   : > { %v8815_v24 = vsub.f32 %v827_v2, %v8805_v59  ;;  %v8818_v31 = vsub.f32 %v829_v11, %v8805_v59  ;;  %v8823_v6 = vsub.f32 %v831_v33, %v8805_v59  ;;  %v8826_v51 = vsub.f32 %v833_v16, %v8805_v59  ;;  %v8828_v36 = vpop.f32.mrf.mxu1 }
 0x1f6   : > { %v1377_v27 = vmax.f32 %v1373_v38, %v1375_v47  ;;  %v10441_v33 = vmax.f32 %v8810_v61, 0.0  ;;  %v10439_v11 = vmax.f32 %v8828_v36, 0.0 }
 0x1f7   : > { %v8831_v9 = vpop.f32.mrf.mxu1  ;;  %v3512_v34 = vmul.f32 1.442695, %v8815_v24 }
 0x1f8   : > { %v1378_v19 = vmax.f32 %v1376_v42, %v1377_v27  ;;  %v10447_v47 = vmax.f32 %v8831_v9, 0.0  ;;  %v2106_v7 = vsel %vm1288_vm1, %v10441_v33, -inf }
 0x1f9   : > { %v8833_v23 = vpop.f32.mrf.mxu1 }
 0x1fa   : > { %v1379_v2 = vrot.slane %v1378_v19, 4  ;;  %v10438_v16 = vmax.f32 %v8833_v23, 0.0 }
 0x1fb   : > { %v8841_v5 = vpop.f32.mrf.mxu1 }
 0x1fc   : > { %v1380_v48 = vmax.f32 %v1378_v19, %v1379_v2  ;;  %v2112_v45 = vsel %vm1288_vm1, %v10438_v16, -inf  ;;  %v10442_v42 = vmax.f32 %v8841_v5, 0.0  ;;  %v2109_v19 = vsel %vm1288_vm1, %v10439_v11, -inf }
 0x1fd   : > { %v2113_v27 = vmax.f32 %v2107_v30, %v2112_v45  ;;  %v8848_v62 = vpop.f32.mrf.mxu1  ;;  %v2108_v30 = vsel %vm1288_vm1, %v10447_v47, -inf }
 0x1fe   : > { %v1381_v38 = vrot.slane %v1380_v48, 2  ;;  %v2110_v2 = vsel %vm1288_vm1, %v10442_v42, -inf  ;;  %v10444_v28 = vmax.f32 %v8848_v62, 0.0 }
 0x1ff   : > { %v8860_v18 = vpop.f32.mrf.mxu1  ;;  %v2111_v11 = vmax.f32 %v2106_v7, %v2110_v2 }
 0x200   : > { %v1382_v44 = vmax.f32 %v1380_v48, %v1381_v38  ;;  %v2116_v45 = vsel %vm1288_vm1, %v10444_v28, -inf  ;;  %v10446_v41 = vmax.f32 %v8860_v18, 0.0 }
 0x201   : > { %v2117_v32 = vmax.f32 %v2109_v19, %v2116_v45  ;;  %v8869_v33 = vpop.f32.mrf.mxu1  ;;  %v2118_v19 = vmax.f32 %v2111_v11, %v2113_v27 }
 0x202   : > { %v1383_v16 = vrot.slane %v1382_v44, 1  ;;  %v2114_v48 = vsel %vm1288_vm1, %v10446_v41, -inf  ;;  %v10445_v21 = vmax.f32 %v8869_v33, 0.0 }
 0x203   : > { %v2115_v42 = vmax.f32 %v2108_v30, %v2114_v48  ;;  %v8876_v10 = vpop.f32.mrf.mxu1 }
 0x204   : > { %v8874_v38 = vmax.f32 %v1382_v44, %v1383_v16  ;;  %v2832_v17 = vsel %vm1288_vm1, %v10445_v21, -inf  ;;  %v3504_v21 = vsub.f32 %v828_v3, %v8805_v59 }
 0x205   : > { %v8888_v2 = vpop.f32.mrf.mxu1  ;;  %v2119_v30 = vmax.f32 %v2115_v42, %v2117_v32 }
 0x206   : > { %v8881_v28 = vsub.f32 %v1160_v39, %v8874_v38  ;;  %v8886_v7 = vsub.f32 %v1162_v54, %v8874_v38  ;;  %v8893_v44 = vsub.f32 %v1164_v56, %v8874_v38  ;;  %v8896_v16 = vsub.f32 %v1166_v15, %v8874_v38 }
 0x207   : > { %v8899_v39 = vpop.f32.mrf.mxu1  ;;  %v2120_v45 = vmax.f32 %v2118_v19, %v2119_v30  ;;  %v10450_v54 = vmax.f32 %v8888_v2, 0.0  ;;  %v10451_v56 = vmax.f32 %v8876_v10, 0.0  ;;  %v3514_v43 = vmul.f32 1.442695, %v3504_v21 }
 0x208   : > { %v10478_v26 = vmax.f32 %v8899_v39, 0.0  ;;  %v3516_v21 = vmul.f32 1.442695, %v8818_v31 }
 0x209   : > { %v8901_v57 = vpop.f32.mrf.mxu1  ;;  %v2121_v11 = vrot.slane %v2120_v45, 4  ;;  %v2834_v41 = vsel %vm1288_vm1, %v10450_v54, -inf  ;;  %v10479_v54 = vmax.f32 %v8674_v13, 0.0 }
 0x20a   : > { %v10449_v15 = vmax.f32 %v8901_v57, 0.0  ;;  %v2833_v3 = vsel %vm1288_vm1, %v10478_v26, -inf }
 0x20b   : > { %v8909_v27 = vpop.f32.mrf.mxu1  ;;  %v2122_v48 = vmax.f32 %v2120_v45, %v2121_v11  ;;  %v2831_v45 = vsel %vm1288_vm1, %v10451_v56, -inf  ;;  %v3502_v56 = vsub.f32 %v10479_v54, %v8805_v59 }
 0x20c   : > { %v10452_v42 = vmax.f32 %v8909_v27, 0.0  ;;  %v2837_v19 = vsel %vm1288_vm1, %v10449_v15, -inf }
 0x20d   : > { %v8916_v30 = vpop.f32.mrf.mxu1  ;;  %v2838_v47 = vmax.f32 %v2832_v17, %v2837_v19  ;;  %v2123_v32 = vrot.slane %v2122_v48, 2  ;;  %v3510_v49 = vmul.f32 1.442695, %v3502_v56  ;;  %v10481_v56 = vmax.f32 %v8810_v61, 0.0 }
 0x20e   : > { %v10453_v29 = vmax.f32 %v8916_v30, 0.0  ;;  %v2835_v11 = vsel %vm1288_vm1, %v10452_v42, -inf  ;;  %v10487_v61 = vmax.f32 %v8848_v62, 0.0 }
 0x20f   : > { %v8931_v15 = vpop.f32.mrf.mxu1  ;;  %v2124_v46 = vmax.f32 %v2122_v48, %v2123_v32  ;;  %v2836_v52 = vmax.f32 %v2831_v45, %v2835_v11  ;;  %7760 = vpow2.f32 %v3510_v49 }
 0x210   : > { %v2841_v17 = vsel %vm1288_vm1, %v10453_v29, -inf  ;;  %v10462_v19 = vmax.f32 %v8931_v15, 0.0  ;;  %v10480_v29 = vmax.f32 %v8719_v4, 0.0  ;;  %7762 = vpow2.f32 %v3512_v34 }
 0x211   : > { %v2842_v42 = vmax.f32 %v2834_v41, %v2841_v17  ;;  %v8944_v40 = vpop.f32.mrf.mxu1  ;;  %v2125_v50 = vrot.slane %v2124_v46, 1  ;;  %7764 = vpow2.f32 %v3514_v43  ;;  %v2843_v32 = vmax.f32 %v2836_v52, %v2838_v47 }
 0x212   : > { %v2839_v26 = vsel %vm1288_vm1, %v10462_v19, -inf  ;;  %v3506_v14 = vsub.f32 %v10480_v29, %v8805_v59  ;;  %v10482_v4 = vmax.f32 %v8803_v8, 0.0  ;;  %v10485_v43 = vmax.f32 %v8841_v5, 0.0 }
 0x213   : > { %v2840_v13 = vmax.f32 %v2833_v3, %v2839_v26  ;;  %v8952_v54 = vpop.f32.mrf.mxu1  ;;  %v2126_v41 = vmax.f32 %v2124_v46, %v2125_v50  ;;  %v10483_v3 = vmax.f32 %v8831_v9, 0.0  ;;  %v10484_v50 = vmax.f32 %v8828_v36, 0.0 }
 0x214   : > { %v3518_v45 = vmul.f32 1.442695, %v3506_v14  ;;  %v10486_v52 = vmax.f32 %v8833_v23, 0.0  ;;  %7766 = vpow2.f32 %v3516_v21  ;;  %v10488_v26 = vmax.f32 %v8732_v20, 0.0 }
 0x215   : > { %v8954_v24 = vpop.f32.mrf.mxu1  ;;  %v2844_v48 = vmax.f32 %v2840_v13, %v2842_v42  ;;  %v2127_v11 = vsub.f32 %v10481_v56, %v2126_v41  ;;  %v2128_v29 = vsub.f32 %v10482_v4, %v2126_v41  ;;  %v2129_v17 = vsub.f32 %v10483_v3, %v2126_v41 }
 0x216   : > { %v2130_v46 = vsub.f32 %v10484_v50, %v2126_v41  ;;  %v2131_v34 = vsub.f32 %v10485_v43, %v2126_v41  ;;  %v2132_v14 = vsub.f32 %v10486_v52, %v2126_v41  ;;  %v2134_v31 = vsub.f32 %v10487_v61, %v2126_v41 }
 0x217   : > { %v8963_v49 = vpop.f32.mrf.mxu1  ;;  %v2135_v8 = vmul.f32 1.442695, %v2127_v11  ;;  %v2137_v9 = vmul.f32 1.442695, %v2128_v29  ;;  %v2845_v42 = vmax.f32 %v2843_v32, %v2844_v48  ;;  %v3508_v36 = vsub.f32 %v10488_v26, %v8805_v59 }
 0x218   : > { %7768 = vpow2.f32 %v3518_v45  ;;  %v2139_v13 = vmul.f32 1.442695, %v2129_v17  ;;  %v2141_v5 = vmul.f32 1.442695, %v2130_v46  ;;  %v2143_v23 = vmul.f32 1.442695, %v2131_v34 }
 0x219   : > { %v8973_v47 = vpop.f32.mrf.mxu1  ;;  %7770 = vpow2.f32 %v2135_v8  ;;  %v10460_v62 = vmax.f32 %v8944_v40, 0.0  ;;  %v3520_v4 = vmul.f32 1.442695, %v8823_v6  ;;  %v2846_v32 = vrot.slane %v2845_v42, 4 }
 0x21a   : > { %7772 = vpow2.f32 %v2137_v9  ;;  %v10457_v48 = vmax.f32 %v8954_v24, 0.0  ;;  %v3522_v20 = vmul.f32 1.442695, %v3508_v36  ;;  %v10489_v59 = vmax.f32 %v8860_v18, 0.0 }
 0x21b   : > { %v8978_v56 = vpop.f32.mrf.mxu1  ;;  %7774 = vpow2.f32 %v2139_v13  ;;  %v2145_v11 = vmul.f32 1.442695, %v2132_v14  ;;  %v2847_v29 = vmax.f32 %v2845_v42, %v2846_v32  ;;  %v3557_v3 = vsel %vm1288_vm1, %v10460_v62, -inf }
 0x21c   : > { %v2133_v45 = vsub.f32 %v10489_v59, %v2126_v41  ;;  %7776 = vpow2.f32 %v2141_v5  ;;  %v10455_v6 = vmax.f32 %v8973_v47, 0.0  ;;  %v8991_v17 = vpop.eup %7760  ;;  %v3524_v50 = vmul.f32 1.442695, %v8826_v51 }
 0x21d   : > { %v8982_v21 = vpop.f32.mrf.mxu1  ;;  %7778 = vpow2.f32 %v2143_v23  ;;  %v10461_v46 = vmax.f32 %v8952_v54, 0.0  ;;  %v8998_v43 = vpop.eup %7762  ;;  %v2848_v34 = vrot.slane %v2847_v29, 2  ;;  %v3559_v52 = vsel %vm1288_vm1, %v10457_v48, -inf }
 0x21e   : > { %7780 = vpow2.f32 %v3520_v4  ;;  %v10454_v18 = vmax.f32 %v8982_v21, 0.0  ;;  %v3562_v14 = vsel %vm1288_vm1, %v10455_v6, -inf  ;;  %v10456_v61 = vmax.f32 %v8978_v56, 0.0  ;;  %v9007_v51 = vpop.eup %7764 }
 0x21f   : > { %v8996_v41 = vpop.f32.mrf.mxu1  ;;  %7782 = vpow2.f32 %v2145_v11  ;;  %v2147_v8 = vmul.f32 1.442695, %v2133_v45  ;;  %v10458_v9 = vmax.f32 %v8963_v49, 0.0  ;;  %v3563_v42 = vmax.f32 %v3557_v3, %v3562_v14 }
 0x220   : > { %v2849_v26 = vmax.f32 %v2847_v29, %v2848_v34  ;;  %v3566_v36 = vsel %vm1288_vm1, %v10454_v18, -inf  ;;  %v10459_v13 = vmax.f32 %v8996_v41, 0.0  ;;  %v3526_v5 = vsel %vm1288_vm1, %v8991_v17, 0.0 }
 0x221   : > { %7784 = vpow2.f32 %v3522_v20  ;;  %v3556_v23 = vsel %vm1288_vm1, %v10461_v46, -inf  ;;  %v3567_v4 = vmax.f32 %v3559_v52, %v3566_v36  ;;  %v3527_v32 = vsel %vm1288_vm1, %v8998_v43, 0.0  ;;  %v9026_v3 = vpop.eup %7766 }
 0x222   : > { %v2850_v59 = vrot.slane %v2849_v26, 1  ;;  %v3560_v45 = vsel %vm1288_vm1, %v10456_v61, -inf  ;;  %v3528_v11 = vadd.f32 %v3527_v32, %v3526_v5  ;;  %v3529_v29 = vsel %vm1288_vm1, %v9007_v51, 0.0 }
 0x223   : > { %7786 = vpow2.f32 %v3524_v50  ;;  %v2149_v20 = vmul.f32 1.442695, %v2134_v31  ;;  %v3558_v34 = vsel %vm1288_vm1, %v10458_v9, -inf  ;;  %v3564_v36 = vsel %vm1288_vm1, %v10459_v13, -inf }
 0x224   : > { %7788 = vpow2.f32 %v2147_v8  ;;  %v2851_v14 = vmax.f32 %v2849_v26, %v2850_v59  ;;  %v3530_v5 = vadd.f32 %v3529_v29, %v3528_v11  ;;  %v3561_v18 = vmax.f32 %v3556_v23, %v3560_v45 }
 0x225   : > { %v9031_v52 = vpop.eup %7768  ;;  %v10490_v50 = vmax.f32 %v8876_v10, 0.0  ;;  %v10491_v48 = vmax.f32 %v8869_v33, 0.0  ;;  %v10492_v26 = vmax.f32 %v8899_v39, 0.0  ;;  %7790 = vpow2.f32 %v2149_v20 }
 0x226   : > { %v9036_v32 = vpop.eup %7770  ;;  %v10494_v45 = vmax.f32 %v8888_v2, 0.0  ;;  %v3565_v29 = vmax.f32 %v3558_v34, %v3564_v36  ;;  %v10498_v2 = vmax.f32 %v8916_v30, 0.0 }
 0x227   : > { %v9038_v6 = vpop.eup %7772  ;;  %v2151_v31 = vsel %vm1288_vm1, %v9036_v32, 0.0  ;;  %v2852_v61 = vsub.f32 %v10490_v50, %v2851_v14  ;;  %v2853_v8 = vsub.f32 %v10491_v48, %v2851_v14  ;;  %v2854_v59 = vsub.f32 %v10492_v26, %v2851_v14 }
 0x228   : > { %v9048_v9 = vpop.eup %7774  ;;  %v2152_v23 = vsel %vm1288_vm1, %v9038_v6, 0.0  ;;  %v2855_v11 = vsub.f32 %v10494_v45, %v2851_v14  ;;  %v10496_v48 = vmax.f32 %v8909_v27, 0.0  ;;  %v10497_v50 = vmax.f32 %v8901_v57, 0.0 }
 0x229   : > { %10493 = vst [vmem:[#allocation10_spill] sm:$0xff] %v9048_v9  ;;  %v9054_v13 = vpop.eup %7776  ;;  %v2153_v10 = vadd.f32 %v2152_v23, %v2151_v31  ;;  %v2154_v33 = vsel %vm1288_vm1, %v9048_v9, 0.0  ;;  %v2859_v34 = vsub.f32 %v10498_v2, %v2851_v14  ;;  %v2860_v36 = vmul.f32 1.442695, %v2852_v61 }
 0x22a   : > { %10495 = vst [vmem:[#allocation11_spill] sm:$0xff] %v9054_v13  ;;  %v2856_v39 = vsub.f32 %v10496_v48, %v2851_v14  ;;  %v2857_v26 = vsub.f32 %v10497_v50, %v2851_v14  ;;  %v9062_v20 = vpop.eup %7778  ;;  %v2156_v62 = vsel %vm1288_vm1, %v9054_v13, 0.0  ;;  %v3568_v45 = vmax.f32 %v3561_v18, %v3563_v42 }
 0x22b   : > { %v9068_v31 = vpop.eup %7780  ;;  %v2155_v23 = vadd.f32 %v2154_v33, %v2153_v10  ;;  %v2862_v46 = vmul.f32 1.442695, %v2853_v8  ;;  %v2864_v19 = vmul.f32 1.442695, %v2854_v59  ;;  %v3531_v27 = vsel %vm1288_vm1, %v9026_v3, 0.0 }
 0x22c   : > { %v10499_v57 = vmax.f32 %v8931_v15, 0.0  ;;  %7792 = vpow2.f32 %v2860_v36  ;;  %v2866_v50 = vmul.f32 1.442695, %v2855_v11  ;;  %v3569_v9 = vmax.f32 %v3565_v29, %v3567_v4  ;;  %v9074_v13 = vpop.eup %7782 }
 0x22d   : > { %v2157_v30 = vadd.f32 %v2156_v62, %v2155_v23  ;;  %v2158_v18 = vsel %vm1288_vm1, %v9062_v20, 0.0  ;;  %7794 = vpow2.f32 %v2862_v46  ;;  %v2868_v61 = vmul.f32 1.442695, %v2856_v39 }
 0x22e   : > { %v2858_v48 = vsub.f32 %v10499_v57, %v2851_v14  ;;  %7796 = vpow2.f32 %v2864_v19  ;;  %v2870_v42 = vmul.f32 1.442695, %v2857_v26  ;;  %v9078_v8 = vpop.eup %7784  ;;  %v3533_v15 = vsel %vm1288_vm1, %v9031_v52, 0.0 }
 0x22f   : > { %7798 = vpow2.f32 %v2866_v50  ;;  %v2159_v14 = vadd.f32 %v2158_v18, %v2157_v30  ;;  %v3570_v59 = vmax.f32 %v3568_v45, %v3569_v9  ;;  %v3532_v11 = vadd.f32 %v3531_v27, %v3530_v5 }
 0x230   : > { %v9082_v4 = vpop.eup %7786  ;;  %v2160_v62 = vsel %vm1288_vm1, %v9074_v13, 0.0  ;;  %7800 = vpow2.f32 %v2868_v61  ;;  %v2872_v29 = vmul.f32 1.442695, %v2858_v48  ;;  %v3535_v19 = vsel %vm1288_vm1, %v9068_v31, 0.0 }
 0x231   : > { %v9088_v46 = vpop.eup %7788  ;;  %7802 = vpow2.f32 %v2870_v42  ;;  %v3571_v10 = vrot.slane %v3570_v59, 4  ;;  %v3534_v33 = vadd.f32 %v3533_v15, %v3532_v11  ;;  %v3537_v39 = vsel %vm1288_vm1, %v9078_v8, 0.0 }
 0x232   : > { %v2161_v9 = vadd.f32 %v2160_v62, %v2159_v14  ;;  %v9092_v2 = vpop.eup %7790  ;;  %v2162_v36 = vsel %vm1288_vm1, %v9088_v46, 0.0  ;;  %7804 = vpow2.f32 %v2872_v29  ;;  %v2874_v45 = vmul.f32 1.442695, %v2859_v34 }
 0x233   : > { %v3572_v5 = vmax.f32 %v3570_v59, %v3571_v10  ;;  %v3536_v26 = vadd.f32 %v3535_v19, %v3534_v33  ;;  %v3539_v23 = vsel %vm1288_vm1, %v9082_v4, 0.0  ;;  %v2164_v61 = vsel %vm1288_vm1, %v9092_v2, 0.0 }
 0x234   : > { %v2163_v48 = vadd.f32 %v2162_v36, %v2161_v9  ;;  %7806 = vpow2.f32 %v2874_v45  ;;  %v10501_v36 = vmax.f32 %v8952_v54, 0.0 }
 0x235   : > { %v3573_v27 = vrot.slane %v3572_v5, 2  ;;  %v3538_v57 = vadd.f32 %v3537_v39, %v3536_v26 }
 0x236   : > { %v2165_v62 = vadd.f32 %v2164_v61, %v2163_v48 }
 0x237   : > { %v3574_v50 = vmax.f32 %v3572_v5, %v3573_v27  ;;  %v3540_v30 = vadd.f32 %v3539_v23, %v3538_v57  ;;  %v10502_v23 = vmax.f32 %v8944_v40, 0.0  ;;  %v10503_v57 = vmax.f32 %v8963_v49, 0.0 }
 0x238   : > { %v10505_v40 = vmax.f32 %v8978_v56, 0.0  ;;  %v10506_v49 = vmax.f32 %v8973_v47, 0.0 }
 0x239   : > { %v9098_v18 = vpop.eup %7792  ;;  %v3575_v34 = vrot.slane %v3574_v50, 1  ;;  %v3541_v39 = vrot.slane %v3540_v30, 4 }
 0x23a   : > { %v9102_v42 = vpop.eup %7794  ;;  %v2876_v15 = vsel %vm1288_vm1, %v9098_v18, 0.0 }
 0x23b   : > { %v9106_v14 = vpop.eup %7796  ;;  %v2877_v59 = vsel %vm1288_vm1, %v9102_v42, 0.0  ;;  %v3576_v10 = vmax.f32 %v3574_v50, %v3575_v34  ;;  %v3542_v56 = vadd.f32 %v3541_v39, %v3540_v30 }
 0x23c   : > { %v9110_v11 = vpop.eup %7798  ;;  %v2878_v29 = vadd.f32 %v2877_v59, %v2876_v15  ;;  %v2879_v19 = vsel %vm1288_vm1, %v9106_v14, 0.0  ;;  %v10504_v15 = vmax.f32 %v8954_v24, 0.0  ;;  %v2166_v59 = vrot.slane %v2165_v62, 4 }
 0x23d   : > { %v2881_v33 = vsel %vm1288_vm1, %v9110_v11, 0.0  ;;  %v9116_v9 = vpop.eup %7800  ;;  %v3577_v45 = vsub.f32 %v10501_v36, %v3576_v10  ;;  %v3578_v27 = vsub.f32 %v10502_v23, %v3576_v10  ;;  %v3579_v48 = vsub.f32 %v10503_v57, %v3576_v10  ;;  %v8138_v57 = vld [vmem:[%s8259_s27 + $0x78] sm:$0xff] }
 0x23e   : > { %10500 = vst [vmem:[#allocation12_spill] sm:$0xff] %v9116_v9  ;;  %v2880_v26 = vadd.f32 %v2879_v19, %v2878_v29  ;;  %v9124_v61 = vpop.eup %7802  ;;  %v2883_v50 = vsel %vm1288_vm1, %v9116_v9, 0.0  ;;  %v3580_v34 = vsub.f32 %v10504_v15, %v3576_v10  ;;  %v3581_v19 = vsub.f32 %v10505_v40, %v3576_v10 }
 0x23f   : > { %v3582_v36 = vsub.f32 %v10506_v49, %v3576_v10  ;;  %v10507_v23 = vmov 0.0   ;;  %v2885_v9 = vsel %vm1288_vm1, %v9124_v61, 0.0  ;;  %v10508_v24 = vmax.f32 %v8982_v21, 0.0  ;;  %v9145_v47 = vpop.eup %7804  ;;  %v8139_v21 = vld [vmem:[%s8259_s27 + $0x70] sm:$0xff] }
 0x240   : > { %v2882_v29 = vadd.f32 %v2881_v33, %v2880_v26  ;;  %v10509_v26 = vmax.f32 %v8996_v41, 0.0  ;;  %v3587_v49 = vmul.f32 1.442695, %v3578_v27  ;;  %v2167_v30 = vadd.f32 %v2166_v59, %v2165_v62 }
 0x241   : > { %v3584_v15 = vsub.f32 %v10508_v24, %v3576_v10  ;;  %v3593_v24 = vmul.f32 1.442695, %v3581_v19  ;;  %v2887_v41 = vsel %vm1288_vm1, %v9145_v47, 0.0  ;;  %v3543_v27 = vrot.slane %v3542_v56, 2  ;;  %v8142_v19 = vld [vmem:[%s8259_s27 + $0x58] sm:$0xff] }
 0x242   : > { %v2884_v33 = vadd.f32 %v2883_v50, %v2882_v29  ;;  %v3583_v40 = vsub.f32 %v10509_v26, %v3576_v10  ;;  %v3595_v10 = vmul.f32 1.442695, %v3582_v36 }
 0x243   : > { %v3544_v62 = vadd.f32 %v3543_v27, %v3542_v56  ;;  %v3599_v29 = vmul.f32 1.442695, %v3584_v15  ;;  %v8144_v15 = vld [vmem:[%s8259_s27 + $0x48] sm:$0xff] }
 0x244   : > { %v2886_v39 = vadd.f32 %v2885_v9, %v2884_v33  ;;  %v3597_v50 = vmul.f32 1.442695, %v3583_v40  ;;  %v2168_v9 = vrot.slane %v2167_v30, 2  ;;  %v8143_v33 = vld [vmem:[%s8259_s27 + $0x50] sm:$0xff] }
 0x246   : > { %v2888_v59 = vadd.f32 %v2887_v41, %v2886_v39  ;;  %v2169_v26 = vadd.f32 %v2168_v9, %v2167_v30 }
 0x273   : > { %v1540_v5 = vpop.f32.mrf.mxu0 }
 0x274   : > { %7100 = vmatpush3.xpose.msk.msra.mxu1 %vm480_vm0, %v1540_v5  ;;  %7113 = vmatmul.mubr.msk.f32.vlgmr.msra.gmra.mxu0 %vm480_vm0, %v1540_v5 }
 0x275   : > { %v7098_v54 = vpop.f32.mrf.mxu0  ;;  %7115 = vmatprep.subr.mxu1 %v10507_v23  ;;  %7135 = vmatpush3.msra.mxu0 %v8138_v57  ;;  %v3589_v57 = vmul.f32 1.442695, %v3579_v48  ;;  %v9158_v48 = vpop.eup %7806 }
 0x276   : > { %v3585_v54 = vmul.f32 1.442695, %v3577_v45  ;;  %7136 = vmatprep.subr.mxu0 %v10507_v23  ;;  %7150 = vmatprep.mubr.msk.f32.mxu0 %vm8175_vm2, %v10507_v23  ;;  %v3591_v45 = vmul.f32 1.442695, %v3580_v34  ;;  %v8141_v34 = vld [vmem:[%s8259_s27 + $0x60] sm:$0xff]  ;;  %v2889_v36 = vsel %vm1288_vm1, %v9158_v48, 0.0 }
 0x277   : > { %7102 = vmatmul.mubr.msk.f32.vlgmr.msra.gmra.mxu1 %vm480_vm0, %v1540_v5  ;;  %7137 = vmatpush3.msra.mxu0 %v8139_v21  ;;  %v8140_v5 = vld [vmem:[%s8259_s27 + $0x68] sm:$0xff]  ;;  %v2890_v40 = vadd.f32 %v2889_v36, %v2888_v59 }
 0x278   : > { %7117 = vmatprep.mubr.msk.f32.mxu1 %vm8175_vm2, %v10507_v23  ;;  %7138 = vmatprep.subr.mxu0 %v10507_v23  ;;  %7808 = vpow2.f32 %v3585_v54  ;;  %v3545_v54 = vrot.slane %v3544_v62, 1 }
 0x279   : > { %7139 = vmatpush3.msra.mxu0 %v8140_v5  ;;  %7810 = vpow2.f32 %v3587_v49  ;;  %v8145_v49 = vld [vmem:[%s8259_s27 + $0x40] sm:$0xff]  ;;  %v2891_v21 = vrot.slane %v2890_v40, 4 }
 0x27a   : > { %7140 = vmatprep.subr.mxu0 %v10507_v23  ;;  %7812 = vpow2.f32 %v3589_v57  ;;  %v3546_v56 = vadd.f32 %v3545_v54, %v3544_v62  ;;  %v2170_v57 = vrot.slane %v2169_v26, 1 }
 0x27b   : > { %7141 = vmatpush3.msra.mxu0 %v8141_v34  ;;  %7814 = vpow2.f32 %v3591_v45  ;;  %v2892_v27 = vadd.f32 %v2891_v21, %v2890_v40 }
 0x27c   : > { %7142 = vmatprep.subr.mxu0 %v10507_v23  ;;  %7816 = vpow2.f32 %v3593_v24 }
 0x27d   : > { %7143 = vmatpush3.msra.mxu0 %v8142_v19  ;;  %7818 = vpow2.f32 %v3595_v10  ;;  %v2171_v10 = vadd.f32 %v2170_v57, %v2169_v26  ;;  %v2893_v54 = vrot.slane %v2892_v27, 2 }
 0x27e   : > { %7144 = vmatprep.subr.mxu0 %v10507_v23  ;;  %7820 = vpow2.f32 %v3597_v50 }
 0x27f   : > { %7145 = vmatpush3.msra.mxu0 %v8143_v33  ;;  %7822 = vpow2.f32 %v3599_v29 }
 0x280   : > { %7146 = vmatprep.subr.mxu0 %v10507_v23  ;;  %7824 = vrcp.f32 %v3546_v56 }
 0x281   : > { %7147 = vmatpush3.msra.mxu0 %v8144_v15  ;;  %7826 = vrcp.f32 %v2171_v10  ;;  %v2894_v10 = vadd.f32 %v2893_v54, %v2892_v27 }
 0x282   : > { %7148 = vmatprep.subr.mxu0 %v10507_v23 }
 0x283   : > { %7149 = vmatpush3.msra.mxu0 %v8145_v49 }
 0x284   : > { %7158 = vmatprep.subr.mxu0 %v10507_v23 }
 0x285   : > { %v7809_v45 = vpop.eup %7808 }
 0x286   : > { %v7811_v39 = vpop.eup %7810  ;;  %v3601_v24 = vsel %vm1288_vm1, %v7809_v45, 0.0 }
 0x287   : > { %v7813_v5 = vpop.eup %7812  ;;  %v3602_v30 = vsel %vm1288_vm1, %v7811_v39, 0.0 }
 0x288   : > { %v7815_v41 = vpop.eup %7814  ;;  %v3603_v50 = vadd.f32 %v3602_v30, %v3601_v24  ;;  %v3604_v34 = vsel %vm1288_vm1, %v7813_v5, 0.0 }
 0x289   : > { %v7817_v62 = vpop.eup %7816  ;;  %v3606_v9 = vsel %vm1288_vm1, %v7815_v41, 0.0 }
 0x28a   : > { %v7819_v59 = vpop.eup %7818  ;;  %v3605_v29 = vadd.f32 %v3604_v34, %v3603_v50  ;;  %v3608_v36 = vsel %vm1288_vm1, %v7817_v62, 0.0 }
 0x28b   : > { %v7821_v19 = vpop.eup %7820  ;;  %v3610_v15 = vsel %vm1288_vm1, %v7819_v59, 0.0 }
 0x28c   : > { %v3607_v33 = vadd.f32 %v3606_v9, %v3605_v29  ;;  %v7823_v56 = vpop.eup %7822  ;;  %v3612_v40 = vsel %vm1288_vm1, %v7821_v19, 0.0 }
 0x28d   : > { %v7825_v49 = vpop.eup %7824  ;;  %v3614_v9 = vsel %vm1288_vm1, %v7823_v56, 0.0 }
 0x28e   : > { %v3609_v26 = vadd.f32 %v3608_v36, %v3607_v33  ;;  %v9180_v57 = vmul.f32 %v7825_v49, %v8991_v17  ;;  %v9183_v21 = vmul.f32 %v7825_v49, %v8998_v43  ;;  %v9186_v24 = vmul.f32 %v7825_v49, %v9007_v51 }
 0x28f   : > { %v9189_v30 = vmul.f32 %v7825_v49, %v9026_v3  ;;  %v9192_v34 = vmul.f32 %v7825_v49, %v9031_v52  ;;  %v9196_v29 = vmul.f32 %v7825_v49, %v9068_v31  ;;  %v9199_v17 = vmul.f32 %v7825_v49, %v9078_v8 }
 0x290   : > { %v3611_v50 = vadd.f32 %v3610_v15, %v3609_v26  ;;  %v9202_v43 = vmul.f32 %v7825_v49, %v9082_v4  ;;  %v2895_v36 = vrot.slane %v2894_v10, 1  ;;  %v9204_v15 = vpop.eup %7826 }
 0x291   : > { %v9208_v31 = vmul.f32 %v9204_v15, %v9036_v32  ;;  %v9212_v8 = vmul.f32 %v9204_v15, %v9038_v6 }
 0x292   : > { %v3613_v51 = vadd.f32 %v3612_v40, %v3611_v50  ;;  %v2896_v27 = vadd.f32 %v2895_v36, %v2894_v10 }
 0x294   : > { %v3615_v3 = vadd.f32 %v3614_v9, %v3613_v51  ;;  %7828 = vrcp.f32 %v2896_v27 }
 0x296   : > { %v3616_v33 = vrot.slane %v3615_v3, 4 }
 0x298   : > { %v3617_v54 = vadd.f32 %v3616_v33, %v3615_v3 }
 0x29a   : > { %v3618_v52 = vrot.slane %v3617_v54, 2 }
 0x29c   : > { %v3619_v4 = vadd.f32 %v3618_v52, %v3617_v54 }
 0x29e   : > { %v3620_v49 = vrot.slane %v3619_v4, 1 }
 0x2a0   : > { %v3621_v26 = vadd.f32 %v3620_v49, %v3619_v4 }
 0x2a1   : > { %v9214_v40 = vpop.eup %7828 }
 0x2a2   : > { %7830 = vrcp.f32 %v3621_v26  ;;  %v9218_v10 = vmul.f32 %v9214_v40, %v9098_v18  ;;  %v9222_v50 = vmul.f32 %v9214_v40, %v9102_v42  ;;  %v9226_v32 = vmul.f32 %v9214_v40, %v9106_v14 }
 0x2a3   : > { %v9230_v6 = vmul.f32 %v9214_v40, %v9110_v11  ;;  %v9234_v9 = vmul.f32 %v9214_v40, %v9124_v61 }
 0x2af   : > { %v7831_v51 = vpop.eup %7830 }
 0x2b0   : > { %v9236_v36 = vmul.f32 %v7831_v51, %v7809_v45  ;;  %v9238_v18 = vmul.f32 %v7831_v51, %v7811_v39  ;;  %v9240_v3 = vmul.f32 %v7831_v51, %v7813_v5  ;;  %v9242_v42 = vmul.f32 %v7831_v51, %v7815_v41 }
 0x2b1   : > { %v9244_v33 = vmul.f32 %v7831_v51, %v7817_v62  ;;  %v9246_v14 = vmul.f32 %v7831_v51, %v7819_v59  ;;  %v9248_v27 = vmul.f32 %v7831_v51, %v7821_v19  ;;  %v9250_v11 = vmul.f32 %v7831_v51, %v7823_v56 }
 0x334   : > { %v1698_v54 = vpop.f32.mrf.mxu0 }
 0x335   : > { %v1702_v5 = vsel %vm480_vm0, %v1698_v54, 0.0 }
 0x336   : > { %v7114_v61 = vpop.f32.mrf.mxu0 }
 0x337   : > { %v1613_v52 = vpop.f32.mrf.mxu1 }
 0x338   : > { %v1617_v45 = vsel %vm1288_vm1, %v1613_v52, -inf }
 0x339   : > { %1618 = vmax.xlane.f32.xlu1 %v1617_v45  ;;  %v7103_v39 = vpop.f32.mrf.mxu1 }
 0x33a   : > { %v10511_v39 = vmax.f32 %v8768_v12, 0.0 }
 0x33d   : > { %1703 = vadd.xlane.f32.xlu1 %v1702_v5  ;;  %v1387_v5 = vsub.f32 %v10511_v39, %v8874_v38 }
 0x3c2   : > { %v1619_v41 = vpop.xlane.xlu1 %1618 }
 0x3c3   : > { %v1620_v4 = vsub.f32 %v1613_v52, %v1619_v41  ;;  %v1395_v41 = vmul.f32 1.442695, %v8881_v28 }
 0x3c5   : > { %v1621_v62 = vmul.f32 1.442695, %v1620_v4 }
 0x3c6   : > { %v1704_v49 = vpop.xlane.xlu1 %1703 }
 0x3c7   : > { %7832 = vpow2.f32 %v1621_v62  ;;  %v1706_v59 = vmul.f32 0.03125, %v1704_v49  ;;  %v1407_v49 = vmul.f32 1.442695, %v8896_v16 }
 0x3c9   : > { %v9254_v19 = vsub.f32 %v1698_v54, %v1706_v59  ;;  %v10510_v54 = vmax.f32 %v8762_v55, 0.0 }
 0x3cb   : > { %v1708_v56 = vmul.f32 %v9254_v19, %v9254_v19  ;;  %v1385_v52 = vsub.f32 %v10510_v54, %v8874_v38 }
 0x3cd   : > { %v1709_v26 = vsel %vm480_vm0, %v1708_v56, 0.0  ;;  %v1393_v45 = vmul.f32 1.442695, %v1385_v52 }
 0x3ce   : > { %1710 = vadd.xlane.f32.xlu1 %v1709_v26 }
 0x3cf   : > { %7834 = vpow2.f32 %v1393_v45 }
 0x3d0   : > { %7836 = vpow2.f32 %v1395_v41 }
 0x3d4   : > { %v9259_v51 = vpop.eup %7832 }
 0x3d5   : > { %v1623_v61 = vsel %vm1288_vm1, %v9259_v51, 0.0 }
 0x3d6   : > { %1624 = vadd.xlane.f32.xlu1 %v1623_v61 }
 0x3dc   : > { %v7835_v12 = vpop.eup %7834 }
 0x3dd   : > { %v9286_v4 = vpop.eup %7836 }
 0x409   : > { %2181 = vxpose.xlu1.b32.start [1/8] (short) (narrow) %v8688_v35, 8  ;;  %v1397_v35 = vmul.f32 1.442695, %v1387_v5 }
 0x40b   : > { %7838 = vpow2.f32 %v1397_v35 }
 0x40d   : > { %2182 = vxpose.xlu1.b32.cont [2/8] (short) (narrow) %v8691_v37, 8  ;;  %v10512_v37 = vmax.f32 %v8780_v1, 0.0 }
 0x411   : > { %2183 = vxpose.xlu1.b32.cont [3/8] (short) (narrow) %v8694_v53, 8  ;;  %v1389_v53 = vsub.f32 %v10512_v37, %v8874_v38 }
 0x413   : > { %v1401_v55 = vmul.f32 1.442695, %v1389_v53 }
 0x415   : > { %2184 = vxpose.xlu1.b32.cont [4/8] (short) (narrow) %v8697_v58, 8  ;;  %v1399_v58 = vmul.f32 1.442695, %v8886_v7  ;;  %v1409_v7 = vsel %vm1288_vm1, %v7835_v12, 0.0 }
 0x417   : > { %7840 = vpow2.f32 %v1399_v58 }
 0x418   : > { %7842 = vpow2.f32 %v1401_v55  ;;  %v9291_v62 = vpop.eup %7838 }
 0x419   : > { %2185 = vxpose.xlu1.b32.cont [5/8] (short) (narrow) %v8700_v60, 8  ;;  %v10513_v60 = vmax.f32 %v8796_v22, 0.0  ;;  %v1412_v22 = vsel %vm1288_vm1, %v9291_v62, 0.0 }
 0x41b   : > { %v1391_v28 = vsub.f32 %v10513_v60, %v8874_v38 }
 0x41d   : > { %2186 = vxpose.xlu1.b32.cont [6/8] (short) (narrow) %v8703_v63, 8  ;;  %v1403_v63 = vmul.f32 1.442695, %v8893_v44  ;;  %v1405_v1 = vmul.f32 1.442695, %v1391_v28 }
 0x41f   : > { %7844 = vpow2.f32 %v1403_v63 }
 0x420   : > { %7846 = vpow2.f32 %v1405_v1 }
 0x421   : > { %2187 = vxpose.xlu1.b32.cont [7/8] (short) (narrow) %v8709_v0, 8  ;;  %v1410_v0 = vsel %vm1288_vm1, %v9286_v4, 0.0  ;;  %7848 = vpow2.f32 %v1407_v49 }
 0x424   : > { %v9296_v38 = vpop.eup %7840 }
 0x425   : > { %2188 = vxpose.xlu1.b32.end [8/8] (short) (narrow) %v8711_v25, 8  ;;  %v1411_v25 = vadd.f32 %v1410_v0, %v1409_v7  ;;  %v1414_v59 = vsel %vm1288_vm1, %v9296_v38, 0.0  ;;  %v9300_v56 = vpop.eup %7842 }
 0x426   : > { %v1416_v61 = vsel %vm1288_vm1, %v9300_v56, 0.0 }
 0x427   : > { %v1413_v44 = vadd.f32 %v1412_v22, %v1411_v25 }
 0x429   : > { %v1415_v26 = vadd.f32 %v1414_v59, %v1413_v44  ;;  %v9319_v44 = vld [vmem:[%s10426_s6] ss:$0 sm:$0xff] }
 0x42b   : > { %v1417_v52 = vadd.f32 %v1416_v61, %v1415_v26  ;;  %v9325_v26 = vld [vmem:[%s10427_s7] ss:$0 sm:$0xff] }
 0x42c   : > { %v9304_v54 = vpop.eup %7844 }
 0x42d   : > { %v1418_v16 = vsel %vm1288_vm1, %v9304_v54, 0.0  ;;  %v9308_v45 = vpop.eup %7846 }
 0x42e   : > { %v1419_v39 = vadd.f32 %v1418_v16, %v1417_v52  ;;  %v1420_v5 = vsel %vm1288_vm1, %v9308_v45, 0.0  ;;  %v9312_v41 = vpop.eup %7848 }
 0x42f   : > { %v1422_v37 = vsel %vm1288_vm1, %v9312_v41, 0.0 }
 0x430   : > { %v1421_v35 = vadd.f32 %v1420_v5, %v1419_v39 }
 0x432   : > { %v1423_v53 = vadd.f32 %v1422_v37, %v1421_v35 }
 0x434   : > { %v1424_v58 = vrot.slane %v1423_v53, 4 }
 0x436   : > { %v1425_v55 = vadd.f32 %v1424_v58, %v1423_v53  ;;  %v9336_v53 = vld [vmem:[%s10425_s5 + $0x18] sm:$0xff]  ;;  %v9359_v58 = vld [vmem:[%s10425_s5] sm:$0xff] }
 0x438   : > { %v1426_v60 = vrot.slane %v1425_v55, 2 }
 0x43a   : > { %v1427_v28 = vadd.f32 %v1426_v60, %v1425_v55 }
 0x43c   : > { %v1428_v7 = vrot.slane %v1427_v28, 1 }
 0x43e   : > { %v1429_v25 = vadd.f32 %v1428_v7, %v1427_v28 }
 0x457   : > { %v1711_v63 = vpop.xlane.xlu1 %1710 }
 0x458   : > { %v1712_v1 = vmul.f32 0.03125, %v1711_v63 }
 0x45a   : > { %v1713_v0 = vadd.f32 1e-05, %v1712_v1 }
 0x45c   : > { %7850 = vrsqrt.f32 %v1713_v0 }
 0x45f   : > { %v1625_v49 = vpop.xlane.xlu1 %1624 }
 0x460   : > { %7852 = vrcp.f32 %v1625_v49  ;;  %v8151_v49 = vld [vmem:[%s8259_s27 + $0xb0] sm:$0xff] }
 0x461   : > { %7854 = vrcp.f32 %v1429_v25 }
 0x469   : > { %v7851_v22 = vpop.eup %7850 }
 0x46a   : > { %v1715_v59 = vmul.f32 %v7851_v22, %v9254_v19  ;;  %v8152_v22 = vld [vmem:[%s8259_s27 + $0xa8] sm:$0xff] }
 0x46c   : > { %v1722_v61 = vmul.f32 %v9319_v44, %v1715_v59  ;;  %v8153_v59 = vld [vmem:[%s8259_s27 + $0xa0] sm:$0xff] }
 0x46d   : > { %v7853_v52 = vpop.eup %7852 }
 0x46e   : > { %v1729_v16 = vadd.f32 %v9325_v26, %v1722_v61  ;;  %v7855_v39 = vpop.eup %7854  ;;  %v1627_v35 = vmul.f32 %v7853_v52, %v9259_v51  ;;  %v9345_v51 = vld [vmem:[%s10425_s5 + $0x10] sm:$0xff]  ;;  %v8157_v52 = vld [vmem:[%s8259_s27 + $0x80] sm:$0xff] }
 0x46f   : > { %v1431_v37 = vmul.f32 %v7855_v39, %v7835_v12  ;;  %v9352_v12 = vld [vmem:[%s10425_s5 + $0x8] sm:$0xff]  ;;  %v1432_v63 = vmul.f32 %v7855_v39, %v9286_v4  ;;  %v1433_v1 = vmul.f32 %v7855_v39, %v9291_v62  ;;  %v1434_v7 = vmul.f32 %v7855_v39, %v9296_v38  ;;  %v8150_v62 = vld [vmem:[%s8259_s27 + $0xb8] sm:$0xff]  ;;  %v8155_v61 = vld [vmem:[%s8259_s27 + $0x90] sm:$0xff] }
 0x470   : > { %v1730_v5 = vmax.f32 %v1729_v16, 0.0  ;;  %v1435_v25 = vmul.f32 %v7855_v39, %v9300_v56  ;;  %v1436_v38 = vmul.f32 %v7855_v39, %v9304_v54  ;;  %v1437_v56 = vmul.f32 %v7855_v39, %v9308_v45  ;;  %v8154_v45 = vld [vmem:[%s8259_s27 + $0x98] sm:$0xff] }
 0x471   : > { %v1438_v54 = vmul.f32 %v7855_v39, %v9312_v41  ;;  %v8156_v41 = vld [vmem:[%s8259_s27 + $0x88] sm:$0xff] }
 0x472   : > { %7116 = vmatpush3.msra.mxu1 %v1730_v5 }
 0x473   : > { %7118 = vmatmul.mubr.msk.f32.vlgmr.msra.gmra.mxu1 %vm1288_vm1, %v1627_v35 }
 0x474   : > { %7122 = vmatprep.mubr.msk.f32.mxu1 %vm1288_vm1, %v1431_v37 }
 0x485   : > { %v2197_v19 = vpop.trf.xlu1 }
 0x486   : > { %7151 = vmatmul.mubr.msk.f32.vlgmr.msra.gmra.mxu0 %vm1199_vm3, %v2197_v19 }
 0x487   : > { %7159 = vmatpush3.msra.mxu0 %v9336_v53  ;;  %7166 = vmatprep.mubr.msk.f32.mxu0 %vm8175_vm2, %v10507_v23 }
 0x488   : > { %7160 = vmatprep.subr.mxu0 %v10507_v23 }
 0x489   : > { %7161 = vmatpush3.msra.mxu0 %v9345_v51 }
 0x48a   : > { %7162 = vmatprep.subr.mxu0 %v10507_v23 }
 0x48b   : > { %7163 = vmatpush3.msra.mxu0 %v9352_v12 }
 0x48c   : > { %7164 = vmatprep.subr.mxu0 %v10507_v23 }
 0x48d   : > { %7165 = vmatpush3.msra.mxu0 %v9359_v58 }
 0x48e   : > { %7188 = vmatprep.subr.mxu0 %v10507_v23 }
 0x533   : > { %v1800_v55 = vpop.f32.mrf.mxu1 }
 0x534   : > { %7856 = vtanh.f32 %v1800_v55 }
 0x535   : > { %v7119_v60 = vpop.f32.mrf.mxu1 }
 0x541   : > { %v7857_v28 = vpop.eup %7856 }
 0x542   : > { %7120 = vmatprep.subr.mxu1 %v7857_v28 }
 0x543   : > { %7121 = vmatpush3.msra.mxu1 %v7857_v28 }
 0x544   : > { %7123 = vmatmul.mubr.msk.f32.vlgmr.msra.gmra.mxu1 %vm1288_vm1, %v1432_v63  ;;  %7153 = vmatprep.subr.mxu1 %v10507_v23 }
 0x545   : > { %7125 = vmatprep.mubr.msk.f32.mxu1 %vm1288_vm1, %v1433_v1 }
 0x546   : > { %v2282_v0 = vpop.f32.mrf.mxu0 }
 0x547   : > { %7154 = vmatpush3.xpose.msk.msra.mxu1 %vm480_vm0, %v2282_v0  ;;  %7167 = vmatmul.mubr.msk.f32.vlgmr.msra.gmra.mxu0 %vm480_vm0, %v2282_v0 }
 0x548   : > { %7126 = vmatmul.mubr.msk.f32.gmra.mxu1 %vm1288_vm1, %v1434_v7  ;;  %v7152_v4 = vpop.f32.mrf.mxu0  ;;  %7169 = vmatprep.subr.mxu1 %v10507_v23 }
 0x549   : > { %7128 = vmatprep.mubr.msk.f32.mxu1 %vm1288_vm1, %v1435_v25  ;;  %7189 = vmatpush3.msra.mxu0 %v8150_v62 }
 0x54a   : > { %7190 = vmatprep.subr.mxu0 %v10507_v23  ;;  %7204 = vmatprep.mubr.msk.f32.mxu0 %vm8175_vm2, %v10507_v23 }
 0x54b   : > { %7191 = vmatpush3.msra.mxu0 %v8151_v49 }
 0x54c   : > { %7129 = vmatmul.mubr.msk.f32.gmra.mxu1 %vm1288_vm1, %v1436_v38  ;;  %7192 = vmatprep.subr.mxu0 %v10507_v23 }
 0x54d   : > { %7131 = vmatprep.mubr.msk.f32.mxu1 %vm1288_vm1, %v1437_v56  ;;  %7193 = vmatpush3.msra.mxu0 %v8152_v22 }
 0x54e   : > { %7194 = vmatprep.subr.mxu0 %v10507_v23 }
 0x54f   : > { %7195 = vmatpush3.msra.mxu0 %v8153_v59 }
 0x550   : > { %7132 = vmatmul.mubr.msk.f32.gmra.mxu1 %vm1288_vm1, %v1438_v54  ;;  %7196 = vmatprep.subr.mxu0 %v10507_v23 }
 0x551   : > { %7155 = vmatprep.mubr.msk.f32.mxu1 %vm8175_vm2, %v10507_v23  ;;  %7197 = vmatpush3.msra.mxu0 %v8154_v45 }
 0x552   : > { %7198 = vmatprep.subr.mxu0 %v10507_v23 }
 0x553   : > { %7199 = vmatpush3.msra.mxu0 %v8155_v61 }
 0x554   : > { %7156 = vmatmul.mubr.msk.f32.vlgmr.msra.gmra.mxu1 %vm480_vm0, %v2282_v0  ;;  %7200 = vmatprep.subr.mxu0 %v10507_v23 }
 0x555   : > { %7171 = vmatprep.mubr.msk.f32.mxu1 %vm8175_vm2, %v10507_v23  ;;  %7201 = vmatpush3.msra.mxu0 %v8156_v41  ;;  %v10514_v41 = vld [vmem:[#allocation2_spill] sm:$0xff] }
 0x556   : > { %7202 = vmatprep.subr.mxu0 %v10507_v23 }
 0x557   : > { %7203 = vmatpush3.msra.mxu0 %v8157_v52  ;;  %v10515_v52 = vld [vmem:[#allocation3_spill] sm:$0xff] }
 0x558   : > { %7212 = vmatprep.subr.mxu0 %v10507_v23 }
 0x604   : > { %v9404_v16 = vpop.f32.mrf.mxu1 }
 0x606   : > { %v9406_v39 = vpop.f32.mrf.mxu1 }
 0x607   : > { %v2436_v5 = vpop.f32.mrf.mxu0 }
 0x608   : > { %v9408_v35 = vpop.f32.mrf.mxu1  ;;  %v2440_v25 = vsel %vm480_vm0, %v2436_v5, 0.0 }
 0x609   : > { %v7168_v37 = vpop.f32.mrf.mxu0 }
 0x60a   : > { %v9410_v19 = vpop.f32.mrf.mxu1  ;;  %v10516_v37 = vld [vmem:[#allocation4_spill] sm:$0xff] }
 0x60c   : > { %v9412_v55 = vpop.f32.mrf.mxu1 }
 0x60e   : > { %v9414_v60 = vpop.f32.mrf.mxu1 }
 0x610   : > { %v9416_v28 = vpop.f32.mrf.mxu1 }
 0x612   : > { %v9418_v63 = vpop.f32.mrf.mxu1 }
 0x614   : > { %v2355_v1 = vpop.f32.mrf.mxu1 }
 0x615   : > { %v2359_v7 = vsel %vm1288_vm1, %v2355_v1, -inf }
 0x616   : > { %2360 = vmax.xlane.f32.xlu0 %v2359_v7  ;;  %v7157_v0 = vpop.f32.mrf.mxu1  ;;  %v10518_v7 = vld [vmem:[#allocation6_spill] sm:$0xff] }
 0x617   : > { %v10519_v0 = vld [vmem:[#allocation7_spill] sm:$0xff] }
 0x61a   : > { %2441 = vadd.xlane.f32.xlu0 %v2440_v25  ;;  %v10521_v25 = vld [vmem:[#allocation9_spill] sm:$0xff] }
 0x69f   : > { %v2361_v4 = vpop.xlane.xlu0 %2360 }
 0x6a0   : > { %v2362_v62 = vsub.f32 %v2355_v1, %v2361_v4  ;;  %v10517_v1 = vld [vmem:[#allocation5_spill] sm:$0xff] }
 0x6a2   : > { %v2363_v38 = vmul.f32 1.442695, %v2362_v62 }
 0x6a3   : > { %v2442_v56 = vpop.xlane.xlu0 %2441 }
 0x6a4   : > { %7858 = vpow2.f32 %v2363_v38  ;;  %v2443_v49 = vmul.f32 0.03125, %v2442_v56 }
 0x6a6   : > { %v2444_v22 = vsub.f32 %v2436_v5, %v2443_v49  ;;  %v10520_v5 = vld [vmem:[#allocation8_spill] sm:$0xff] }
 0x6a8   : > { %v2445_v54 = vmul.f32 %v2444_v22, %v2444_v22 }
 0x6aa   : > { %v2446_v59 = vsel %vm480_vm0, %v2445_v54, 0.0 }
 0x6ab   : > { %2447 = vadd.xlane.f32.xlu0 %v2446_v59 }
 0x6b1   : > { %v7859_v45 = vpop.eup %7858 }
 0x6b2   : > { %v2365_v61 = vsel %vm1288_vm1, %v7859_v45, 0.0 }
 0x6b3   : > { %2366 = vadd.xlane.f32.xlu0 %v2365_v61 }
 0x6e0   : > { %2906 = vxpose.xlu0.b32.start [1/8] (short) (narrow) %v10514_v41, 8 }
 0x6e4   : > { %2907 = vxpose.xlu0.b32.cont [2/8] (short) (narrow) %v10515_v52, 8 }
 0x6e8   : > { %2908 = vxpose.xlu0.b32.cont [3/8] (short) (narrow) %v10516_v37, 8 }
 0x6ec   : > { %2909 = vxpose.xlu0.b32.cont [4/8] (short) (narrow) %v10517_v1, 8 }
 0x6f0   : > { %2910 = vxpose.xlu0.b32.cont [5/8] (short) (narrow) %v10518_v7, 8 }
 0x6f4   : > { %2911 = vxpose.xlu0.b32.cont [6/8] (short) (narrow) %v10519_v0, 8 }
 0x6f8   : > { %2912 = vxpose.xlu0.b32.cont [7/8] (short) (narrow) %v10520_v5, 8  ;;  %v8158_v5 = vld [vmem:[%s8259_s27 + $0xf8] sm:$0xff] }
 0x6fc   : > { %2913 = vxpose.xlu0.b32.end [8/8] (short) (narrow) %v10521_v25, 8  ;;  %v10522_v25 = vld [vmem:[#allocation10_spill] sm:$0xff] }
 0x734   : > { %v2448_v4 = vpop.xlane.xlu0 %2447 }
 0x735   : > { %v2449_v62 = vmul.f32 0.03125, %v2448_v4  ;;  %v2175_v4 = vmul.f32 %v9204_v15, %v10522_v25 }
 0x737   : > { %v2450_v38 = vadd.f32 1e-05, %v2449_v62  ;;  %v10523_v62 = vld [vmem:[#allocation11_spill] sm:$0xff] }
 0x739   : > { %7860 = vrsqrt.f32 %v2450_v38  ;;  %v2176_v38 = vmul.f32 %v9204_v15, %v10523_v62 }
 0x73c   : > { %v2367_v56 = vpop.xlane.xlu0 %2366 }
 0x73d   : > { %7862 = vrcp.f32 %v2367_v56  ;;  %v8159_v56 = vld [vmem:[%s8259_s27 + $0xf0] sm:$0xff] }
 0x746   : > { %v7861_v49 = vpop.eup %7860 }
 0x747   : > { %v2452_v54 = vmul.f32 %v7861_v49, %v2444_v22  ;;  %v2177_v49 = vmul.f32 %v9204_v15, %v9062_v20  ;;  %v2179_v20 = vmul.f32 %v9204_v15, %v9088_v46  ;;  %v8164_v46 = vld [vmem:[%s8259_s27 + $0xc8] sm:$0xff] }
 0x749   : > { %v2453_v59 = vmul.f32 %v9319_v44, %v2452_v54  ;;  %v2178_v54 = vmul.f32 %v9204_v15, %v9074_v13  ;;  %v8163_v13 = vld [vmem:[%s8259_s27 + $0xd0] sm:$0xff] }
 0x74a   : > { %v7863_v61 = vpop.eup %7862 }
 0x74b   : > { %v2454_v41 = vadd.f32 %v9325_v26, %v2453_v59  ;;  %v2369_v37 = vmul.f32 %v7863_v61, %v7859_v45  ;;  %v8161_v59 = vld [vmem:[%s8259_s27 + $0xe0] sm:$0xff]  ;;  %v8162_v61 = vld [vmem:[%s8259_s27 + $0xd8] sm:$0xff] }
 0x74d   : > { %v2455_v52 = vmax.f32 %v2454_v41, 0.0  ;;  %v2180_v41 = vmul.f32 %v9204_v15, %v9092_v2 }
 0x74f   : > { %7170 = vmatpush3.msra.mxu1 %v2455_v52  ;;  %v8165_v52 = vld [vmem:[%s8259_s27 + $0xc0] sm:$0xff] }
 0x750   : > { %7172 = vmatmul.mubr.msk.f32.vlgmr.msra.gmra.mxu1 %vm1288_vm1, %v2369_v37 }
 0x751   : > { %7176 = vmatprep.mubr.msk.f32.mxu1 %vm1288_vm1, %v9208_v31 }
 0x75c   : > { %v2922_v1 = vpop.trf.xlu0 }
 0x75d   : > { %7205 = vmatmul.mubr.msk.f32.vlgmr.msra.gmra.mxu0 %vm1199_vm3, %v2922_v1 }
 0x75e   : > { %7213 = vmatpush3.msra.mxu0 %v9336_v53  ;;  %7220 = vmatprep.mubr.msk.f32.mxu0 %vm8175_vm2, %v10507_v23 }
 0x75f   : > { %7214 = vmatprep.subr.mxu0 %v10507_v23 }
 0x760   : > { %7215 = vmatpush3.msra.mxu0 %v9345_v51 }
 0x761   : > { %7216 = vmatprep.subr.mxu0 %v10507_v23 }
 0x762   : > { %7217 = vmatpush3.msra.mxu0 %v9352_v12 }
 0x763   : > { %7218 = vmatprep.subr.mxu0 %v10507_v23 }
 0x764   : > { %7219 = vmatpush3.msra.mxu0 %v9359_v58 }
 0x765   : > { %7242 = vmatprep.subr.mxu0 %v10507_v23 }
 0x810   : > { %v2525_v31 = vpop.f32.mrf.mxu1 }
 0x811   : > { %7864 = vtanh.f32 %v2525_v31 }
 0x812   : > { %v7173_v22 = vpop.f32.mrf.mxu1 }
 0x81d   : > { %v3007_v45 = vpop.f32.mrf.mxu0 }
 0x81e   : > { %v7865_v7 = vpop.eup %7864  ;;  %7221 = vmatmul.mubr.msk.f32.vlgmr.msra.gmra.mxu0 %vm480_vm0, %v3007_v45 }
 0x81f   : > { %7174 = vmatprep.subr.mxu1 %v7865_v7  ;;  %v7206_v0 = vpop.f32.mrf.mxu0  ;;  %7243 = vmatpush3.msra.mxu0 %v8158_v5 }
 0x820   : > { %7175 = vmatpush3.msra.mxu1 %v7865_v7  ;;  %7244 = vmatprep.subr.mxu0 %v10507_v23 }
 0x821   : > { %7177 = vmatmul.mubr.msk.f32.vlgmr.msra.gmra.mxu1 %vm1288_vm1, %v9212_v8  ;;  %7207 = vmatprep.subr.mxu1 %v10507_v23  ;;  %v8160_v8 = vld [vmem:[%s8259_s27 + $0xe8] sm:$0xff] }
 0x822   : > { %7179 = vmatprep.mubr.msk.f32.mxu1 %vm1288_vm1, %v2175_v4  ;;  %7208 = vmatpush3.xpose.msk.msra.mxu1 %vm480_vm0, %v3007_v45 }
 0x823   : > { %7223 = vmatprep.subr.mxu1 %v10507_v23  ;;  %7245 = vmatpush3.msra.mxu0 %v8159_v56 }
 0x824   : > { %7246 = vmatprep.subr.mxu0 %v10507_v23  ;;  %7258 = vmatprep.mubr.msk.f32.mxu0 %vm8175_vm2, %v10507_v23 }
 0x825   : > { %7180 = vmatmul.mubr.msk.f32.gmra.mxu1 %vm1288_vm1, %v2176_v38  ;;  %7247 = vmatpush3.msra.mxu0 %v8160_v8 }
 0x826   : > { %7182 = vmatprep.mubr.msk.f32.mxu1 %vm1288_vm1, %v2177_v49  ;;  %7248 = vmatprep.subr.mxu0 %v10507_v23 }
 0x827   : > { %7249 = vmatpush3.msra.mxu0 %v8161_v59 }
 0x828   : > { %7250 = vmatprep.subr.mxu0 %v10507_v23 }
 0x829   : > { %7183 = vmatmul.mubr.msk.f32.gmra.mxu1 %vm1288_vm1, %v2178_v54  ;;  %7251 = vmatpush3.msra.mxu0 %v8162_v61 }
 0x82a   : > { %7185 = vmatprep.mubr.msk.f32.mxu1 %vm1288_vm1, %v2179_v20  ;;  %7252 = vmatprep.subr.mxu0 %v10507_v23 }
 0x82b   : > { %7253 = vmatpush3.msra.mxu0 %v8163_v13 }
 0x82c   : > { %7254 = vmatprep.subr.mxu0 %v10507_v23 }
 0x82d   : > { %7186 = vmatmul.mubr.msk.f32.gmra.mxu1 %vm1288_vm1, %v2180_v41  ;;  %7255 = vmatpush3.msra.mxu0 %v8164_v46 }
 0x82e   : > { %7209 = vmatprep.mubr.msk.f32.mxu1 %vm8175_vm2, %v10507_v23  ;;  %7256 = vmatprep.subr.mxu0 %v10507_v23 }
 0x82f   : > { %7257 = vmatpush3.msra.mxu0 %v8165_v52 }
 0x830   : > { %7266 = vmatprep.subr.mxu0 %v10507_v23 }
 0x831   : > { %7210 = vmatmul.mubr.msk.f32.vlgmr.msra.gmra.mxu1 %vm480_vm0, %v3007_v45 }
 0x832   : > { %7225 = vmatprep.mubr.msk.f32.mxu1 %vm8175_vm2, %v10507_v23 }
 0x8de   : > { %v3161_v2 = vpop.f32.mrf.mxu0 }
 0x8df   : > { %v3165_v38 = vsel %vm480_vm0, %v3161_v2, 0.0 }
 0x8e0   : > { %v7222_v15 = vpop.f32.mrf.mxu0 }
 0x8e1   : > { %v9495_v37 = vpop.f32.mrf.mxu1 }
 0x8e3   : > { %v9497_v1 = vpop.f32.mrf.mxu1 }
 0x8e5   : > { %v9499_v31 = vpop.f32.mrf.mxu1 }
 0x8e7   : > { %v9501_v22 = vpop.f32.mrf.mxu1 }
 0x8e9   : > { %v9503_v7 = vpop.f32.mrf.mxu1 }
 0x8eb   : > { %v9505_v0 = vpop.f32.mrf.mxu1 }
 0x8ed   : > { %v9507_v5 = vpop.f32.mrf.mxu1 }
 0x8ef   : > { %v9509_v45 = vpop.f32.mrf.mxu1 }
 0x8f1   : > { %v3080_v25 = vpop.f32.mrf.mxu1 }
 0x8f2   : > { %v3084_v4 = vsel %vm1288_vm1, %v3080_v25, -inf }
 0x8f3   : > { %3085 = vmax.xlane.f32.xlu1 %v3084_v4  ;;  %v7211_v62 = vpop.f32.mrf.mxu1 }
 0x8f7   : > { %3166 = vadd.xlane.f32.xlu1 %v3165_v38 }
 0x97c   : > { %v3086_v56 = vpop.xlane.xlu1 %3085 }
 0x97d   : > { %v3087_v49 = vsub.f32 %v3080_v25, %v3086_v56  ;;  %v4109_v56 = vld [vmem:[%s10428_s8] sm:$0xff] }
 0x97f   : > { %v3088_v8 = vmul.f32 1.442695, %v3087_v49  ;;  %v9641_v49 = vld [vmem:[%s9623_s20 + $0x88] sm:$0xff] }
 0x980   : > { %v3167_v54 = vpop.xlane.xlu1 %3166 }
 0x981   : > { %7866 = vpow2.f32 %v3088_v8  ;;  %v3168_v59 = vmul.f32 0.03125, %v3167_v54  ;;  %v2671_v8 = vsel %vm1199_vm3, %v9641_v49, -inf  ;;  %v9646_v54 = vld [vmem:[%s9623_s20 + $0x98] sm:$0xff] }
 0x983   : > { %v3169_v20 = vsub.f32 %v3161_v2, %v3168_v59  ;;  %v2677_v59 = vsel %vm1199_vm3, %v9646_v54, -inf }
 0x985   : > { %v3170_v61 = vmul.f32 %v3169_v20, %v3169_v20 }
 0x987   : > { %v3171_v41 = vsel %vm480_vm0, %v3170_v61, 0.0 }
 0x988   : > { %3172 = vadd.xlane.f32.xlu1 %v3171_v41  ;;  %v9656_v41 = vld [vmem:[%s9623_s20 + $0xb8] sm:$0xff] }
 0x98e   : > { %v7867_v13 = vpop.eup %7866 }
 0x98f   : > { %v3090_v46 = vsel %vm1288_vm1, %v7867_v13, 0.0 }
 0x990   : > { %3091 = vadd.xlane.f32.xlu1 %v3090_v46 }
 0x9c3   : > { %3631 = vxpose.xlu1.b32.start [1/8] (short) (narrow) %v9180_v57, 8 }
 0x9c7   : > { %3632 = vxpose.xlu1.b32.cont [2/8] (short) (narrow) %v9183_v21, 8 }
 0x9cb   : > { %3633 = vxpose.xlu1.b32.cont [3/8] (short) (narrow) %v9186_v24, 8 }
 0x9cf   : > { %3634 = vxpose.xlu1.b32.cont [4/8] (short) (narrow) %v9189_v30, 8 }
 0x9d3   : > { %3635 = vxpose.xlu1.b32.cont [5/8] (short) (narrow) %v9192_v34, 8 }
 0x9d7   : > { %3636 = vxpose.xlu1.b32.cont [6/8] (short) (narrow) %v9196_v29, 8 }
 0x9db   : > { %3637 = vxpose.xlu1.b32.cont [7/8] (short) (narrow) %v9199_v17, 8  ;;  %v4112_v17 = vld [vmem:[%s10428_s8 + $0x18] sm:$0xff] }
 0x9df   : > { %3638 = vxpose.xlu1.b32.end [8/8] (short) (narrow) %v9202_v43, 8 }
 0xa11   : > { %v3173_v52 = vpop.xlane.xlu1 %3172 }
 0xa12   : > { %v3174_v2 = vmul.f32 0.03125, %v3173_v52 }
 0xa14   : > { %v3175_v15 = vadd.f32 1e-05, %v3174_v2 }
 0xa16   : > { %7868 = vrsqrt.f32 %v3175_v15 }
 0xa19   : > { %v3092_v25 = vpop.xlane.xlu1 %3091 }
 0xa1a   : > { %7870 = vrcp.f32 %v3092_v25 }
 0xa23   : > { %v7869_v57 = vpop.eup %7868 }
 0xa24   : > { %v3177_v21 = vmul.f32 %v7869_v57, %v3169_v20  ;;  %v9651_v20 = vld [vmem:[%s9623_s20 + $0xa8] sm:$0xff] }
 0xa25   : > { %v2683_v61 = vsel %vm1199_vm3, %v9651_v20, -inf }
 0xa26   : > { %v3178_v24 = vmul.f32 %v9319_v44, %v3177_v21 }
 0xa27   : > { %v7871_v4 = vpop.eup %7870 }
 0xa28   : > { %v3179_v30 = vadd.f32 %v9325_v26, %v3178_v24  ;;  %v3094_v62 = vmul.f32 %v7871_v4, %v7867_v13  ;;  %v2689_v13 = vsel %vm1199_vm3, %v9656_v41, -inf }
 0xa2a   : > { %v3180_v34 = vmax.f32 %v3179_v30, 0.0  ;;  %v9668_v30 = vld [vmem:[%s9623_s20] sm:$0xff] }
 0xa2c   : > { %7224 = vmatpush3.msra.mxu1 %v3180_v34 }
 0xa2d   : > { %7226 = vmatmul.mubr.msk.f32.vlgmr.msra.gmra.mxu1 %vm1288_vm1, %v3094_v62  ;;  %v1200_v62 = vsel %vm1199_vm3, %v9668_v30, -inf }
 0xa2e   : > { %7230 = vmatprep.mubr.msk.f32.mxu1 %vm1288_vm1, %v9218_v10 }
 0xa3f   : > { %v3647_v29 = vpop.trf.xlu1 }
 0xa40   : > { %7259 = vmatmul.mubr.msk.f32.vlgmr.msra.gmra.mxu0 %vm1199_vm3, %v3647_v29  ;;  %v9675_v29 = vld [vmem:[%s9623_s20 + $0x8] sm:$0xff] }
 0xa41   : > { %7267 = vmatpush3.msra.mxu0 %v9336_v53  ;;  %7274 = vmatprep.mubr.msk.f32.mxu0 %vm8175_vm2, %v10507_v23 }
 0xa42   : > { %7268 = vmatprep.subr.mxu0 %v10507_v23 }
 0xa43   : > { %7269 = vmatpush3.msra.mxu0 %v9345_v51 }
 0xa44   : > { %7270 = vmatprep.subr.mxu0 %v10507_v23 }
 0xa45   : > { %7271 = vmatpush3.msra.mxu0 %v9352_v12  ;;  %v4111_v12 = vld [vmem:[%s10428_s8 + $0x10] sm:$0xff] }
 0xa46   : > { %7272 = vmatprep.subr.mxu0 %v10507_v23 }
 0xa47   : > { %7273 = vmatpush3.msra.mxu0 %v9359_v58  ;;  %v10524_v58 = vld [vmem:[#allocation12_spill] sm:$0xff] }
 0xa48   : > { %7296 = vmatprep.subr.mxu0 %v4112_v17 }
 0xaed   : > { %v3250_v43 = vpop.f32.mrf.mxu1 }
 0xaee   : > { %7872 = vtanh.f32 %v3250_v43  ;;  %v9680_v43 = vld [vmem:[%s9623_s20 + $0x18] sm:$0xff] }
 0xaef   : > { %v7227_v10 = vpop.f32.mrf.mxu1 }
 0xaf0   : > { %v1209_v10 = vsel %vm1199_vm3, %v9680_v43, -inf }
 0xafb   : > { %v7873_v53 = vpop.eup %7872 }
 0xafc   : > { %7228 = vmatprep.subr.mxu1 %v7873_v53 }
 0xafd   : > { %7229 = vmatpush3.msra.mxu1 %v7873_v53  ;;  %v9685_v53 = vld [vmem:[%s9623_s20 + $0x20] sm:$0xff] }
 0xafe   : > { %7231 = vmatmul.mubr.msk.f32.vlgmr.msra.gmra.mxu1 %vm1288_vm1, %v9222_v50  ;;  %7261 = vmatprep.subr.mxu1 %v10507_v23  ;;  %v2902_v50 = vmul.f32 %v9214_v40, %v10524_v58 }
 0xaff   : > { %7233 = vmatprep.mubr.msk.f32.mxu1 %vm1288_vm1, %v9226_v32  ;;  %v4110_v32 = vld [vmem:[%s10428_s8 + $0x8] sm:$0xff] }
 0xb00   : > { %v3732_v51 = vpop.f32.mrf.mxu0 }
 0xb01   : > { %7275 = vmatmul.mubr.msk.f32.vlgmr.msra.gmra.mxu0 %vm480_vm0, %v3732_v51  ;;  %7262 = vmatpush3.xpose.msk.msra.mxu1 %vm480_vm0, %v3732_v51 }
 0xb02   : > { %7297 = vmatpush3.msra.mxu0 %v4112_v17  ;;  %7234 = vmatmul.mubr.msk.f32.gmra.mxu1 %vm1288_vm1, %v9230_v6  ;;  %v7260_v38 = vpop.f32.mrf.mxu0  ;;  %v2904_v6 = vmul.f32 %v9214_v40, %v9145_v47  ;;  %v1203_v17 = vsel %vm1199_vm3, %v9675_v29, -inf }
 0xb03   : > { %7298 = vmatprep.subr.mxu0 %v4111_v12  ;;  %7304 = vmatprep.mubr.msk.f32.mxu0 %vm480_vm0, %v9406_v39  ;;  %v2905_v39 = vmul.f32 %v9214_v40, %v9158_v48  ;;  %v9700_v38 = vld [vmem:[%s9623_s20 + $0x38] sm:$0xff] }
 0xb04   : > { %7236 = vmatprep.mubr.msk.f32.mxu1 %vm1288_vm1, %v2902_v50  ;;  %7299 = vmatpush3.msra.mxu0 %v4111_v12  ;;  %v9690_v12 = vld [vmem:[%s9623_s20 + $0x28] sm:$0xff]  ;;  %v9695_v50 = vld [vmem:[%s9623_s20 + $0x30] sm:$0xff] }
 0xb05   : > { %7300 = vmatprep.subr.mxu0 %v4110_v32  ;;  %7277 = vmatprep.subr.mxu1 %v10507_v23  ;;  %v1215_v58 = vsel %vm1199_vm3, %v9690_v12, -inf }
 0xb06   : > { %7301 = vmatpush3.msra.mxu0 %v4110_v32  ;;  %7237 = vmatmul.mubr.msk.f32.gmra.mxu1 %vm1288_vm1, %v9234_v9  ;;  %v1218_v32 = vsel %vm1199_vm3, %v9695_v50, -inf }
 0xb07   : > { %7302 = vmatprep.subr.mxu0 %v4109_v56  ;;  %7239 = vmatprep.mubr.msk.f32.mxu1 %vm1288_vm1, %v2904_v6  ;;  %v9705_v6 = vld [vmem:[%s9623_s20 + $0x40] sm:$0xff] }
 0xb08   : > { %7303 = vmatpush3.msra.mxu0 %v4109_v56  ;;  %v1221_v56 = vsel %vm1199_vm3, %v9700_v38, -inf }
 0xb09   : > { %7305 = vmatmul.mubr.msk.f32.vlgmr.msra.gmra.mxu0 %vm480_vm0, %v9404_v16 }
 0xb0a   : > { %7307 = vmatprep.mubr.msk.f32.mxu0 %vm480_vm0, %v9410_v19  ;;  %7240 = vmatmul.mubr.msk.f32.gmra.mxu1 %vm1288_vm1, %v2905_v39  ;;  %v1943_v39 = vsel %vm1199_vm3, %v9705_v6, -inf }
 0xb0b   : > { %7263 = vmatprep.mubr.msk.f32.mxu1 %vm8175_vm2, %v10507_v23 }
 0xb0d   : > { %7308 = vmatmul.mubr.msk.f32.gmra.mxu0 %vm480_vm0, %v9408_v35 }
 0xb0e   : > { %7310 = vmatprep.mubr.msk.f32.mxu0 %vm480_vm0, %v9414_v60  ;;  %7264 = vmatmul.mubr.msk.f32.vlgmr.msra.gmra.mxu1 %vm480_vm0, %v3732_v51  ;;  %v1212_v51 = vsel %vm1199_vm3, %v9685_v53, -inf }
 0xb0f   : > { %7279 = vmatprep.mubr.msk.f32.mxu1 %vm8175_vm2, %v10507_v23 }
 0xb11   : > { %7311 = vmatmul.mubr.msk.f32.gmra.mxu0 %vm480_vm0, %v9412_v55 }
 0xb12   : > { %7313 = vmatprep.mubr.msk.f32.mxu0 %vm480_vm0, %v9418_v63 }
 0xb15   : > { %7314 = vmatmul.mubr.msk.f32.gmra.mxu0 %vm480_vm0, %v9416_v28 }
 0xb16   : > { %7316 = vmatprep.mubr.msk.f32.mxu0 %vm480_vm0, %v9497_v1 }
 0xb19   : > { %7317 = vmatmul.mubr.msk.f32.gmra.mxu0 %vm480_vm0, %v9495_v37 }
 0xb1a   : > { %7319 = vmatprep.mubr.msk.f32.mxu0 %vm480_vm0, %v9501_v22 }
 0xb1d   : > { %7320 = vmatmul.mubr.msk.f32.gmra.mxu0 %vm480_vm0, %v9499_v31  ;;  %v9626_v31 = vld [vmem:[%s9623_s20 + $0x10] sm:$0xff] }
 0xb1e   : > { %7322 = vmatprep.mubr.msk.f32.mxu0 %vm480_vm0, %v9505_v0  ;;  %v1206_v22 = vsel %vm1199_vm3, %v9626_v31, -inf }
 0xb1f   : > { %1207 = vmax.xlane.f32.xlu1 %v1206_v22  ;;  %v9745_v22 = vld [vmem:[%s9623_s20 + $0x80] sm:$0xff] }
 0xb21   : > { %7323 = vmatmul.mubr.msk.f32.gmra.mxu0 %vm480_vm0, %v9503_v7  ;;  %v9631_v7 = vld [vmem:[%s9623_s20 + $0x68] sm:$0xff] }
 0xb22   : > { %7325 = vmatprep.mubr.msk.f32.mxu0 %vm480_vm0, %v9509_v45  ;;  %v1958_v0 = vsel %vm1199_vm3, %v9631_v7, -inf }
 0xb23   : > { %1959 = vmax.xlane.f32.xlu1 %v1958_v0  ;;  %v9748_v0 = vld [vmem:[%s9623_s20 + $0xe8] sm:$0xff] }
 0xb25   : > { %7326 = vmatmul.mubr.msk.f32.gmra.mxu0 %vm480_vm0, %v9507_v5  ;;  %v9636_v5 = vld [vmem:[%s9623_s20 + $0x78] sm:$0xff] }
 0xb26   : > { %v1964_v45 = vsel %vm1199_vm3, %v9636_v5, -inf }
 0xb27   : > { %1965 = vmax.xlane.f32.xlu1 %v1964_v45  ;;  %v3408_v45 = vsel %vm1199_vm3, %v9748_v0, -inf }
 0xb2b   : > { %2672 = vmax.xlane.f32.xlu1 %v2671_v8  ;;  %v2668_v8 = vsel %vm1199_vm3, %v9745_v22, -inf }
 0xb2f   : > { %2678 = vmax.xlane.f32.xlu1 %v2677_v59  ;;  %v9755_v59 = vld [vmem:[%s9623_s20 + $0x90] sm:$0xff] }
 0xb33   : > { %2684 = vmax.xlane.f32.xlu1 %v2683_v61  ;;  %v9758_v61 = vld [vmem:[%s9623_s20 + $0xf8] sm:$0xff] }
 0xb37   : > { %2690 = vmax.xlane.f32.xlu1 %v2689_v13  ;;  %v3414_v13 = vsel %vm1199_vm3, %v9758_v61, -inf }
 0xbbe   : > { %v7232_v23 = vpop.f32.mrf.mxu1 }
 0xbc0   : > { %v3345_v47 = vpop.f32.mrf.mxu1 }
 0xbc1   : > { %7328 = vmatprep.mubr.msk.f32.mxu0 %vm480_vm0, %v3345_v47  ;;  %v3886_v48 = vpop.f32.mrf.mxu0 }
 0xbc2   : > { %v7235_v40 = vpop.f32.mrf.mxu1  ;;  %7329 = vmatmul.mubr.msk.f32.gmra.mxu0 %vm480_vm0, %v7232_v23  ;;  %v3890_v1 = vsel %vm480_vm0, %v3886_v48, 0.0  ;;  %v9710_v23 = vld [vmem:[%s9623_s20 + $0x48] sm:$0xff] }
 0xbc3   : > { %v7276_v9 = vpop.f32.mrf.mxu0  ;;  %v1946_v47 = vsel %vm1199_vm3, %v9710_v23, -inf }
 0xbc4   : > { %v3355_v16 = vpop.f32.mrf.mxu1  ;;  %v9720_v9 = vld [vmem:[%s9623_s20 + $0x58] sm:$0xff] }
 0xbc5   : > { %7331 = vmatprep.mubr.msk.f32.mxu0 %vm480_vm0, %v3355_v16  ;;  %v1952_v16 = vsel %vm1199_vm3, %v9720_v9, -inf }
 0xbc6   : > { %v7238_v35 = vpop.f32.mrf.mxu1  ;;  %7332 = vmatmul.mubr.msk.f32.gmra.mxu0 %vm480_vm0, %v7235_v40 }
 0xbc8   : > { %v3365_v19 = vpop.f32.mrf.mxu1 }
 0xbc9   : > { %7334 = vmatprep.mubr.msk.f32.mxu0 %vm480_vm0, %v3365_v19  ;;  %v9728_v19 = vld [vmem:[%s9623_s20 + $0xc8] sm:$0xff] }
 0xbca   : > { %v7241_v55 = vpop.f32.mrf.mxu1  ;;  %7335 = vmatmul.mubr.msk.f32.gmra.mxu0 %vm480_vm0, %v7238_v35  ;;  %v9725_v35 = vld [vmem:[%s9623_s20 + $0x60] sm:$0xff] }
 0xbcc   : > { %v3375_v60 = vpop.f32.mrf.mxu1 }
 0xbcd   : > { %7337 = vmatprep.mubr.msk.f32.mxu0 %vm480_vm0, %v3375_v60  ;;  %v1955_v60 = vsel %vm1199_vm3, %v9725_v35, -inf }
 0xbce   : > { %v3805_v28 = vpop.f32.mrf.mxu1  ;;  %7338 = vmatmul.mubr.msk.f32.gmra.mxu0 %vm480_vm0, %v7241_v55  ;;  %v3396_v55 = vsel %vm1199_vm3, %v9728_v19, -inf }
 0xbcf   : > { %v3809_v63 = vsel %vm1288_vm1, %v3805_v28, -inf  ;;  %3397 = vmax.xlane.f32.xlu1 %v3396_v55 }
 0xbd0   : > { %3810 = vmax.xlane.f32.xlu0 %v3809_v63  ;;  %v7265_v37 = vpop.f32.mrf.mxu1  ;;  %v9738_v63 = vld [vmem:[%s9623_s20 + $0xd8] sm:$0xff] }
 0xbd1   : > { %v3402_v37 = vsel %vm1199_vm3, %v9738_v63, -inf }
 0xbd3   : > { %3403 = vmax.xlane.f32.xlu1 %v3402_v37 }
 0xbd4   : > { %3891 = vadd.xlane.f32.xlu0 %v3890_v1 }
 0xbd7   : > { %3409 = vmax.xlane.f32.xlu1 %v3408_v45 }
 0xbdb   : > { %3415 = vmax.xlane.f32.xlu1 %v3414_v13 }
 0xc59   : > { %v3811_v46 = vpop.xlane.xlu0 %3810 }
 0xc5a   : > { %v3812_v52 = vsub.f32 %v3805_v28, %v3811_v46  ;;  %v9735_v28 = vld [vmem:[%s9623_s20 + $0x70] sm:$0xff]  ;;  %v2674_v46 = vsel %vm1199_vm3, %v9755_v59, -inf }
 0xc5b   : > { %v1961_v1 = vsel %vm1199_vm3, %v9735_v28, -inf }
 0xc5c   : > { %v3813_v2 = vmul.f32 1.442695, %v3812_v52  ;;  %v9765_v52 = vld [vmem:[%s9623_s20 + $0xa0] sm:$0xff] }
 0xc5d   : > { %v3892_v15 = vpop.xlane.xlu0 %3891 }
 0xc5e   : > { %7874 = vpow2.f32 %v3813_v2  ;;  %v3893_v25 = vmul.f32 0.03125, %v3892_v15  ;;  %v2680_v2 = vsel %vm1199_vm3, %v9765_v52, -inf  ;;  %v9770_v15 = vld [vmem:[%s9623_s20 + $0xb0] sm:$0xff] }
 0xc60   : > { %v9660_v57 = vsub.f32 %v3886_v48, %v3893_v25  ;;  %v9715_v48 = vld [vmem:[%s9623_s20 + $0x50] sm:$0xff]  ;;  %v2686_v25 = vsel %vm1199_vm3, %v9770_v15, -inf }
 0xc61   : > { %v1949_v40 = vsel %vm1199_vm3, %v9715_v48, -inf }
 0xc62   : > { %v3895_v21 = vmul.f32 %v9660_v57, %v9660_v57 }
 0xc64   : > { %v3896_v24 = vsel %vm480_vm0, %v3895_v21, 0.0  ;;  %v9775_v21 = vld [vmem:[%s9623_s20 + $0xc0] sm:$0xff] }
 0xc65   : > { %3897 = vadd.xlane.f32.xlu0 %v3896_v24  ;;  %v3393_v24 = vsel %vm1199_vm3, %v9775_v21, -inf }
 0xc6b   : > { %v9665_v4 = vpop.eup %7874 }
 0xc6c   : > { %v3815_v34 = vsel %vm1288_vm1, %v9665_v4, 0.0 }
 0xc6d   : > { %3816 = vadd.xlane.f32.xlu0 %v3815_v34  ;;  %v9780_v34 = vld [vmem:[%s9623_s20 + $0xd0] sm:$0xff] }
 0xc71   : > { %1201 = vmax.xlane.f32.xlu0 %v1200_v62  ;;  %v3399_v62 = vsel %vm1199_vm3, %v9780_v34, -inf }
 0xc75   : > { %1204 = vmax.xlane.f32.xlu0 %v1203_v17  ;;  %v9785_v17 = vld [vmem:[%s9623_s20 + $0xe0] sm:$0xff] }
 0xc79   : > { %1210 = vmax.xlane.f32.xlu0 %v1209_v10  ;;  %v3405_v10 = vsel %vm1199_vm3, %v9785_v17, -inf }
 0xc7d   : > { %1213 = vmax.xlane.f32.xlu0 %v1212_v51  ;;  %v9790_v51 = vld [vmem:[%s9623_s20 + $0xf0] sm:$0xff] }
 0xc81   : > { %1216 = vmax.xlane.f32.xlu0 %v1215_v58  ;;  %v3411_v58 = vsel %vm1199_vm3, %v9790_v51, -inf }
 0xc85   : > { %1219 = vmax.xlane.f32.xlu0 %v1218_v32 }
 0xc89   : > { %1222 = vmax.xlane.f32.xlu0 %v1221_v56 }
 0xc8d   : > { %1944 = vmax.xlane.f32.xlu0 %v1943_v39 }
 0xc91   : > { %1947 = vmax.xlane.f32.xlu0 %v1946_v47  ;;  %v1208_v47 = vpop.xlane.xlu1 %1207 }
 0xc95   : > { %1950 = vmax.xlane.f32.xlu0 %v1949_v40 }
 0xc99   : > { %1953 = vmax.xlane.f32.xlu0 %v1952_v16  ;;  %v1226_v16 = vsub.f32 %v9626_v31, %v1208_v47 }
 0xc9d   : > { %1956 = vmax.xlane.f32.xlu0 %v1955_v60  ;;  %v1236_v60 = vmul.f32 1.442695, %v1226_v16 }
 0xca1   : > { %1962 = vmax.xlane.f32.xlu0 %v1961_v1 }
 0xca5   : > { %2669 = vmax.xlane.f32.xlu0 %v2668_v8 }
 0xca9   : > { %2675 = vmax.xlane.f32.xlu0 %v2674_v46 }
 0xcad   : > { %2681 = vmax.xlane.f32.xlu0 %v2680_v2 }
 0xcb1   : > { %2687 = vmax.xlane.f32.xlu0 %v2686_v25 }
 0xcb5   : > { %3394 = vmax.xlane.f32.xlu0 %v3393_v24 }
 0xcb9   : > { %3400 = vmax.xlane.f32.xlu0 %v3399_v62 }
 0xcbd   : > { %3406 = vmax.xlane.f32.xlu0 %v3405_v10 }
 0xcc1   : > { %3412 = vmax.xlane.f32.xlu0 %v3411_v58 }
 0xcee   : > { %v3898_v32 = vpop.xlane.xlu0 %3897 }
 0xcef   : > { %v3899_v56 = vmul.f32 0.03125, %v3898_v32 }
 0xcf1   : > { %v3900_v39 = vadd.f32 1e-05, %v3899_v56 }
 0xcf3   : > { %7876 = vrsqrt.f32 %v3900_v39 }
 0xcf6   : > { %v3817_v40 = vpop.xlane.xlu0 %3816 }
 0xcf7   : > { %7878 = vrcp.f32 %v3817_v40 }
 0xcf8   : > { %7880 = vpow2.f32 %v1236_v60  ;;  %v1960_v60 = vpop.xlane.xlu1 %1959 }
 0xcfa   : > { %v1202_v55 = vpop.xlane.xlu0 %1201 }
 0xcfb   : > { %v1224_v37 = vsub.f32 %v9668_v30, %v1202_v55 }
 0xcfd   : > { %v1232_v1 = vmul.f32 1.442695, %v1224_v37 }
 0xcfe   : > { %v1205_v45 = vpop.xlane.xlu0 %1204 }
 0xcff   : > { %7882 = vpow2.f32 %v1232_v1  ;;  %v1225_v8 = vsub.f32 %v9675_v29, %v1205_v45 }
 0xd00   : > { %v7877_v13 = vpop.eup %7876 }
 0xd01   : > { %v3902_v46 = vmul.f32 %v7877_v13, %v9660_v57  ;;  %v1234_v2 = vmul.f32 1.442695, %v1225_v8 }
 0xd02   : > { %v1211_v25 = vpop.xlane.xlu0 %1210 }
 0xd03   : > { %v3903_v24 = vmul.f32 %v9319_v44, %v3902_v46  ;;  %7884 = vpow2.f32 %v1234_v2  ;;  %v1227_v31 = vsub.f32 %v9680_v43, %v1211_v25  ;;  %v1966_v2 = vpop.xlane.xlu1 %1965 }
 0xd04   : > { %v7879_v62 = vpop.eup %7878 }
 0xd05   : > { %v3904_v10 = vadd.f32 %v9325_v26, %v3903_v24  ;;  %v1238_v30 = vmul.f32 1.442695, %v1227_v31  ;;  %v3819_v29 = vmul.f32 %v7879_v62, %v9665_v4  ;;  %v9804_v44 = vpop.eup %7880 }
 0xd06   : > { %v1214_v58 = vpop.xlane.xlu0 %1213  ;;  %v1254_v16 = vsel %vm1199_vm3, %v9804_v44, 0.0 }
 0xd07   : > { %v3905_v32 = vmax.f32 %v3904_v10, 0.0  ;;  %7886 = vpow2.f32 %v1238_v30  ;;  %v1228_v56 = vsub.f32 %v9685_v53, %v1214_v58 }
 0xd09   : > { %7278 = vmatpush3.msra.mxu1 %v3905_v32  ;;  %v1240_v57 = vmul.f32 1.442695, %v1228_v56  ;;  %v2673_v32 = vpop.xlane.xlu1 %2672  ;;  %v1972_v56 = vsub.f32 %v9631_v7, %v1960_v60 }
 0xd0a   : > { %7280 = vmatmul.mubr.msk.f32.vlgmr.msra.gmra.mxu1 %vm1288_vm1, %v3819_v29  ;;  %v1217_v39 = vpop.xlane.xlu0 %1216  ;;  %v2693_v60 = vsub.f32 %v9641_v49, %v2673_v32 }
 0xd0b   : > { %7284 = vmatprep.mubr.msk.f32.mxu1 %vm1288_vm1, %v9236_v36  ;;  %7888 = vpow2.f32 %v1240_v57  ;;  %v1229_v26 = vsub.f32 %v9690_v12, %v1217_v39 }
 0xd0c   : > { %v9809_v43 = vpop.eup %7882 }
 0xd0d   : > { %v1242_v47 = vmul.f32 1.442695, %v1229_v26  ;;  %v1248_v53 = vsel %vm1199_vm3, %v9809_v43, 0.0 }
 0xd0e   : > { %v1220_v4 = vpop.xlane.xlu0 %1219  ;;  %1249 = vadd.xlane.f32.xlu0 %v1248_v53  ;;  %v1974_v53 = vsub.f32 %v9636_v5, %v1966_v2 }
 0xd0f   : > { %7890 = vpow2.f32 %v1242_v47  ;;  %v1230_v40 = vsub.f32 %v9695_v50, %v1220_v4  ;;  %v1985_v47 = vmul.f32 1.442695, %v1972_v56 }
 0xd10   : > { %v9816_v55 = vpop.eup %7884 }
 0xd11   : > { %v1244_v36 = vmul.f32 1.442695, %v1230_v40  ;;  %v1251_v12 = vsel %vm1199_vm3, %v9816_v55, 0.0  ;;  %v2679_v40 = vpop.xlane.xlu1 %2678 }
 0xd12   : > { %v1223_v37 = vpop.xlane.xlu0 %1222  ;;  %1252 = vadd.xlane.f32.xlu1 %v1251_v12  ;;  %1255 = vadd.xlane.f32.xlu0 %v1254_v16  ;;  %v1989_v12 = vmul.f32 1.442695, %v1974_v53 }
 0xd13   : > { %7892 = vpow2.f32 %v1244_v36  ;;  %v1231_v1 = vsub.f32 %v9700_v38, %v1223_v37 }
 0xd14   : > { %v9821_v45 = vpop.eup %7886 }
 0xd15   : > { %v1246_v8 = vmul.f32 1.442695, %v1231_v1  ;;  %v1257_v50 = vsel %vm1199_vm3, %v9821_v45, 0.0 }
 0xd16   : > { %v1945_v13 = vpop.xlane.xlu0 %1944  ;;  %1258 = vadd.xlane.f32.xlu1 %v1257_v50 }
 0xd17   : > { %7894 = vpow2.f32 %v1246_v8  ;;  %v1967_v46 = vsub.f32 %v9705_v6, %v1945_v13  ;;  %v2685_v8 = vpop.xlane.xlu1 %2684  ;;  %v2702_v13 = vmul.f32 1.442695, %v2693_v60 }
 0xd18   : > { %v9826_v25 = vpop.eup %7888 }
 0xd19   : > { %v1975_v24 = vmul.f32 1.442695, %v1967_v46  ;;  %v1260_v31 = vsel %vm1199_vm3, %v9826_v25, 0.0  ;;  %v2695_v46 = vsub.f32 %v9646_v54, %v2679_v40 }
 0xd1a   : > { %v1948_v62 = vpop.xlane.xlu0 %1947  ;;  %1261 = vadd.xlane.f32.xlu0 %v1260_v31 }
 0xd1b   : > { %7896 = vpow2.f32 %v1975_v24  ;;  %v1968_v38 = vsub.f32 %v9710_v23, %v1948_v62  ;;  %v2706_v62 = vmul.f32 1.442695, %v2695_v46 }
 0xd1c   : > { %v9831_v10 = vpop.eup %7890 }
 0xd1d   : > { %v1977_v30 = vmul.f32 1.442695, %v1968_v38  ;;  %v1263_v58 = vsel %vm1199_vm3, %v9831_v10, 0.0  ;;  %v2697_v38 = vsub.f32 %v9651_v20, %v2685_v8 }
 0xd1e   : > { %v1951_v6 = vpop.xlane.xlu0 %1950  ;;  %1264 = vadd.xlane.f32.xlu1 %v1263_v58  ;;  %v2691_v58 = vpop.xlane.xlu1 %2690 }
 0xd1f   : > { %7898 = vpow2.f32 %v1977_v30  ;;  %v1969_v29 = vsub.f32 %v9715_v48, %v1951_v6  ;;  %v2710_v56 = vmul.f32 1.442695, %v2697_v38 }
 0xd20   : > { %v9837_v57 = vpop.eup %7892 }
 0xd21   : > { %v1979_v39 = vmul.f32 1.442695, %v1969_v29  ;;  %v1266_v23 = vsel %vm1199_vm3, %v9837_v57, 0.0  ;;  %v2699_v29 = vsub.f32 %v9656_v41, %v2691_v58 }
 0xd22   : > { %v1954_v26 = vpop.xlane.xlu0 %1953  ;;  %1267 = vadd.xlane.f32.xlu0 %v1266_v23 }
 0xd23   : > { %7900 = vpow2.f32 %v1979_v39  ;;  %v1970_v4 = vsub.f32 %v9720_v9, %v1954_v26  ;;  %v2714_v53 = vmul.f32 1.442695, %v2699_v29 }
 0xd24   : > { %v9843_v7 = vpop.eup %7894  ;;  %7902 = vpow2.f32 %v1985_v47 }
 0xd25   : > { %v1981_v16 = vmul.f32 1.442695, %v1970_v4  ;;  %v1269_v48 = vsel %vm1199_vm3, %v9843_v7, 0.0 }
 0xd26   : > { %v1957_v36 = vpop.xlane.xlu0 %1956  ;;  %1270 = vadd.xlane.f32.xlu1 %v1269_v48 }
 0xd27   : > { %7904 = vpow2.f32 %v1981_v16  ;;  %v1971_v5 = vsub.f32 %v9725_v35, %v1957_v36 }
 0xd28   : > { %v9849_v37 = vpop.eup %7896  ;;  %7906 = vpow2.f32 %v1989_v12 }
 0xd29   : > { %v1983_v1 = vmul.f32 1.442695, %v1971_v5  ;;  %v1991_v9 = vsel %vm1199_vm3, %v9849_v37, 0.0 }
 0xd2a   : > { %v1963_v50 = vpop.xlane.xlu0 %1962  ;;  %1992 = vadd.xlane.f32.xlu0 %v1991_v9 }
 0xd2b   : > { %7908 = vpow2.f32 %v1983_v1  ;;  %v1973_v49 = vsub.f32 %v9735_v28, %v1963_v50 }
 0xd2c   : > { %v9855_v2 = vpop.eup %7898  ;;  %7910 = vpow2.f32 %v2702_v13 }
 0xd2d   : > { %v1987_v24 = vmul.f32 1.442695, %v1973_v49  ;;  %v1994_v35 = vsel %vm1199_vm3, %v9855_v2, 0.0 }
 0xd2e   : > { %v2670_v31 = vpop.xlane.xlu0 %2669  ;;  %1995 = vadd.xlane.f32.xlu1 %v1994_v35 }
 0xd2f   : > { %7912 = vpow2.f32 %v1987_v24  ;;  %v2692_v30 = vsub.f32 %v9745_v22, %v2670_v31 }
 0xd30   : > { %v9861_v54 = vpop.eup %7900  ;;  %7914 = vpow2.f32 %v2706_v62 }
 0xd31   : > { %v2700_v32 = vmul.f32 1.442695, %v2692_v30  ;;  %v1997_v28 = vsel %vm1199_vm3, %v9861_v54, 0.0  ;;  %v9866_v39 = vpop.eup %7902 }
 0xd32   : > { %v2676_v6 = vpop.xlane.xlu0 %2675  ;;  %1998 = vadd.xlane.f32.xlu0 %v1997_v28  ;;  %v2006_v40 = vsel %vm1199_vm3, %v9866_v39, 0.0 }
 0xd33   : > { %7916 = vpow2.f32 %v2700_v32  ;;  %v2694_v20 = vsub.f32 %v9755_v59, %v2676_v6 }
 0xd34   : > { %v9869_v23 = vpop.eup %7904  ;;  %7918 = vpow2.f32 %v2710_v56  ;;  %v3398_v56 = vpop.xlane.xlu1 %3397 }
 0xd35   : > { %v2704_v22 = vmul.f32 1.442695, %v2694_v20  ;;  %v2000_v26 = vsel %vm1199_vm3, %v9869_v23, 0.0  ;;  %v9873_v4 = vpop.eup %7906 }
 0xd36   : > { %v2682_v47 = vpop.xlane.xlu0 %2681  ;;  %2001 = vadd.xlane.f32.xlu1 %v2000_v26 }
 0xd37   : > { %7920 = vpow2.f32 %v2704_v22  ;;  %v2696_v41 = vsub.f32 %v9765_v52, %v2682_v47  ;;  %v2012_v52 = vsel %vm1199_vm3, %v9873_v4, 0.0  ;;  %v3418_v22 = vsub.f32 %v9728_v19, %v3398_v56 }
 0xd38   : > { %v9878_v16 = vpop.eup %7908  ;;  %7922 = vpow2.f32 %v2714_v53  ;;  %v3404_v20 = vpop.xlane.xlu1 %3403 }
 0xd39   : > { %v2708_v59 = vmul.f32 1.442695, %v2696_v41  ;;  %v2003_v48 = vsel %vm1199_vm3, %v9878_v16, 0.0  ;;  %v9882_v12 = vpop.eup %7910  ;;  %v3420_v53 = vsub.f32 %v9738_v63, %v3404_v20 }
 0xd3a   : > { %2004 = vadd.xlane.f32.xlu0 %v2003_v48  ;;  %v2688_v36 = vpop.xlane.xlu0 %2687  ;;  %2007 = vadd.xlane.f32.xlu1 %v2006_v40  ;;  %v2719_v50 = vsel %vm1199_vm3, %v9882_v12, 0.0  ;;  %v3427_v40 = vmul.f32 1.442695, %v3418_v22 }
 0xd3b   : > { %7924 = vpow2.f32 %v2708_v59  ;;  %v2698_v60 = vsub.f32 %v9770_v15, %v2688_v36 }
 0xd3c   : > { %v9887_v5 = vpop.eup %7912  ;;  %v3410_v59 = vpop.xlane.xlu1 %3409 }
 0xd3d   : > { %v2712_v1 = vmul.f32 1.442695, %v2698_v60  ;;  %v2009_v9 = vsel %vm1199_vm3, %v9887_v5, 0.0  ;;  %v9891_v8 = vpop.eup %7914 }
 0xd3e   : > { %2010 = vadd.xlane.f32.xlu0 %v2009_v9  ;;  %2013 = vadd.xlane.f32.xlu1 %v2012_v52  ;;  %v2725_v49 = vsel %vm1199_vm3, %v9891_v8, 0.0  ;;  %v3395_v6 = vpop.xlane.xlu0 %3394  ;;  %v3431_v52 = vmul.f32 1.442695, %v3420_v53 }
 0xd3f   : > { %7926 = vpow2.f32 %v2712_v1  ;;  %v3417_v26 = vsub.f32 %v9775_v21, %v3395_v6  ;;  %v3422_v1 = vsub.f32 %v9748_v0, %v3410_v59 }
 0xd40   : > { %v9895_v13 = vpop.eup %7916  ;;  %7928 = vpow2.f32 %v3427_v40 }
 0xd41   : > { %v2716_v15 = vsel %vm1199_vm3, %v9895_v13, 0.0  ;;  %v9899_v46 = vpop.eup %7918  ;;  %v3425_v48 = vmul.f32 1.442695, %v3417_v26  ;;  %v3435_v63 = vmul.f32 1.442695, %v3422_v1  ;;  %v9957_v26 = vpop.f32.mrf.mxu0 }
 0xd42   : > { %2717 = vadd.xlane.f32.xlu0 %v2716_v15  ;;  %2720 = vadd.xlane.f32.xlu1 %v2719_v50  ;;  %v2731_v62 = vsel %vm1199_vm3, %v9899_v46, 0.0  ;;  %v3401_v29 = vpop.xlane.xlu0 %3400 }
 0xd43   : > { %v3419_v47 = vsub.f32 %v9780_v34, %v3401_v29  ;;  %7930 = vpow2.f32 %v3425_v48  ;;  %v3416_v34 = vpop.xlane.xlu1 %3415 }
 0xd44   : > { %v9903_v24 = vpop.eup %7920  ;;  %v3424_v50 = vsub.f32 %v9758_v61, %v3416_v34 }
 0xd45   : > { %v2722_v35 = vsel %vm1199_vm3, %v9903_v24, 0.0  ;;  %v9907_v31 = vpop.eup %7922  ;;  %v3429_v36 = vmul.f32 1.442695, %v3419_v47 }
 0xd46   : > { %2723 = vadd.xlane.f32.xlu0 %v2722_v35  ;;  %2726 = vadd.xlane.f32.xlu1 %v2725_v49  ;;  %v2737_v58 = vsel %vm1199_vm3, %v9907_v31, 0.0  ;;  %v3407_v41 = vpop.xlane.xlu0 %3406  ;;  %v3439_v49 = vmul.f32 1.442695, %v3424_v50 }
 0xd47   : > { %v3421_v60 = vsub.f32 %v9785_v17, %v3407_v41  ;;  %7932 = vpow2.f32 %v3429_v36  ;;  %v9963_v41 = vpop.f32.mrf.mxu0 }
 0xd48   : > { %v9911_v38 = vpop.eup %7924  ;;  %7934 = vpow2.f32 %v3431_v52 }
 0xd49   : > { %v2728_v30 = vsel %vm1199_vm3, %v9911_v38, 0.0  ;;  %v3433_v19 = vmul.f32 1.442695, %v3421_v60  ;;  %v7309_v40 = vpop.f32.mrf.mxu0 }
 0xd4a   : > { %2729 = vadd.xlane.f32.xlu0 %v2728_v30  ;;  %2732 = vadd.xlane.f32.xlu1 %v2731_v62  ;;  %v3413_v9 = vpop.xlane.xlu0 %3412 }
 0xd4b   : > { %v3423_v21 = vsub.f32 %v9790_v51, %v3413_v9  ;;  %7936 = vpow2.f32 %v3433_v19  ;;  %v9965_v59 = vpop.f32.mrf.mxu0 }
 0xd4c   : > { %v9917_v32 = vpop.eup %7926  ;;  %7938 = vpow2.f32 %v3435_v63 }
 0xd4d   : > { %v2734_v28 = vsel %vm1199_vm3, %v9917_v32, 0.0  ;;  %v3437_v15 = vmul.f32 1.442695, %v3423_v21  ;;  %v9929_v17 = vpop.eup %7928  ;;  %v7312_v48 = vpop.f32.mrf.mxu0 }
 0xd4e   : > { %2735 = vadd.xlane.f32.xlu0 %v2734_v28  ;;  %2738 = vadd.xlane.f32.xlu1 %v2737_v58  ;;  %v3444_v61 = vsel %vm1199_vm3, %v9929_v17, 0.0 }
 0xd4f   : > { %7940 = vpow2.f32 %v3437_v15  ;;  %v4295_v36 = vpop.f32.mrf.mxu0 }
 0xd50   : > { %7942 = vpow2.f32 %v3439_v49  ;;  %v9931_v0 = vpop.eup %7930 }
 0xd51   : > { %v3441_v51 = vsel %vm1199_vm3, %v9931_v0, 0.0  ;;  %v7315_v60 = vpop.f32.mrf.mxu0 }
 0xd52   : > { %3442 = vadd.xlane.f32.xlu0 %v3441_v51  ;;  %3445 = vadd.xlane.f32.xlu1 %v3444_v61 }
 0xd53   : > { %v4305_v1 = vpop.f32.mrf.mxu0 }
 0xd54   : > { %v9933_v35 = vpop.eup %7932 }
 0xd55   : > { %v9935_v62 = vpop.eup %7934  ;;  %v3447_v58 = vsel %vm1199_vm3, %v9933_v35, 0.0  ;;  %v9967_v19 = vpop.f32.mrf.mxu0 }
 0xd56   : > { %v3450_v28 = vsel %vm1199_vm3, %v9935_v62, 0.0  ;;  %3448 = vadd.xlane.f32.xlu0 %v3447_v58 }
 0xd57   : > { %3451 = vadd.xlane.f32.xlu1 %v3450_v28  ;;  %v9969_v63 = vpop.f32.mrf.mxu0 }
 0xd58   : > { %v9941_v30 = vpop.eup %7936 }
 0xd59   : > { %10525 = vst [vmem:[#allocation2_spill] sm:$0xff] %v9941_v30  ;;  %v9947_v6 = vpop.eup %7938  ;;  %v3453_v29 = vsel %vm1199_vm3, %v9941_v30, 0.0  ;;  %v9971_v15 = vpop.f32.mrf.mxu0 }
 0xd5a   : > { %10526 = vst [vmem:[#allocation3_spill] sm:$0xff] %v9947_v6  ;;  %v3456_v20 = vsel %vm1199_vm3, %v9947_v6, 0.0  ;;  %3454 = vadd.xlane.f32.xlu0 %v3453_v29 }
 0xd5b   : > { %3457 = vadd.xlane.f32.xlu1 %v3456_v20  ;;  %v9973_v28 = vpop.f32.mrf.mxu0 }
 0xd5c   : > { %v9949_v56 = vpop.eup %7940 }
 0xd5d   : > { %10527 = vst [vmem:[#allocation4_spill] sm:$0xff] %v9949_v56  ;;  %v9955_v22 = vpop.eup %7942  ;;  %v3459_v47 = vsel %vm1199_vm3, %v9949_v56, 0.0  ;;  %v9975_v20 = vpop.f32.mrf.mxu0 }
 0xd5e   : > { %10528 = vst [vmem:[#allocation5_spill] sm:$0xff] %v9955_v22  ;;  %v3462_v53 = vsel %vm1199_vm3, %v9955_v22, 0.0  ;;  %3460 = vadd.xlane.f32.xlu0 %v3459_v47 }
 0xd5f   : > { %3463 = vadd.xlane.f32.xlu1 %v3462_v53  ;;  %v9977_v53 = vpop.f32.mrf.mxu0 }
 0xd61   : > { %v7327_v30 = vpop.f32.mrf.mxu0 }
 0xd97   : > { %v1250_v52 = vpop.xlane.xlu0 %1249 }
 0xd9b   : > { %v1253_v9 = vpop.xlane.xlu1 %1252  ;;  %v1256_v21 = vpop.xlane.xlu0 %1255 }
 0xd9f   : > { %v1259_v34 = vpop.xlane.xlu1 %1258 }
 0xda3   : > { %v1262_v50 = vpop.xlane.xlu0 %1261 }
 0xda7   : > { %v1265_v51 = vpop.xlane.xlu1 %1264 }
 0xdab   : > { %v1268_v58 = vpop.xlane.xlu0 %1267 }
 0xdaf   : > { %v1271_v29 = vpop.xlane.xlu1 %1270 }
 0xdb3   : > { %v1993_v47 = vpop.xlane.xlu0 %1992 }
 0xdb7   : > { %v1996_v22 = vpop.xlane.xlu1 %1995 }
 0xdbb   : > { %v1999_v6 = vpop.xlane.xlu0 %1998 }
 0xdca   : > { %v3975_v49 = vpop.f32.mrf.mxu1 }
 0xdcb   : > { %7944 = vtanh.f32 %v3975_v49  ;;  %v4345_v49 = vpop.f32.mrf.mxu0 }
 0xdcc   : > { %v7281_v61 = vpop.f32.mrf.mxu1  ;;  %7946 = vrcp.f32 %v1250_v52  ;;  %v2002_v52 = vpop.xlane.xlu1 %2001 }
 0xdcd   : > { %7948 = vrcp.f32 %v1253_v9  ;;  %v9985_v9 = vpop.f32.mrf.mxu0 }
 0xdce   : > { %7950 = vrcp.f32 %v1256_v21 }
 0xdcf   : > { %7952 = vrcp.f32 %v1259_v34 }
 0xdd0   : > { %7954 = vrcp.f32 %v1262_v50 }
 0xdd1   : > { %7956 = vrcp.f32 %v1265_v51 }
 0xdd2   : > { %7958 = vrcp.f32 %v1268_v58 }
 0xdd3   : > { %7960 = vrcp.f32 %v1271_v29 }
 0xdd4   : > { %7962 = vrcp.f32 %v1993_v47 }
 0xdd5   : > { %7964 = vrcp.f32 %v1996_v22 }
 0xdd6   : > { %7966 = vrcp.f32 %v1999_v6 }
 0xdd7   : > { %7968 = vrcp.f32 %v2002_v52 }
 0xdd8   : > { %v7945_v56 = vpop.eup %7944 }
 0xdd9   : > { %7282 = vmatprep.subr.mxu1 %v7945_v56 }
 0xdda   : > { %7283 = vmatpush3.msra.mxu1 %v7945_v56  ;;  %v2005_v56 = vpop.xlane.xlu0 %2004 }
 0xddb   : > { %7285 = vmatmul.mubr.msk.f32.vlgmr.msra.gmra.mxu1 %vm1288_vm1, %v9238_v18  ;;  %7352 = vmatprep.subr.mxu1 %v7315_v60  ;;  %v7947_v18 = vpop.eup %7946  ;;  %7970 = vrcp.f32 %v2005_v56 }
 0xddc   : > { %7287 = vmatprep.mubr.msk.f32.mxu1 %vm1288_vm1, %v9240_v3  ;;  %7353 = vmatpush3.msra.mxu1 %v7315_v60  ;;  %v2008_v3 = vpop.xlane.xlu1 %2007  ;;  %v9991_v60 = vpop.f32.mrf.mxu0 }
 0xddd   : > { %7354 = vmatprep.subr.mxu1 %v4305_v1  ;;  %7972 = vrcp.f32 %v2008_v3 }
 0xdde   : > { %7355 = vmatpush3.msra.mxu1 %v4305_v1 }
 0xddf   : > { %7288 = vmatmul.mubr.msk.f32.gmra.mxu1 %vm1288_vm1, %v9242_v42  ;;  %7356 = vmatprep.subr.mxu1 %v7312_v48  ;;  %v7949_v42 = vpop.eup %7948 }
 0xde0   : > { %7290 = vmatprep.mubr.msk.f32.mxu1 %vm1288_vm1, %v9244_v33  ;;  %7357 = vmatpush3.msra.mxu1 %v7312_v48  ;;  %v9996_v33 = vmul.f32 %v7947_v18, %v9809_v43  ;;  %v7951_v48 = vpop.eup %7950 }
 0xde1   : > { %7358 = vmatprep.subr.mxu1 %v4295_v36  ;;  %v10012_v43 = vmul.f32 %v7951_v48, %v9804_v44 }
 0xde2   : > { %7359 = vmatpush3.msra.mxu1 %v4295_v36  ;;  %v2011_v36 = vpop.xlane.xlu0 %2010 }
 0xde3   : > { %7291 = vmatmul.mubr.msk.f32.gmra.mxu1 %vm1288_vm1, %v9246_v14  ;;  %7360 = vmatprep.subr.mxu1 %v7309_v40  ;;  %v10001_v14 = vmul.f32 %v7949_v42, %v9816_v55  ;;  %v2014_v55 = vpop.xlane.xlu1 %2013  ;;  %7974 = vrcp.f32 %v2011_v36 }
 0xde4   : > { %7293 = vmatprep.mubr.msk.f32.mxu1 %vm1288_vm1, %v9248_v27  ;;  %7361 = vmatpush3.msra.mxu1 %v7309_v40  ;;  %v7953_v27 = vpop.eup %7952  ;;  %v10006_v40 = vpop.f32.mrf.mxu0  ;;  %7976 = vrcp.f32 %v2014_v55 }
 0xde5   : > { %7362 = vmatprep.subr.mxu1 %v9965_v59 }
 0xde6   : > { %7363 = vmatpush3.msra.mxu1 %v9965_v59  ;;  %v7955_v59 = vpop.eup %7954  ;;  %v2718_v22 = vpop.xlane.xlu0 %2717 }
 0xde7   : > { %7294 = vmatmul.mubr.msk.f32.gmra.mxu1 %vm1288_vm1, %v9250_v11  ;;  %7364 = vmatprep.subr.mxu1 %v9957_v26  ;;  %v10019_v11 = vmul.f32 %v7953_v27, %v9821_v45  ;;  %v10021_v6 = vpop.f32.mrf.mxu0  ;;  %v10026_v44 = vmul.f32 %v7955_v59, %v9826_v25  ;;  %v2721_v1 = vpop.xlane.xlu1 %2720  ;;  %7978 = vrcp.f32 %v2718_v22  ;;  %v6449_v59 = vld [vmem:[%s10428_s8 + $0x20] sm:$0xff] }
 0xde8   : > { %7365 = vmatpush3.msra.mxu1 %v9957_v26  ;;  %7368 = vmatprep.mubr.msk.f32.mxu1 %vm1199_vm3, %v9996_v33  ;;  %v7957_v26 = vpop.eup %7956  ;;  %7980 = vrcp.f32 %v2721_v1 }
 0xde9   : > { %7366 = vmatprep.subr.mxu1 %v9963_v41  ;;  %v10032_v45 = vmul.f32 %v7957_v26, %v9831_v10  ;;  %v7336_v21 = vpop.f32.mrf.mxu0 }
 0xdea   : > { %7367 = vmatpush3.msra.mxu1 %v9963_v41  ;;  %v7959_v41 = vpop.eup %7958  ;;  %v2724_v50 = vpop.xlane.xlu0 %2723 }
 0xdeb   : > { %7369 = vmatmul.mubr.msk.f32.vlgmr.msra.gmra.mxu1 %vm1199_vm3, %v10001_v14  ;;  %7380 = vmatprep.subr.mxu1 %v7327_v30  ;;  %v10038_v25 = vmul.f32 %v7959_v41, %v9837_v57  ;;  %v4375_v61 = vpop.f32.mrf.mxu0  ;;  %v2727_v58 = vpop.xlane.xlu1 %2726  ;;  %7982 = vrcp.f32 %v2724_v50 }
 0xdec   : > { %7381 = vmatpush3.msra.mxu1 %v7327_v30  ;;  %7371 = vmatprep.mubr.msk.f32.mxu1 %vm1199_vm3, %v10012_v43  ;;  %v7961_v30 = vpop.eup %7960  ;;  %7984 = vrcp.f32 %v2727_v58 }
 0xded   : > { %7382 = vmatprep.subr.mxu1 %v4345_v49  ;;  %v7963_v34 = vpop.eup %7962  ;;  %v10046_v10 = vmul.f32 %v7961_v30, %v9843_v7  ;;  %v7339_v47 = vpop.f32.mrf.mxu0 }
 0xdee   : > { %7383 = vmatpush3.msra.mxu1 %v4345_v49  ;;  %v7965_v51 = vpop.eup %7964  ;;  %v10052_v57 = vmul.f32 %v7963_v34, %v9849_v37 }
 0xdef   : > { %7372 = vmatmul.mubr.msk.f32.gmra.mxu1 %vm1199_vm3, %v10019_v11  ;;  %7384 = vmatprep.subr.mxu1 %v9975_v20  ;;  %v7967_v29 = vpop.eup %7966  ;;  %v10057_v7 = vmul.f32 %v7965_v51, %v9855_v2  ;;  %v4385_v52 = vpop.f32.mrf.mxu0 }
 0xdf0   : > { %7385 = vmatpush3.msra.mxu1 %v9975_v20  ;;  %7374 = vmatprep.mubr.msk.f32.mxu1 %vm1199_vm3, %v10026_v44  ;;  %v7969_v20 = vpop.eup %7968  ;;  %v10066_v37 = vmul.f32 %v7967_v29, %v9861_v54 }
 0xdf1   : > { %7386 = vmatprep.subr.mxu1 %v9977_v53  ;;  %v7971_v2 = vpop.eup %7970 }
 0xdf2   : > { %7387 = vmatpush3.msra.mxu1 %v9977_v53  ;;  %v7973_v53 = vpop.eup %7972  ;;  %v10078_v54 = vmul.f32 %v7971_v2, %v9878_v16 }
 0xdf3   : > { %7375 = vmatmul.mubr.msk.f32.gmra.mxu1 %vm1199_vm3, %v10032_v45  ;;  %7388 = vmatprep.subr.mxu1 %v9971_v15 }
 0xdf4   : > { %7389 = vmatpush3.msra.mxu1 %v9971_v15  ;;  %7377 = vmatprep.mubr.msk.f32.mxu1 %vm1199_vm3, %v10038_v25  ;;  %v2730_v15 = vpop.xlane.xlu0 %2729 }
 0xdf5   : > { %7390 = vmatprep.subr.mxu1 %v9973_v28  ;;  %7986 = vrcp.f32 %v2730_v15 }
 0xdf6   : > { %7391 = vmatpush3.msra.mxu1 %v9973_v28  ;;  %v2733_v28 = vpop.xlane.xlu1 %2732 }
 0xdf7   : > { %7378 = vmatmul.mubr.msk.f32.gmra.mxu1 %vm1199_vm3, %v10046_v10  ;;  %7392 = vmatprep.subr.mxu1 %v9967_v19  ;;  %7988 = vrcp.f32 %v2733_v28 }
 0xdf8   : > { %7393 = vmatpush3.msra.mxu1 %v9967_v19  ;;  %7396 = vmatprep.mubr.msk.f32.mxu1 %vm1199_vm3, %v10052_v57  ;;  %v10073_v19 = vmul.f32 %v7969_v20, %v9869_v23  ;;  %v2736_v49 = vpop.xlane.xlu0 %2735  ;;  %v10083_v23 = vmul.f32 %v7973_v53, %v9866_v39 }
 0xdf9   : > { %7394 = vmatprep.subr.mxu1 %v9969_v63  ;;  %7990 = vrcp.f32 %v2736_v49 }
 0xdfa   : > { %7395 = vmatpush3.msra.mxu1 %v9969_v63  ;;  %v7975_v63 = vpop.eup %7974  ;;  %v2739_v16 = vpop.xlane.xlu1 %2738 }
 0xdfb   : > { %7397 = vmatmul.mubr.msk.f32.vlgmr.msra.gmra.mxu1 %vm1199_vm3, %v10057_v7  ;;  %7408 = vmatprep.subr.mxu1 %v7339_v47  ;;  %v7977_v56 = vpop.eup %7976  ;;  %v10088_v18 = vmul.f32 %v7975_v63, %v9887_v5  ;;  %7992 = vrcp.f32 %v2739_v16 }
 0xdfc   : > { %7409 = vmatpush3.msra.mxu1 %v7339_v47  ;;  %7399 = vmatprep.mubr.msk.f32.mxu1 %vm1199_vm3, %v10066_v37  ;;  %v7979_v3 = vpop.eup %7978  ;;  %v10094_v39 = vmul.f32 %v7977_v56, %v9873_v4  ;;  %v3443_v22 = vpop.xlane.xlu0 %3442 }
 0xdfd   : > { %7410 = vmatprep.subr.mxu1 %v4385_v52  ;;  %v7981_v42 = vpop.eup %7980  ;;  %v10100_v5 = vmul.f32 %v7979_v3, %v9895_v13  ;;  %7994 = vrcp.f32 %v3443_v22 }
 0xdfe   : > { %7411 = vmatpush3.msra.mxu1 %v4385_v52  ;;  %v7983_v48 = vpop.eup %7982  ;;  %v10105_v36 = vmul.f32 %v7981_v42, %v9882_v12 }
 0xdff   : > { %7400 = vmatmul.mubr.msk.f32.gmra.mxu1 %vm1199_vm3, %v10073_v19  ;;  %7412 = vmatprep.subr.mxu1 %v7336_v21  ;;  %v7985_v4 = vpop.eup %7984  ;;  %v10114_v13 = vmul.f32 %v7983_v48, %v9903_v24 }
 0xe00   : > { %7413 = vmatpush3.msra.mxu1 %v7336_v21  ;;  %7402 = vmatprep.mubr.msk.f32.mxu1 %vm1199_vm3, %v10078_v54  ;;  %v10121_v12 = vmul.f32 %v7985_v4, %v9891_v8 }
 0xe01   : > { %7414 = vmatprep.subr.mxu1 %v4375_v61 }
 0xe02   : > { %7415 = vmatpush3.msra.mxu1 %v4375_v61  ;;  %v7987_v27 = vpop.eup %7986 }
 0xe03   : > { %7403 = vmatmul.mubr.msk.f32.gmra.mxu1 %vm1199_vm3, %v10083_v23  ;;  %7416 = vmatprep.subr.mxu1 %v10006_v40 }
 0xe04   : > { %7417 = vmatpush3.msra.mxu1 %v10006_v40  ;;  %7405 = vmatprep.mubr.msk.f32.mxu1 %vm1199_vm3, %v10088_v18  ;;  %v7989_v40 = vpop.eup %7988 }
 0xe05   : > { %7418 = vmatprep.subr.mxu1 %v10021_v6  ;;  %v10131_v55 = vmul.f32 %v7989_v40, %v9899_v46  ;;  %v6452_v46 = vld [vmem:[%s10428_s8 + $0x38] sm:$0xff] }
 0xe06   : > { %7419 = vmatpush3.msra.mxu1 %v10021_v6  ;;  %v7991_v24 = vpop.eup %7990  ;;  %7464 = vmatprep.subr.mxu0 %v6452_v46 }
 0xe07   : > { %7406 = vmatmul.mubr.msk.f32.gmra.mxu1 %vm1199_vm3, %v10094_v39  ;;  %7420 = vmatprep.subr.mxu1 %v9985_v9  ;;  %v10136_v8 = vmul.f32 %v7991_v24, %v9917_v32  ;;  %v6451_v32 = vld [vmem:[%s10428_s8 + $0x30] sm:$0xff] }
 0xe08   : > { %7421 = vmatpush3.msra.mxu1 %v9985_v9  ;;  %7424 = vmatprep.mubr.msk.f32.mxu1 %vm1199_vm3, %v10100_v5  ;;  %v10126_v9 = vmul.f32 %v7987_v27, %v9911_v38 }
 0xe09   : > { %7422 = vmatprep.subr.mxu1 %v9991_v60  ;;  %7465 = vmatpush3.msra.mxu0 %v6452_v46 }
 0xe0a   : > { %7423 = vmatpush3.msra.mxu1 %v9991_v60  ;;  %v7993_v60 = vpop.eup %7992  ;;  %7466 = vmatprep.subr.mxu0 %v6451_v32 }
 0xe0b   : > { %7425 = vmatmul.mubr.msk.f32.vlgmr.msra.gmra.mxu1 %vm1199_vm3, %v10105_v36  ;;  %v10141_v38 = vmul.f32 %v7993_v60, %v9907_v31  ;;  %7467 = vmatpush3.msra.mxu0 %v6451_v32  ;;  %v6450_v31 = vld [vmem:[%s10428_s8 + $0x28] sm:$0xff]  ;;  %v7995_v26 = vpop.eup %7994 }
 0xe0c   : > { %7427 = vmatprep.mubr.msk.f32.mxu1 %vm1199_vm3, %v10114_v13  ;;  %7468 = vmatprep.subr.mxu0 %v6450_v31  ;;  %v10160_v6 = vmul.f32 %v7995_v26, %v9931_v0 }
 0xe0d   : > { %7469 = vmatpush3.msra.mxu0 %v6450_v31 }
 0xe0e   : > { %7470 = vmatprep.subr.mxu0 %v6449_v59 }
 0xe0f   : > { %7428 = vmatmul.mubr.msk.f32.gmra.mxu1 %vm1199_vm3, %v10121_v12  ;;  %7471 = vmatpush3.msra.mxu0 %v6449_v59 }
 0xe10   : > { %7430 = vmatprep.mubr.msk.f32.mxu1 %vm1199_vm3, %v10126_v9 }
 0xe13   : > { %7431 = vmatmul.mubr.msk.f32.gmra.mxu1 %vm1199_vm3, %v10131_v55 }
 0xe14   : > { %7433 = vmatprep.mubr.msk.f32.mxu1 %vm1199_vm3, %v10136_v8 }
 0xe17   : > { %7434 = vmatmul.mubr.msk.f32.gmra.mxu1 %vm1199_vm3, %v10141_v38 }
 0xe18   : > { %7452 = vmatprep.mubr.msk.f32.mxu1 %vm1199_vm3, %v10160_v6 }
 0xe9b   : > { %v7286_v41 = vpop.f32.mrf.mxu1 }
 0xe9d   : > { %v4070_v1 = vpop.f32.mrf.mxu1 }
 0xe9e   : > { %7340 = vmatprep.mubr.msk.f32.mxu0 %vm480_vm0, %v4070_v1 }
 0xe9f   : > { %v7289_v30 = vpop.f32.mrf.mxu1  ;;  %7341 = vmatmul.mubr.msk.f32.gmra.mxu0 %vm480_vm0, %v7286_v41 }
 0xea1   : > { %v4080_v21 = vpop.f32.mrf.mxu1 }
 0xea2   : > { %7343 = vmatprep.mubr.msk.f32.mxu0 %vm480_vm0, %v4080_v21 }
 0xea3   : > { %v7292_v34 = vpop.f32.mrf.mxu1  ;;  %7344 = vmatmul.mubr.msk.f32.gmra.mxu0 %vm480_vm0, %v7289_v30 }
 0xea5   : > { %v4090_v50 = vpop.f32.mrf.mxu1 }
 0xea6   : > { %7346 = vmatprep.mubr.msk.f32.mxu0 %vm480_vm0, %v4090_v50 }
 0xea7   : > { %v7295_v0 = vpop.f32.mrf.mxu1  ;;  %7347 = vmatmul.mubr.msk.f32.gmra.mxu0 %vm480_vm0, %v7292_v34 }
 0xea9   : > { %v4100_v51 = vpop.f32.mrf.mxu1 }
 0xeaa   : > { %7349 = vmatprep.mubr.msk.f32.mxu0 %vm480_vm0, %v4100_v51 }
 0xeab   : > { %7350 = vmatmul.mubr.msk.f32.gmra.mxu0 %vm480_vm0, %v7295_v0  ;;  %v7370_v61 = vpop.f32.mrf.mxu1 }
 0xeac   : > { %7996 = vtanh.f32 %v7370_v61 }
 0xead   : > { %v4524_v58 = vpop.f32.mrf.mxu1 }
 0xeae   : > { %7998 = vtanh.f32 %v4524_v58 }
 0xeaf   : > { %v7373_v29 = vpop.f32.mrf.mxu1 }
 0xeb0   : > { %8000 = vtanh.f32 %v7373_v29 }
 0xeb1   : > { %v4534_v15 = vpop.f32.mrf.mxu1 }
 0xeb2   : > { %8002 = vtanh.f32 %v4534_v15 }
 0xeb3   : > { %v7376_v20 = vpop.f32.mrf.mxu1 }
 0xeb4   : > { %8004 = vtanh.f32 %v7376_v20 }
 0xeb5   : > { %v4544_v47 = vpop.f32.mrf.mxu1 }
 0xeb6   : > { %8006 = vtanh.f32 %v4544_v47 }
 0xeb7   : > { %v7379_v2 = vpop.f32.mrf.mxu1 }
 0xeb8   : > { %8008 = vtanh.f32 %v7379_v2 }
 0xeb9   : > { %v4554_v28 = vpop.f32.mrf.mxu1  ;;  %v7997_v53 = vpop.eup %7996 }
 0xeba   : > { %8010 = vtanh.f32 %v4554_v28 }
 0xebb   : > { %v7999_v52 = vpop.eup %7998  ;;  %v7398_v63 = vpop.f32.mrf.mxu1 }
 0xebc   : > { %7472 = vmatprep.mubr.msk.f32.mxu0 %vm480_vm0, %v7999_v52  ;;  %8012 = vtanh.f32 %v7398_v63 }
 0xebd   : > { %v4661_v49 = vpop.f32.mrf.mxu1  ;;  %7473 = vmatmul.mubr.msk.f32.vlgmr.msra.gmra.mxu0 %vm480_vm0, %v7997_v53  ;;  %v8001_v56 = vpop.eup %8000 }
 0xebe   : > { %8014 = vtanh.f32 %v4661_v49 }
 0xebf   : > { %v8003_v16 = vpop.eup %8002  ;;  %v7401_v3 = vpop.f32.mrf.mxu1 }
 0xec0   : > { %7475 = vmatprep.mubr.msk.f32.mxu0 %vm480_vm0, %v8003_v16  ;;  %8016 = vtanh.f32 %v7401_v3  ;;  %v3446_v16 = vpop.xlane.xlu1 %3445 }
 0xec1   : > { %v4671_v42 = vpop.f32.mrf.mxu1  ;;  %7476 = vmatmul.mubr.msk.f32.gmra.mxu0 %vm480_vm0, %v8001_v56  ;;  %v8005_v48 = vpop.eup %8004 }
 0xec2   : > { %8018 = vtanh.f32 %v4671_v42 }
 0xec3   : > { %v8007_v4 = vpop.eup %8006  ;;  %v7404_v27 = vpop.f32.mrf.mxu1 }
 0xec4   : > { %7478 = vmatprep.mubr.msk.f32.mxu0 %vm480_vm0, %v8007_v4  ;;  %8020 = vtanh.f32 %v7404_v27  ;;  %v3452_v27 = vpop.xlane.xlu1 %3451 }
 0xec5   : > { %v4681_v40 = vpop.f32.mrf.mxu1  ;;  %7479 = vmatmul.mubr.msk.f32.gmra.mxu0 %vm480_vm0, %v8005_v48  ;;  %v8009_v24 = vpop.eup %8008 }
 0xec6   : > { %8022 = vtanh.f32 %v4681_v40  ;;  %v3449_v48 = vpop.xlane.xlu0 %3448 }
 0xec7   : > { %v8011_v60 = vpop.eup %8010  ;;  %v7407_v46 = vpop.f32.mrf.mxu1 }
 0xec8   : > { %7481 = vmatprep.mubr.msk.f32.mxu0 %vm480_vm0, %v8011_v60  ;;  %8024 = vtanh.f32 %v7407_v46 }
 0xec9   : > { %v4691_v32 = vpop.f32.mrf.mxu1  ;;  %7482 = vmatmul.mubr.msk.f32.gmra.mxu0 %vm480_vm0, %v8009_v24  ;;  %v8013_v31 = vpop.eup %8012 }
 0xeca   : > { %8026 = vtanh.f32 %v4691_v32  ;;  %v3455_v60 = vpop.xlane.xlu0 %3454  ;;  %v3458_v32 = vpop.xlane.xlu1 %3457 }
 0xecb   : > { %v8015_v59 = vpop.eup %8014  ;;  %v7426_v22 = vpop.f32.mrf.mxu1 }
 0xecc   : > { %7484 = vmatprep.mubr.msk.f32.mxu0 %vm480_vm0, %v8015_v59  ;;  %8028 = vtanh.f32 %v7426_v22 }
 0xecd   : > { %v4798_v26 = vpop.f32.mrf.mxu1  ;;  %7485 = vmatmul.mubr.msk.f32.gmra.mxu0 %vm480_vm0, %v8013_v31  ;;  %v8017_v41 = vpop.eup %8016 }
 0xece   : > { %8030 = vtanh.f32 %v4798_v26  ;;  %v3461_v59 = vpop.xlane.xlu0 %3460  ;;  %v3464_v22 = vpop.xlane.xlu1 %3463 }
 0xecf   : > { %v8019_v1 = vpop.eup %8018  ;;  %v7429_v30 = vpop.f32.mrf.mxu1 }
 0xed0   : > { %7487 = vmatprep.mubr.msk.f32.mxu0 %vm480_vm0, %v8019_v1  ;;  %8032 = vtanh.f32 %v7429_v30 }
 0xed1   : > { %v4808_v21 = vpop.f32.mrf.mxu1  ;;  %7488 = vmatmul.mubr.msk.f32.gmra.mxu0 %vm480_vm0, %v8017_v41  ;;  %v8021_v34 = vpop.eup %8020 }
 0xed2   : > { %8034 = vtanh.f32 %v4808_v21 }
 0xed3   : > { %v8023_v50 = vpop.eup %8022  ;;  %v7432_v0 = vpop.f32.mrf.mxu1 }
 0xed4   : > { %7490 = vmatprep.mubr.msk.f32.mxu0 %vm480_vm0, %v8023_v50  ;;  %8036 = vtanh.f32 %v7432_v0 }
 0xed5   : > { %v4818_v51 = vpop.f32.mrf.mxu1  ;;  %7491 = vmatmul.mubr.msk.f32.gmra.mxu0 %vm480_vm0, %v8021_v34  ;;  %v8025_v61 = vpop.eup %8024 }
 0xed6   : > { %8038 = vtanh.f32 %v4818_v51 }
 0xed7   : > { %v8027_v58 = vpop.eup %8026  ;;  %v7435_v29 = vpop.f32.mrf.mxu1 }
 0xed8   : > { %7493 = vmatprep.mubr.msk.f32.mxu0 %vm480_vm0, %v8027_v58  ;;  %8040 = vtanh.f32 %v7435_v29 }
 0xed9   : > { %v4828_v15 = vpop.f32.mrf.mxu1  ;;  %7494 = vmatmul.mubr.msk.f32.gmra.mxu0 %vm480_vm0, %v8025_v61  ;;  %v8029_v20 = vpop.eup %8028  ;;  %v10529_v61 = vld [vmem:[#allocation2_spill] sm:$0xff] }
 0xeda   : > { %8042 = vtanh.f32 %v4828_v15  ;;  %v10530_v15 = vld [vmem:[#allocation3_spill] sm:$0xff] }
 0xedb   : > { %v8031_v47 = vpop.eup %8030  ;;  %8044 = vrcp.f32 %v3446_v16 }
 0xedc   : > { %7496 = vmatprep.mubr.msk.f32.mxu0 %vm480_vm0, %v8031_v47  ;;  %8046 = vrcp.f32 %v3449_v48 }
 0xedd   : > { %7497 = vmatmul.mubr.msk.f32.gmra.mxu0 %vm480_vm0, %v8029_v20  ;;  %v8033_v2 = vpop.eup %8032  ;;  %8048 = vrcp.f32 %v3452_v27 }
 0xede   : > { %8050 = vrcp.f32 %v3455_v60 }
 0xedf   : > { %v8035_v28 = vpop.eup %8034  ;;  %8052 = vrcp.f32 %v3458_v32 }
 0xee0   : > { %7499 = vmatprep.mubr.msk.f32.mxu0 %vm480_vm0, %v8035_v28  ;;  %8054 = vrcp.f32 %v3461_v59 }
 0xee1   : > { %7500 = vmatmul.mubr.msk.f32.gmra.mxu0 %vm480_vm0, %v8033_v2  ;;  %v8037_v53 = vpop.eup %8036  ;;  %8056 = vrcp.f32 %v3464_v22 }
 0xee3   : > { %v8039_v52 = vpop.eup %8038 }
 0xee4   : > { %7502 = vmatprep.mubr.msk.f32.mxu0 %vm480_vm0, %v8039_v52  ;;  %v10532_v52 = vld [vmem:[#allocation5_spill] sm:$0xff] }
 0xee5   : > { %7503 = vmatmul.mubr.msk.f32.gmra.mxu0 %vm480_vm0, %v8037_v53  ;;  %v8041_v63 = vpop.eup %8040 }
 0xee7   : > { %v8043_v49 = vpop.eup %8042 }
 0xee8   : > { %7505 = vmatprep.mubr.msk.f32.mxu0 %vm480_vm0, %v8043_v49  ;;  %v8045_v26 = vpop.eup %8044 }
 0xee9   : > { %7506 = vmatmul.mubr.msk.f32.gmra.mxu0 %vm480_vm0, %v8041_v63  ;;  %v8047_v41 = vpop.eup %8046  ;;  %v10197_v1 = vmul.f32 %v8045_v26, %v9929_v17 }
 0xeea   : > { %v8049_v30 = vpop.eup %8048  ;;  %v10200_v21 = vmul.f32 %v8047_v41, %v9933_v35 }
 0xeeb   : > { %v8051_v34 = vpop.eup %8050  ;;  %v10207_v0 = vmul.f32 %v8049_v30, %v9935_v62  ;;  %v10531_v62 = vld [vmem:[#allocation4_spill] sm:$0xff] }
 0xeec   : > { %v8053_v51 = vpop.eup %8052  ;;  %v10210_v58 = vmul.f32 %v8051_v34, %v10529_v61 }
 0xeed   : > { %v8055_v29 = vpop.eup %8054  ;;  %v10217_v20 = vmul.f32 %v8053_v51, %v10530_v15 }
 0xeee   : > { %v8057_v47 = vpop.eup %8056  ;;  %v10220_v28 = vmul.f32 %v8055_v29, %v10531_v62 }
 0xeef   : > { %v10227_v63 = vmul.f32 %v8057_v47, %v10532_v52 }
 0xf5f   : > { %v7342_v56 = vpop.f32.mrf.mxu0 }
 0xf61   : > { %v4395_v3 = vpop.f32.mrf.mxu0 }
 0xf63   : > { %v7345_v42 = vpop.f32.mrf.mxu0 }
 0xf65   : > { %v4405_v4 = vpop.f32.mrf.mxu0 }
 0xf67   : > { %v7348_v40 = vpop.f32.mrf.mxu0 }
 0xf69   : > { %v4415_v24 = vpop.f32.mrf.mxu0 }
 0xf6b   : > { %v7351_v46 = vpop.f32.mrf.mxu0 }
 0xf6c   : > { %7436 = vmatprep.subr.mxu1 %v7351_v46 }
 0xf6d   : > { %v4425_v31 = vpop.f32.mrf.mxu0  ;;  %7437 = vmatpush3.msra.mxu1 %v7351_v46 }
 0xf6e   : > { %7438 = vmatprep.subr.mxu1 %v4425_v31 }
 0xf6f   : > { %7439 = vmatpush3.msra.mxu1 %v4425_v31 }
 0xf70   : > { %7440 = vmatprep.subr.mxu1 %v7348_v40 }
 0xf71   : > { %7441 = vmatpush3.msra.mxu1 %v7348_v40 }
 0xf72   : > { %7442 = vmatprep.subr.mxu1 %v4415_v24 }
 0xf73   : > { %7443 = vmatpush3.msra.mxu1 %v4415_v24 }
 0xf74   : > { %7444 = vmatprep.subr.mxu1 %v7345_v42 }
 0xf75   : > { %7445 = vmatpush3.msra.mxu1 %v7345_v42 }
 0xf76   : > { %7446 = vmatprep.subr.mxu1 %v4405_v4 }
 0xf77   : > { %7447 = vmatpush3.msra.mxu1 %v4405_v4 }
 0xf78   : > { %7448 = vmatprep.subr.mxu1 %v7342_v56 }
 0xf79   : > { %7449 = vmatpush3.msra.mxu1 %v7342_v56 }
 0xf7a   : > { %7450 = vmatprep.subr.mxu1 %v4395_v3 }
 0xf7b   : > { %7451 = vmatpush3.msra.mxu1 %v4395_v3 }
 0xf7c   : > { %7453 = vmatmul.mubr.msk.f32.vlgmr.msra.gmra.mxu1 %vm1199_vm3, %v10197_v1 }
 0xf7d   : > { %7455 = vmatprep.mubr.msk.f32.mxu1 %vm1199_vm3, %v10200_v21  ;;  %v7474_v50 = vpop.f32.mrf.mxu0 }
 0xf7f   : > { %v5149_v17 = vpop.f32.mrf.mxu0 }
 0xf80   : > { %7456 = vmatmul.mubr.msk.f32.gmra.mxu1 %vm1199_vm3, %v10207_v0 }
 0xf81   : > { %7458 = vmatprep.mubr.msk.f32.mxu1 %vm1199_vm3, %v10210_v58  ;;  %v7477_v35 = vpop.f32.mrf.mxu0 }
 0xf83   : > { %v5159_v2 = vpop.f32.mrf.mxu0 }
 0xf84   : > { %7459 = vmatmul.mubr.msk.f32.gmra.mxu1 %vm1199_vm3, %v10217_v20 }
 0xf85   : > { %7461 = vmatprep.mubr.msk.f32.mxu1 %vm1199_vm3, %v10220_v28  ;;  %v7480_v53 = vpop.f32.mrf.mxu0 }
 0xf87   : > { %v5169_v49 = vpop.f32.mrf.mxu0 }
 0xf88   : > { %7462 = vmatmul.mubr.msk.f32.gmra.mxu1 %vm1199_vm3, %v10227_v63 }
 0xf89   : > { %v7483_v56 = vpop.f32.mrf.mxu0  ;;  %7536 = vmatprep.mubr.msk.f32.mxu1 %vm1199_vm3, %v9996_v33 }
 0xf8a   : > { %7520 = vmatprep.subr.mxu1 %v7483_v56 }
 0xf8b   : > { %v5179_v16 = vpop.f32.mrf.mxu0  ;;  %7521 = vmatpush3.msra.mxu1 %v7483_v56 }
 0xf8c   : > { %7522 = vmatprep.subr.mxu1 %v5179_v16 }
 0xf8d   : > { %v7486_v3 = vpop.f32.mrf.mxu0  ;;  %7523 = vmatpush3.msra.mxu1 %v5179_v16 }
 0xf8e   : > { %7524 = vmatprep.subr.mxu1 %v7480_v53 }
 0xf8f   : > { %v5189_v42 = vpop.f32.mrf.mxu0  ;;  %7525 = vmatpush3.msra.mxu1 %v7480_v53 }
 0xf90   : > { %7526 = vmatprep.subr.mxu1 %v5169_v49 }
 0xf91   : > { %v7489_v48 = vpop.f32.mrf.mxu0  ;;  %7527 = vmatpush3.msra.mxu1 %v5169_v49 }
 0xf92   : > { %7528 = vmatprep.subr.mxu1 %v7477_v35 }
 0xf93   : > { %v5199_v4 = vpop.f32.mrf.mxu0  ;;  %7529 = vmatpush3.msra.mxu1 %v7477_v35 }
 0xf94   : > { %7530 = vmatprep.subr.mxu1 %v5159_v2 }
 0xf95   : > { %v7492_v27 = vpop.f32.mrf.mxu0  ;;  %7531 = vmatpush3.msra.mxu1 %v5159_v2 }
 0xf96   : > { %7532 = vmatprep.subr.mxu1 %v7474_v50 }
 0xf97   : > { %v5209_v33 = vpop.f32.mrf.mxu0  ;;  %7533 = vmatpush3.msra.mxu1 %v7474_v50 }
 0xf98   : > { %7534 = vmatprep.subr.mxu1 %v5149_v17 }
 0xf99   : > { %v7495_v40 = vpop.f32.mrf.mxu0  ;;  %7535 = vmatpush3.msra.mxu1 %v5149_v17 }
 0xf9a   : > { %7537 = vmatmul.mubr.msk.f32.vlgmr.msra.gmra.mxu1 %vm1199_vm3, %v10001_v14  ;;  %7548 = vmatprep.subr.mxu1 %v7495_v40 }
 0xf9b   : > { %v5219_v24 = vpop.f32.mrf.mxu0  ;;  %7539 = vmatprep.mubr.msk.f32.mxu1 %vm1199_vm3, %v10012_v43  ;;  %7549 = vmatpush3.msra.mxu1 %v7495_v40 }
 0xf9c   : > { %7550 = vmatprep.subr.mxu1 %v5219_v24 }
 0xf9d   : > { %v7498_v60 = vpop.f32.mrf.mxu0  ;;  %7551 = vmatpush3.msra.mxu1 %v5219_v24 }
 0xf9e   : > { %7540 = vmatmul.mubr.msk.f32.gmra.mxu1 %vm1199_vm3, %v10019_v11  ;;  %7552 = vmatprep.subr.mxu1 %v7492_v27 }
 0xf9f   : > { %v5229_v46 = vpop.f32.mrf.mxu0  ;;  %7542 = vmatprep.mubr.msk.f32.mxu1 %vm1199_vm3, %v10026_v44  ;;  %7553 = vmatpush3.msra.mxu1 %v7492_v27 }
 0xfa0   : > { %7554 = vmatprep.subr.mxu1 %v5209_v33 }
 0xfa1   : > { %v7501_v14 = vpop.f32.mrf.mxu0  ;;  %7555 = vmatpush3.msra.mxu1 %v5209_v33 }
 0xfa2   : > { %7543 = vmatmul.mubr.msk.f32.gmra.mxu1 %vm1199_vm3, %v10032_v45  ;;  %7556 = vmatprep.subr.mxu1 %v7489_v48 }
 0xfa3   : > { %v5239_v43 = vpop.f32.mrf.mxu0  ;;  %7545 = vmatprep.mubr.msk.f32.mxu1 %vm1199_vm3, %v10038_v25  ;;  %7557 = vmatpush3.msra.mxu1 %v7489_v48 }
 0xfa4   : > { %7558 = vmatprep.subr.mxu1 %v5199_v4 }
 0xfa5   : > { %v7504_v11 = vpop.f32.mrf.mxu0  ;;  %7559 = vmatpush3.msra.mxu1 %v5199_v4 }
 0xfa6   : > { %7546 = vmatmul.mubr.msk.f32.gmra.mxu1 %vm1199_vm3, %v10046_v10  ;;  %7560 = vmatprep.subr.mxu1 %v7486_v3  ;;  %v5763_v10 = vld [vmem:[%s10429_s9 + $0x18] sm:$0xff] }
 0xfa7   : > { %v5249_v44 = vpop.f32.mrf.mxu0  ;;  %7561 = vmatpush3.msra.mxu1 %v7486_v3  ;;  %7564 = vmatprep.mubr.msk.f32.mxu1 %vm1199_vm3, %v10052_v57  ;;  %v5762_v57 = vld [vmem:[%s10429_s9 + $0x10] sm:$0xff] }
 0xfa8   : > { %7562 = vmatprep.subr.mxu1 %v5189_v42  ;;  %7632 = vmatprep.subr.mxu0 %v5763_v10 }
 0xfa9   : > { %v7507_v45 = vpop.f32.mrf.mxu0  ;;  %7563 = vmatpush3.msra.mxu1 %v5189_v42  ;;  %7633 = vmatpush3.msra.mxu0 %v5763_v10 }
 0xfaa   : > { %7565 = vmatmul.mubr.msk.f32.vlgmr.msra.gmra.mxu1 %vm1199_vm3, %v10057_v7  ;;  %7576 = vmatprep.subr.mxu1 %v7507_v45  ;;  %v5761_v7 = vld [vmem:[%s10429_s9 + $0x8] sm:$0xff] }
 0xfab   : > { %v5259_v25 = vpop.f32.mrf.mxu0  ;;  %7567 = vmatprep.mubr.msk.f32.mxu1 %vm1199_vm3, %v10066_v37  ;;  %7577 = vmatpush3.msra.mxu1 %v7507_v45  ;;  %v5760_v37 = vld [vmem:[%s10429_s9] sm:$0xff] }
 0xfac   : > { %7578 = vmatprep.subr.mxu1 %v5259_v25  ;;  %7634 = vmatprep.subr.mxu0 %v5762_v57 }
 0xfad   : > { %7579 = vmatpush3.msra.mxu1 %v5259_v25  ;;  %7635 = vmatpush3.msra.mxu0 %v5762_v57 }
 0xfae   : > { %7568 = vmatmul.mubr.msk.f32.gmra.mxu1 %vm1199_vm3, %v10073_v19  ;;  %7580 = vmatprep.subr.mxu1 %v7504_v11 }
 0xfaf   : > { %7570 = vmatprep.mubr.msk.f32.mxu1 %vm1199_vm3, %v10078_v54  ;;  %7581 = vmatpush3.msra.mxu1 %v7504_v11 }
 0xfb0   : > { %7582 = vmatprep.subr.mxu1 %v5249_v44  ;;  %7636 = vmatprep.subr.mxu0 %v5761_v7 }
 0xfb1   : > { %7583 = vmatpush3.msra.mxu1 %v5249_v44  ;;  %7637 = vmatpush3.msra.mxu0 %v5761_v7 }
 0xfb2   : > { %7571 = vmatmul.mubr.msk.f32.gmra.mxu1 %vm1199_vm3, %v10083_v23  ;;  %7584 = vmatprep.subr.mxu1 %v7501_v14 }
 0xfb3   : > { %7573 = vmatprep.mubr.msk.f32.mxu1 %vm1199_vm3, %v10088_v18  ;;  %7585 = vmatpush3.msra.mxu1 %v7501_v14 }
 0xfb4   : > { %7586 = vmatprep.subr.mxu1 %v5239_v43  ;;  %7638 = vmatprep.subr.mxu0 %v5760_v37 }
 0xfb5   : > { %7587 = vmatpush3.msra.mxu1 %v5239_v43  ;;  %7639 = vmatpush3.msra.mxu0 %v5760_v37 }
 0xfb6   : > { %7574 = vmatmul.mubr.msk.f32.gmra.mxu1 %vm1199_vm3, %v10094_v39  ;;  %7588 = vmatprep.subr.mxu1 %v7498_v60 }
 0xfb7   : > { %7589 = vmatpush3.msra.mxu1 %v7498_v60  ;;  %7592 = vmatprep.mubr.msk.f32.mxu1 %vm1199_vm3, %v10100_v5 }
 0xfb8   : > { %7590 = vmatprep.subr.mxu1 %v5229_v46 }
 0xfb9   : > { %7591 = vmatpush3.msra.mxu1 %v5229_v46 }
 0xfba   : > { %7593 = vmatmul.mubr.msk.f32.vlgmr.msra.gmra.mxu1 %vm1199_vm3, %v10105_v36 }
 0xfbb   : > { %7595 = vmatprep.mubr.msk.f32.mxu1 %vm1199_vm3, %v10114_v13 }
 0xfbe   : > { %7596 = vmatmul.mubr.msk.f32.gmra.mxu1 %vm1199_vm3, %v10121_v12 }
 0xfbf   : > { %7598 = vmatprep.mubr.msk.f32.mxu1 %vm1199_vm3, %v10126_v9 }
 0xfc2   : > { %7599 = vmatmul.mubr.msk.f32.gmra.mxu1 %vm1199_vm3, %v10131_v55 }
 0xfc3   : > { %7601 = vmatprep.mubr.msk.f32.mxu1 %vm1199_vm3, %v10136_v8 }
 0xfc6   : > { %7602 = vmatmul.mubr.msk.f32.gmra.mxu1 %vm1199_vm3, %v10141_v38 }
 0xfc7   : > { %7620 = vmatprep.mubr.msk.f32.mxu1 %vm1199_vm3, %v10160_v6 }
0x103c   : > { %v7454_v19 = vpop.f32.mrf.mxu1 }
0x103e   : > { %v4935_v54 = vpop.f32.mrf.mxu1 }
0x103f   : > { %8058 = vtanh.f32 %v4935_v54 }
0x1040   : > { %8060 = vtanh.f32 %v7454_v19  ;;  %v7457_v23 = vpop.f32.mrf.mxu1 }
0x1042   : > { %v4945_v18 = vpop.f32.mrf.mxu1 }
0x1043   : > { %8062 = vtanh.f32 %v4945_v18 }
0x1044   : > { %8064 = vtanh.f32 %v7457_v23  ;;  %v7460_v39 = vpop.f32.mrf.mxu1 }
0x1046   : > { %v4955_v5 = vpop.f32.mrf.mxu1 }
0x1047   : > { %8066 = vtanh.f32 %v4955_v5 }
0x1048   : > { %8068 = vtanh.f32 %v7460_v39  ;;  %v7463_v36 = vpop.f32.mrf.mxu1 }
0x104a   : > { %v4965_v13 = vpop.f32.mrf.mxu1 }
0x104b   : > { %8070 = vtanh.f32 %v4965_v13 }
0x104c   : > { %v8059_v12 = vpop.eup %8058  ;;  %8072 = vtanh.f32 %v7463_v36 }
0x104d   : > { %v8061_v9 = vpop.eup %8060  ;;  %7508 = vmatprep.mubr.msk.f32.mxu0 %vm480_vm0, %v8059_v12 }
0x104e   : > { %7509 = vmatmul.mubr.msk.f32.gmra.mxu0 %vm480_vm0, %v8061_v9 }
0x1050   : > { %v8063_v55 = vpop.eup %8062 }
0x1051   : > { %v8065_v8 = vpop.eup %8064  ;;  %7511 = vmatprep.mubr.msk.f32.mxu0 %vm480_vm0, %v8063_v55 }
0x1052   : > { %7512 = vmatmul.mubr.msk.f32.gmra.mxu0 %vm480_vm0, %v8065_v8 }
0x1054   : > { %v8067_v38 = vpop.eup %8066 }
0x1055   : > { %v8069_v6 = vpop.eup %8068  ;;  %7514 = vmatprep.mubr.msk.f32.mxu0 %vm480_vm0, %v8067_v38 }
0x1056   : > { %7515 = vmatmul.mubr.msk.f32.gmra.mxu0 %vm480_vm0, %v8069_v6 }
0x1058   : > { %v8071_v32 = vpop.eup %8070 }
0x1059   : > { %v8073_v31 = vpop.eup %8072  ;;  %7517 = vmatprep.mubr.msk.f32.mxu0 %vm480_vm0, %v8071_v32 }
0x105a   : > { %7518 = vmatmul.mubr.msk.f32.gmra.mxu0 %vm480_vm0, %v8073_v31  ;;  %v7538_v59 = vpop.f32.mrf.mxu1 }
0x105c   : > { %v5374_v22 = vpop.f32.mrf.mxu1 }
0x105d   : > { %8074 = vtanh.f32 %v5374_v22 }
0x105e   : > { %8076 = vtanh.f32 %v7538_v59  ;;  %v7541_v26 = vpop.f32.mrf.mxu1 }
0x1060   : > { %v5384_v41 = vpop.f32.mrf.mxu1 }
0x1061   : > { %8078 = vtanh.f32 %v5384_v41 }
0x1062   : > { %8080 = vtanh.f32 %v7541_v26  ;;  %v7544_v30 = vpop.f32.mrf.mxu1 }
0x1064   : > { %v5394_v34 = vpop.f32.mrf.mxu1 }
0x1065   : > { %8082 = vtanh.f32 %v5394_v34 }
0x1066   : > { %8084 = vtanh.f32 %v7544_v30  ;;  %v7547_v50 = vpop.f32.mrf.mxu1 }
0x1068   : > { %v5404_v51 = vpop.f32.mrf.mxu1 }
0x1069   : > { %8086 = vtanh.f32 %v5404_v51 }
0x106a   : > { %v8075_v17 = vpop.eup %8074  ;;  %8088 = vtanh.f32 %v7547_v50  ;;  %v7566_v61 = vpop.f32.mrf.mxu1 }
0x106b   : > { %v8077_v29 = vpop.eup %8076  ;;  %7640 = vmatprep.mubr.msk.f32.mxu0 %vm480_vm0, %v8075_v17 }
0x106c   : > { %v5487_v35 = vpop.f32.mrf.mxu1  ;;  %7641 = vmatmul.mubr.msk.f32.vlgmr.msra.gmra.mxu0 %vm480_vm0, %v8077_v29 }
0x106d   : > { %8090 = vtanh.f32 %v5487_v35 }
0x106e   : > { %v8079_v15 = vpop.eup %8078  ;;  %8092 = vtanh.f32 %v7566_v61  ;;  %v7569_v47 = vpop.f32.mrf.mxu1 }
0x106f   : > { %v8081_v2 = vpop.eup %8080  ;;  %7643 = vmatprep.mubr.msk.f32.mxu0 %vm480_vm0, %v8079_v15 }
0x1070   : > { %v5497_v62 = vpop.f32.mrf.mxu1  ;;  %7644 = vmatmul.mubr.msk.f32.gmra.mxu0 %vm480_vm0, %v8081_v2 }
0x1071   : > { %8094 = vtanh.f32 %v5497_v62 }
0x1072   : > { %v8083_v53 = vpop.eup %8082  ;;  %8096 = vtanh.f32 %v7569_v47  ;;  %v7572_v52 = vpop.f32.mrf.mxu1 }
0x1073   : > { %v8085_v49 = vpop.eup %8084  ;;  %7646 = vmatprep.mubr.msk.f32.mxu0 %vm480_vm0, %v8083_v53 }
0x1074   : > { %v5507_v56 = vpop.f32.mrf.mxu1  ;;  %7647 = vmatmul.mubr.msk.f32.gmra.mxu0 %vm480_vm0, %v8085_v49 }
0x1075   : > { %8098 = vtanh.f32 %v5507_v56 }
0x1076   : > { %v8087_v16 = vpop.eup %8086  ;;  %8100 = vtanh.f32 %v7572_v52  ;;  %v7575_v3 = vpop.f32.mrf.mxu1 }
0x1077   : > { %v8089_v42 = vpop.eup %8088  ;;  %7649 = vmatprep.mubr.msk.f32.mxu0 %vm480_vm0, %v8087_v16 }
0x1078   : > { %v5517_v48 = vpop.f32.mrf.mxu1  ;;  %7650 = vmatmul.mubr.msk.f32.gmra.mxu0 %vm480_vm0, %v8089_v42 }
0x1079   : > { %8102 = vtanh.f32 %v5517_v48 }
0x107a   : > { %v8091_v4 = vpop.eup %8090  ;;  %8104 = vtanh.f32 %v7575_v3  ;;  %v7594_v27 = vpop.f32.mrf.mxu1 }
0x107b   : > { %v8093_v33 = vpop.eup %8092  ;;  %7652 = vmatprep.mubr.msk.f32.mxu0 %vm480_vm0, %v8091_v4 }
0x107c   : > { %v5600_v40 = vpop.f32.mrf.mxu1  ;;  %7653 = vmatmul.mubr.msk.f32.gmra.mxu0 %vm480_vm0, %v8093_v33 }
0x107d   : > { %8106 = vtanh.f32 %v5600_v40 }
0x107e   : > { %v8095_v24 = vpop.eup %8094  ;;  %8108 = vtanh.f32 %v7594_v27  ;;  %v7597_v60 = vpop.f32.mrf.mxu1 }
0x107f   : > { %v8097_v46 = vpop.eup %8096  ;;  %7655 = vmatprep.mubr.msk.f32.mxu0 %vm480_vm0, %v8095_v24 }
0x1080   : > { %v5610_v14 = vpop.f32.mrf.mxu1  ;;  %7656 = vmatmul.mubr.msk.f32.gmra.mxu0 %vm480_vm0, %v8097_v46 }
0x1081   : > { %8110 = vtanh.f32 %v5610_v14 }
0x1082   : > { %v8099_v43 = vpop.eup %8098  ;;  %8112 = vtanh.f32 %v7597_v60  ;;  %v7600_v11 = vpop.f32.mrf.mxu1 }
0x1083   : > { %v8101_v44 = vpop.eup %8100  ;;  %7658 = vmatprep.mubr.msk.f32.mxu0 %vm480_vm0, %v8099_v43 }
0x1084   : > { %v5620_v45 = vpop.f32.mrf.mxu1  ;;  %7659 = vmatmul.mubr.msk.f32.gmra.mxu0 %vm480_vm0, %v8101_v44 }
0x1085   : > { %8114 = vtanh.f32 %v5620_v45 }
0x1086   : > { %v8103_v25 = vpop.eup %8102  ;;  %8116 = vtanh.f32 %v7600_v11  ;;  %v7603_v10 = vpop.f32.mrf.mxu1 }
0x1087   : > { %v8105_v57 = vpop.eup %8104  ;;  %7661 = vmatprep.mubr.msk.f32.mxu0 %vm480_vm0, %v8103_v25 }
0x1088   : > { %v5630_v7 = vpop.f32.mrf.mxu1  ;;  %7662 = vmatmul.mubr.msk.f32.gmra.mxu0 %vm480_vm0, %v8105_v57 }
0x1089   : > { %8118 = vtanh.f32 %v5630_v7 }
0x108a   : > { %v8107_v37 = vpop.eup %8106  ;;  %8120 = vtanh.f32 %v7603_v10 }
0x108b   : > { %v8109_v19 = vpop.eup %8108  ;;  %7664 = vmatprep.mubr.msk.f32.mxu0 %vm480_vm0, %v8107_v37 }
0x108c   : > { %7665 = vmatmul.mubr.msk.f32.gmra.mxu0 %vm480_vm0, %v8109_v19 }
0x108e   : > { %v8111_v54 = vpop.eup %8110 }
0x108f   : > { %v8113_v23 = vpop.eup %8112  ;;  %7667 = vmatprep.mubr.msk.f32.mxu0 %vm480_vm0, %v8111_v54 }
0x1090   : > { %7668 = vmatmul.mubr.msk.f32.gmra.mxu0 %vm480_vm0, %v8113_v23 }
0x1092   : > { %v8115_v18 = vpop.eup %8114 }
0x1093   : > { %v8117_v39 = vpop.eup %8116  ;;  %7670 = vmatprep.mubr.msk.f32.mxu0 %vm480_vm0, %v8115_v18 }
0x1094   : > { %7671 = vmatmul.mubr.msk.f32.gmra.mxu0 %vm480_vm0, %v8117_v39 }
0x1096   : > { %v8119_v5 = vpop.eup %8118 }
0x1097   : > { %v8121_v36 = vpop.eup %8120  ;;  %7673 = vmatprep.mubr.msk.f32.mxu0 %vm480_vm0, %v8119_v5 }
0x1098   : > { %7674 = vmatmul.mubr.msk.f32.gmra.mxu0 %vm480_vm0, %v8121_v36 }
0x110e   : > { %v7510_v13 = vpop.f32.mrf.mxu0 }
0x1110   : > { %v5269_v12 = vpop.f32.mrf.mxu0 }
0x1112   : > { %v7513_v9 = vpop.f32.mrf.mxu0 }
0x1114   : > { %v5279_v55 = vpop.f32.mrf.mxu0 }
0x1116   : > { %v7516_v8 = vpop.f32.mrf.mxu0 }
0x1118   : > { %v5289_v38 = vpop.f32.mrf.mxu0 }
0x111a   : > { %v7519_v6 = vpop.f32.mrf.mxu0 }
0x111b   : > { %7604 = vmatprep.subr.mxu1 %v7519_v6 }
0x111c   : > { %v5299_v32 = vpop.f32.mrf.mxu0  ;;  %7605 = vmatpush3.msra.mxu1 %v7519_v6 }
0x111d   : > { %7606 = vmatprep.subr.mxu1 %v5299_v32 }
0x111e   : > { %7607 = vmatpush3.msra.mxu1 %v5299_v32 }
0x111f   : > { %7608 = vmatprep.subr.mxu1 %v7516_v8 }
0x1120   : > { %7609 = vmatpush3.msra.mxu1 %v7516_v8 }
0x1121   : > { %7610 = vmatprep.subr.mxu1 %v5289_v38 }
0x1122   : > { %7611 = vmatpush3.msra.mxu1 %v5289_v38 }
0x1123   : > { %7612 = vmatprep.subr.mxu1 %v7513_v9 }
0x1124   : > { %7613 = vmatpush3.msra.mxu1 %v7513_v9 }
0x1125   : > { %7614 = vmatprep.subr.mxu1 %v5279_v55 }
0x1126   : > { %7615 = vmatpush3.msra.mxu1 %v5279_v55 }
0x1127   : > { %7616 = vmatprep.subr.mxu1 %v7510_v13 }
0x1128   : > { %7617 = vmatpush3.msra.mxu1 %v7510_v13 }
0x1129   : > { %7618 = vmatprep.subr.mxu1 %v5269_v12 }
0x112a   : > { %7619 = vmatpush3.msra.mxu1 %v5269_v12 }
0x112b   : > { %7621 = vmatmul.mubr.msk.f32.vlgmr.msra.gmra.mxu1 %vm1199_vm3, %v10197_v1 }
0x112c   : > { %7623 = vmatprep.mubr.msk.f32.mxu1 %vm1199_vm3, %v10200_v21  ;;  %v7642_v31 = vpop.f32.mrf.mxu0 }
0x112d   : > { %v6086_v59 = vmax.f32 %v7642_v31, 0.0 }
0x112e   : > { %v5926_v22 = vpop.f32.mrf.mxu0 }
0x112f   : > { %6118 = vst.msk [vmem:[%s10333_s14 + $0x8] sm:$0xff] %vm480_vm0, %v6086_v59  ;;  %v6085_v26 = vmax.f32 %v5926_v22, 0.0  ;;  %7624 = vmatmul.mubr.msk.f32.gmra.mxu1 %vm1199_vm3, %v10207_v0 }
0x1130   : > { %7626 = vmatprep.mubr.msk.f32.mxu1 %vm1199_vm3, %v10210_v58  ;;  %v7645_v1 = vpop.f32.mrf.mxu0 }
0x1131   : > { %6117 = vst.msk [vmem:[%s10333_s14] sm:$0xff] %vm480_vm0, %v6085_v26  ;;  %v6088_v21 = vmax.f32 %v7645_v1, 0.0 }
0x1132   : > { %v5936_v41 = vpop.f32.mrf.mxu0 }
0x1133   : > { %6120 = vst.msk [vmem:[%s10333_s14 + $0x18] sm:$0xff] %vm480_vm0, %v6088_v21  ;;  %v6087_v30 = vmax.f32 %v5936_v41, 0.0  ;;  %7627 = vmatmul.mubr.msk.f32.gmra.mxu1 %vm1199_vm3, %v10217_v20 }
0x1134   : > { %7629 = vmatprep.mubr.msk.f32.mxu1 %vm1199_vm3, %v10220_v28  ;;  %v7648_v0 = vpop.f32.mrf.mxu0 }
0x1135   : > { %6119 = vst.msk [vmem:[%s10333_s14 + $0x10] sm:$0xff] %vm480_vm0, %v6087_v30  ;;  %v6090_v58 = vmax.f32 %v7648_v0, 0.0 }
0x1136   : > { %v5946_v34 = vpop.f32.mrf.mxu0 }
0x1137   : > { %6122 = vst.msk [vmem:[%s10333_s14 + $0x28] sm:$0xff] %vm480_vm0, %v6090_v58  ;;  %v6089_v50 = vmax.f32 %v5946_v34, 0.0  ;;  %7630 = vmatmul.mubr.msk.f32.gmra.mxu1 %vm1199_vm3, %v10227_v63 }
0x1138   : > { %v7651_v51 = vpop.f32.mrf.mxu0 }
0x1139   : > { %6121 = vst.msk [vmem:[%s10333_s14 + $0x20] sm:$0xff] %vm480_vm0, %v6089_v50  ;;  %v6092_v20 = vmax.f32 %v7651_v51, 0.0 }
0x113a   : > { %v5956_v17 = vpop.f32.mrf.mxu0 }
0x113b   : > { %6124 = vst.msk [vmem:[%s10333_s14 + $0x38] sm:$0xff] %vm480_vm0, %v6092_v20  ;;  %v6091_v28 = vmax.f32 %v5956_v17, 0.0 }
0x113c   : > { %v7654_v61 = vpop.f32.mrf.mxu0 }
0x113d   : > { %6123 = vst.msk [vmem:[%s10333_s14 + $0x30] sm:$0xff] %vm480_vm0, %v6091_v28  ;;  %v6094_v29 = vmax.f32 %v7654_v61, 0.0 }
0x113e   : > { %v5966_v35 = vpop.f32.mrf.mxu0 }
0x113f   : > { %6126 = vst.msk [vmem:[%s10333_s14 + $0x48] sm:$0xff] %vm480_vm0, %v6094_v29  ;;  %v6093_v63 = vmax.f32 %v5966_v35, 0.0 }
0x1140   : > { %v7657_v15 = vpop.f32.mrf.mxu0 }
0x1141   : > { %6125 = vst.msk [vmem:[%s10333_s14 + $0x40] sm:$0xff] %vm480_vm0, %v6093_v63  ;;  %v6096_v47 = vmax.f32 %v7657_v15, 0.0 }
0x1142   : > { %v5976_v2 = vpop.f32.mrf.mxu0 }
0x1143   : > { %6128 = vst.msk [vmem:[%s10333_s14 + $0x58] sm:$0xff] %vm480_vm0, %v6096_v47  ;;  %v6095_v62 = vmax.f32 %v5976_v2, 0.0 }
0x1144   : > { %v7660_v53 = vpop.f32.mrf.mxu0 }
0x1145   : > { %6127 = vst.msk [vmem:[%s10333_s14 + $0x50] sm:$0xff] %vm480_vm0, %v6095_v62  ;;  %v6098_v52 = vmax.f32 %v7660_v53, 0.0 }
0x1146   : > { %v5986_v49 = vpop.f32.mrf.mxu0 }
0x1147   : > { %6130 = vst.msk [vmem:[%s10333_s14 + $0x68] sm:$0xff] %vm480_vm0, %v6098_v52  ;;  %v6097_v56 = vmax.f32 %v5986_v49, 0.0 }
0x1148   : > { %v7663_v16 = vpop.f32.mrf.mxu0 }
0x1149   : > { %6129 = vst.msk [vmem:[%s10333_s14 + $0x60] sm:$0xff] %vm480_vm0, %v6097_v56  ;;  %v6100_v3 = vmax.f32 %v7663_v16, 0.0 }
0x114a   : > { %v5996_v42 = vpop.f32.mrf.mxu0 }
0x114b   : > { %6132 = vst.msk [vmem:[%s10333_s14 + $0x78] sm:$0xff] %vm480_vm0, %v6100_v3  ;;  %v6099_v48 = vmax.f32 %v5996_v42, 0.0 }
0x114c   : > { %v7666_v4 = vpop.f32.mrf.mxu0 }
0x114d   : > { %6131 = vst.msk [vmem:[%s10333_s14 + $0x70] sm:$0xff] %vm480_vm0, %v6099_v48  ;;  %v6102_v27 = vmax.f32 %v7666_v4, 0.0 }
0x114e   : > { %v6006_v33 = vpop.f32.mrf.mxu0 }
0x114f   : > { %6134 = vst.msk [vmem:[%s10333_s14 + $0x88] sm:$0xff] %vm480_vm0, %v6102_v27  ;;  %v6101_v40 = vmax.f32 %v6006_v33, 0.0 }
0x1150   : > { %v7669_v24 = vpop.f32.mrf.mxu0 }
0x1151   : > { %6133 = vst.msk [vmem:[%s10333_s14 + $0x80] sm:$0xff] %vm480_vm0, %v6101_v40  ;;  %v6104_v60 = vmax.f32 %v7669_v24, 0.0 }
0x1152   : > { %v6016_v46 = vpop.f32.mrf.mxu0 }
0x1153   : > { %6136 = vst.msk [vmem:[%s10333_s14 + $0x98] sm:$0xff] %vm480_vm0, %v6104_v60  ;;  %v6103_v14 = vmax.f32 %v6016_v46, 0.0 }
0x1154   : > { %v7672_v43 = vpop.f32.mrf.mxu0 }
0x1155   : > { %6135 = vst.msk [vmem:[%s10333_s14 + $0x90] sm:$0xff] %vm480_vm0, %v6103_v14  ;;  %v6106_v11 = vmax.f32 %v7672_v43, 0.0 }
0x1156   : > { %v6026_v44 = vpop.f32.mrf.mxu0 }
0x1157   : > { %6138 = vst.msk [vmem:[%s10333_s14 + $0xa8] sm:$0xff] %vm480_vm0, %v6106_v11  ;;  %v6105_v45 = vmax.f32 %v6026_v44, 0.0 }
0x1158   : > { %v7675_v25 = vpop.f32.mrf.mxu0 }
0x1159   : > { %6137 = vst.msk [vmem:[%s10333_s14 + $0xa0] sm:$0xff] %vm480_vm0, %v6105_v45  ;;  %v6108_v10 = vmax.f32 %v7675_v25, 0.0 }
0x115a   : > { %v6036_v57 = vpop.f32.mrf.mxu0 }
0x115b   : > { %6140 = vst.msk [vmem:[%s10333_s14 + $0xb8] sm:$0xff] %vm480_vm0, %v6108_v10  ;;  %v6107_v7 = vmax.f32 %v6036_v57, 0.0 }
0x115d   : > { %6139 = vst.msk [vmem:[%s10333_s14 + $0xb0] sm:$0xff] %vm480_vm0, %v6107_v7 }
0x11eb   : > { %v7622_v37 = vpop.f32.mrf.mxu1 }
0x11ed   : > { %v5713_v19 = vpop.f32.mrf.mxu1 }
0x11ee   : > { %8122 = vtanh.f32 %v5713_v19 }
0x11ef   : > { %8124 = vtanh.f32 %v7622_v37  ;;  %v7625_v54 = vpop.f32.mrf.mxu1 }
0x11f1   : > { %v5723_v23 = vpop.f32.mrf.mxu1 }
0x11f2   : > { %8126 = vtanh.f32 %v5723_v23 }
0x11f3   : > { %8128 = vtanh.f32 %v7625_v54  ;;  %v7628_v18 = vpop.f32.mrf.mxu1 }
0x11f5   : > { %v5733_v39 = vpop.f32.mrf.mxu1 }
0x11f6   : > { %8130 = vtanh.f32 %v5733_v39 }
0x11f7   : > { %8132 = vtanh.f32 %v7628_v18  ;;  %v7631_v5 = vpop.f32.mrf.mxu1 }
0x11f9   : > { %v5743_v36 = vpop.f32.mrf.mxu1 }
0x11fa   : > { %8134 = vtanh.f32 %v5743_v36 }
0x11fb   : > { %v8123_v13 = vpop.eup %8122  ;;  %8136 = vtanh.f32 %v7631_v5 }
0x11fc   : > { %v8125_v12 = vpop.eup %8124  ;;  %7676 = vmatprep.mubr.msk.f32.mxu0 %vm480_vm0, %v8123_v13 }
0x11fd   : > { %7677 = vmatmul.mubr.msk.f32.gmra.mxu0 %vm480_vm0, %v8125_v12 }
0x11ff   : > { %v8127_v9 = vpop.eup %8126 }
0x1200   : > { %v8129_v55 = vpop.eup %8128  ;;  %7679 = vmatprep.mubr.msk.f32.mxu0 %vm480_vm0, %v8127_v9 }
0x1201   : > { %7680 = vmatmul.mubr.msk.f32.gmra.mxu0 %vm480_vm0, %v8129_v55 }
0x1203   : > { %v8131_v8 = vpop.eup %8130 }
0x1204   : > { %v8133_v38 = vpop.eup %8132  ;;  %7682 = vmatprep.mubr.msk.f32.mxu0 %vm480_vm0, %v8131_v8 }
0x1205   : > { %7683 = vmatmul.mubr.msk.f32.gmra.mxu0 %vm480_vm0, %v8133_v38 }
0x1207   : > { %v8135_v6 = vpop.eup %8134 }
0x1208   : > { %v8137_v32 = vpop.eup %8136  ;;  %7685 = vmatprep.mubr.msk.f32.mxu0 %vm480_vm0, %v8135_v6 }
0x1209   : > { %7686 = vmatmul.mubr.msk.f32.gmra.mxu0 %vm480_vm0, %v8137_v32 }
0x12bd   : > { %v7678_v31 = vpop.f32.mrf.mxu0 }
0x12be   : > { %v6110_v59 = vmax.f32 %v7678_v31, 0.0 }
0x12bf   : > { %v6046_v22 = vpop.f32.mrf.mxu0 }
0x12c0   : > { %6142 = vst.msk [vmem:[%s10333_s14 + $0xc8] sm:$0xff] %vm480_vm0, %v6110_v59  ;;  %v6109_v26 = vmax.f32 %v6046_v22, 0.0 }
0x12c1   : > { %v7681_v1 = vpop.f32.mrf.mxu0 }
0x12c2   : > { %6141 = vst.msk [vmem:[%s10333_s14 + $0xc0] sm:$0xff] %vm480_vm0, %v6109_v26  ;;  %v6112_v21 = vmax.f32 %v7681_v1, 0.0 }
0x12c3   : > { %v6056_v41 = vpop.f32.mrf.mxu0 }
0x12c4   : > { %6144 = vst.msk [vmem:[%s10333_s14 + $0xd8] sm:$0xff] %vm480_vm0, %v6112_v21  ;;  %v6111_v30 = vmax.f32 %v6056_v41, 0.0 }
0x12c5   : > { %v7684_v0 = vpop.f32.mrf.mxu0 }
0x12c6   : > { %6143 = vst.msk [vmem:[%s10333_s14 + $0xd0] sm:$0xff] %vm480_vm0, %v6111_v30  ;;  %v6114_v58 = vmax.f32 %v7684_v0, 0.0 }
0x12c7   : > { %v6066_v34 = vpop.f32.mrf.mxu0 }
0x12c8   : > { %6146 = vst.msk [vmem:[%s10333_s14 + $0xe8] sm:$0xff] %vm480_vm0, %v6114_v58  ;;  %v6113_v50 = vmax.f32 %v6066_v34, 0.0 }
0x12c9   : > { %v7687_v51 = vpop.f32.mrf.mxu0 }
0x12ca   : > { %6145 = vst.msk [vmem:[%s10333_s14 + $0xe0] sm:$0xff] %vm480_vm0, %v6113_v50  ;;  %v6116_v20 = vmax.f32 %v7687_v51, 0.0 }
0x12cb   : > { %v6076_v17 = vpop.f32.mrf.mxu0 }
0x12cc   : > { %6148 = vst.msk [vmem:[%s10333_s14 + $0xf8] sm:$0xff] %vm480_vm0, %v6116_v20  ;;  %v6115_v28 = vmax.f32 %v6076_v17, 0.0 }
0x12ce   : > { %6147 = vst.msk [vmem:[%s10333_s14 + $0xf0] sm:$0xff] %vm480_vm0, %v6115_v28 }
0x12cf PF: > { %s20_s13 = sadd.s32 1, %s8172_s13  }
0x12d0   : > { %p17_p5 = scmp.ge.s32.totalorder %s20_s13, 4  }
0x12d2   :  { %19 = sbr.rel (!%p17_p5) target bundleno = 1 (0x1), region = 100 }

</bundles_post_ra>
